<compile_context>
chip_gen: v6e
topology: v6e:2x2x1
jax: 0.10.0
libtpu: 0.0.40
codegen_flags: <defaults>
</compile_context>

<pallas_src>
import functools
import math

import jax
import jax.numpy as jnp
from jax.experimental import pallas as pl
from jax.experimental.pallas import tpu as pltpu

# ----------------------------- config ---------------------------------------
B = 2           # batch
S_SRC = 16      # source sequence length
S_TGT = 8       # target sequence length
H = 32          # hidden size
VOCAB = 64      # vocab size
N_HEADS = 4
D_HEAD = H // N_HEADS
FFN = 64
MAX_POS = 32
NEG_BIG = -10000.0   # unified masking bias magnitude


# ----------------------------- Pallas kernels -------------------------------
def _layer_norm_inkernel(y, g, b, eps=1e-5):
    mu = jnp.mean(y, axis=-1, keepdims=True)
    var = jnp.mean((y - mu) ** 2, axis=-1, keepdims=True)
    return (y - mu) * jax.lax.rsqrt(var + eps) * g + b


def _embed_kernel(n2t_ref, emb_ref, nmask_ref, pos_ref, g_ref, beta_ref, o_ref):
    """graph-mix + position-embedding add + embedding LayerNorm, one batch row."""
    n2t = n2t_ref[0]                      # [S, S]
    emb = emb_ref[0]                      # [S, H]
    nm = nmask_ref[0]                     # [S, 1]
    pe = pos_ref[0]                       # [S, H]
    denom = jnp.sum(n2t, axis=-1, keepdims=True) + 1e-10
    avg = jnp.dot(n2t / denom, emb, preferred_element_type=jnp.float32)
    mixed = emb * (1.0 - nm) + avg * nm
    y = _layer_norm_inkernel(mixed + pe, g_ref[...], beta_ref[...])
    o_ref[0] = y.astype(o_ref.dtype)


def fused_embed(n2t, emb, nodes_mask_f, pos_e, ln_g, ln_b):
    Bd, S, Hd = emb.shape
    return pl.pallas_call(
        _embed_kernel,
        out_shape=jax.ShapeDtypeStruct((Bd, S, Hd), jnp.float32),
        grid=(Bd,),
        in_specs=[
            pl.BlockSpec((1, S, S), lambda b: (b, 0, 0)),
            pl.BlockSpec((1, S, Hd), lambda b: (b, 0, 0)),
            pl.BlockSpec((1, S, 1), lambda b: (b, 0, 0)),
            pl.BlockSpec((1, S, Hd), lambda b: (b, 0, 0)),
            pl.BlockSpec((1, Hd), lambda b: (0, 0)),
            pl.BlockSpec((1, Hd), lambda b: (0, 0)),
        ],
        out_specs=pl.BlockSpec((1, S, Hd), lambda b: (b, 0, 0)),
        compiler_params=pltpu.CompilerParams(dimension_semantics=("parallel",)),
    )(n2t, emb, nodes_mask_f, pos_e, ln_g.reshape(1, Hd), ln_b.reshape(1, Hd))


def _mha_block_kernel(*refs, n_heads, d_head, scale, causal,
                      has_rel, has_attn2d, has_kpad):
    """Fused: QKV projection, all-head attention (bias built in-kernel),
    output projection, residual add and LayerNorm — one batch row per step."""
    (xq_ref, xkv_ref, wq_ref, bq_ref, wkv_ref, bkv_ref,
     wo_ref, bo_ref, g_ref, beta_ref) = refs[:10]
    pos = 10
    rel_ref = attn2d_ref = kpad_ref = None
    if has_rel:
        rel_ref = refs[pos]; pos += 1
    if has_attn2d:
        attn2d_ref = refs[pos]; pos += 1
    if has_kpad:
        kpad_ref = refs[pos]; pos += 1
    o_ref = refs[pos]

    xq = xq_ref[0]                        # [T, H]
    xkv = xkv_ref[0]                      # [S, H]
    T, Hd = xq.shape
    S = xkv.shape[0]

    # fused projections: bf16 MXU operands, f32 accumulation
    q = jnp.dot(xq.astype(jnp.bfloat16), wq_ref[...].astype(jnp.bfloat16),
                preferred_element_type=jnp.float32) + bq_ref[...]
    kv = jnp.dot(xkv.astype(jnp.bfloat16), wkv_ref[...].astype(jnp.bfloat16),
                 preferred_element_type=jnp.float32) + bkv_ref[...]
    k = kv[:, :Hd]
    v = kv[:, Hd:]

    # additive attention bias, computed in-kernel (no [B*nH,T,S] HBM bias)
    bias = jnp.zeros((T, S), jnp.float32)
    if causal:
        rows = jax.lax.broadcasted_iota(jnp.int32, (T, S), 0)
        cols = jax.lax.broadcasted_iota(jnp.int32, (T, S), 1)
        bias = bias + jnp.where(cols <= rows, 0.0, NEG_BIG)
    if has_attn2d:
        bias = bias + (1.0 - attn2d_ref[0]) * NEG_BIG            # [S,S]
    if has_kpad:
        bias = bias + (1.0 - kpad_ref[0]) * NEG_BIG              # [1,S] bcast
    rel_all = rel_ref[0] if has_rel else None                    # [nH, S, S]

    wo = wo_ref[...]
    acc = jnp.zeros((T, Hd), jnp.float32)
    for h in range(n_heads):                                     # unrolled heads
        qh = q[:, h * d_head:(h + 1) * d_head]
        kh = k[:, h * d_head:(h + 1) * d_head]
        vh = v[:, h * d_head:(h + 1) * d_head]
        s = jnp.dot(qh, kh.T, preferred_element_type=jnp.float32) * scale + bias
        if has_rel:
            s = s + rel_all[h]
        m = jnp.max(s, axis=-1, keepdims=True)
        p = jnp.exp(s - m)
        p = p * pl.reciprocal(jnp.sum(p, axis=-1, keepdims=True), approx=True)
        oh = jnp.dot(p, vh, preferred_element_type=jnp.float32)  # [T, dh]
        woh = wo[h * d_head:(h + 1) * d_head, :]                 # [dh, H]
        acc = acc + jnp.dot(oh.astype(jnp.bfloat16), woh.astype(jnp.bfloat16),
                            preferred_element_type=jnp.float32)
    proj = acc + bo_ref[...]

    # fused residual + LayerNorm epilogue
    y = _layer_norm_inkernel(xq + proj, g_ref[...], beta_ref[...])
    o_ref[0] = y.astype(o_ref.dtype)


def fused_mha_block(x_q, x_kv, p, ln_g, ln_b, *, rel_pos=None, attn_mask2d=None,
                    key_pad=None, causal=False):
    Bd, T, Hd = x_q.shape
    S = x_kv.shape[1]
    scale = 1.0 / math.sqrt(D_HEAD)
    inputs = [x_q, x_kv, p["wq"], p["bq"].reshape(1, Hd),
              p["wkv"], p["bkv"].reshape(1, 2 * Hd),
              p["wo"], p["bo"].reshape(1, Hd),
              ln_g.reshape(1, Hd), ln_b.reshape(1, Hd)]
    in_specs = [
        pl.BlockSpec((1, T, Hd), lambda b: (b, 0, 0)),
        pl.BlockSpec((1, S, Hd), lambda b: (b, 0, 0)),
        pl.BlockSpec((Hd, Hd), lambda b: (0, 0)),
        pl.BlockSpec((1, Hd), lambda b: (0, 0)),
        pl.BlockSpec((Hd, 2 * Hd), lambda b: (0, 0)),
        pl.BlockSpec((1, 2 * Hd), lambda b: (0, 0)),
        pl.BlockSpec((Hd, Hd), lambda b: (0, 0)),
        pl.BlockSpec((1, Hd), lambda b: (0, 0)),
        pl.BlockSpec((1, Hd), lambda b: (0, 0)),
        pl.BlockSpec((1, Hd), lambda b: (0, 0)),
    ]
    has_rel = rel_pos is not None
    has_attn2d = attn_mask2d is not None
    has_kpad = key_pad is not None
    if has_rel:
        inputs.append(rel_pos)           # [B, nH, S, S]
        in_specs.append(pl.BlockSpec((1, N_HEADS, S, S), lambda b: (b, 0, 0, 0)))
    if has_attn2d:
        inputs.append(attn_mask2d)       # [B, S, S]
        in_specs.append(pl.BlockSpec((1, S, S), lambda b: (b, 0, 0)))
    if has_kpad:
        inputs.append(key_pad)           # [B, 1, S]
        in_specs.append(pl.BlockSpec((1, 1, S), lambda b: (b, 0, 0)))
    kernel = functools.partial(
        _mha_block_kernel, n_heads=N_HEADS, d_head=D_HEAD, scale=scale,
        causal=causal, has_rel=has_rel, has_attn2d=has_attn2d, has_kpad=has_kpad)
    return pl.pallas_call(
        kernel,
        out_shape=jax.ShapeDtypeStruct((Bd, T, Hd), jnp.float32),
        grid=(Bd,),
        in_specs=in_specs,
        out_specs=pl.BlockSpec((1, T, Hd), lambda b: (b, 0, 0)),
        compiler_params=pltpu.CompilerParams(dimension_semantics=("parallel",)),
    )(*inputs)


def _ffn_block_kernel(x_ref, w1_ref, b1_ref, w2_ref, b2_ref, g_ref, beta_ref, o_ref):
    """Fused FFN: w1 + relu + w2 + residual + LayerNorm, one batch row."""
    x = x_ref[0]                          # [T, H]
    h1 = jnp.dot(x.astype(jnp.bfloat16), w1_ref[...].astype(jnp.bfloat16),
                 preferred_element_type=jnp.float32) + b1_ref[...]
    h1 = jnp.maximum(h1, 0.0)
    h2 = jnp.dot(h1.astype(jnp.bfloat16), w2_ref[...].astype(jnp.bfloat16),
                 preferred_element_type=jnp.float32) + b2_ref[...]
    y = _layer_norm_inkernel(x + h2, g_ref[...], beta_ref[...])
    o_ref[0] = y.astype(o_ref.dtype)


def fused_ffn_block(x, p, ln_g, ln_b):
    Bd, T, Hd = x.shape
    return pl.pallas_call(
        _ffn_block_kernel,
        out_shape=jax.ShapeDtypeStruct((Bd, T, Hd), jnp.float32),
        grid=(Bd,),
        in_specs=[
            pl.BlockSpec((1, T, Hd), lambda b: (b, 0, 0)),
            pl.BlockSpec((Hd, FFN), lambda b: (0, 0)),
            pl.BlockSpec((1, FFN), lambda b: (0, 0)),
            pl.BlockSpec((FFN, Hd), lambda b: (0, 0)),
            pl.BlockSpec((1, Hd), lambda b: (0, 0)),
            pl.BlockSpec((1, Hd), lambda b: (0, 0)),
            pl.BlockSpec((1, Hd), lambda b: (0, 0)),
        ],
        out_specs=pl.BlockSpec((1, T, Hd), lambda b: (b, 0, 0)),
        compiler_params=pltpu.CompilerParams(dimension_semantics=("parallel",)),
    )(x, p["w1"], p["b1"].reshape(1, FFN), p["w2"], p["b2"].reshape(1, Hd),
      ln_g.reshape(1, Hd), ln_b.reshape(1, Hd))


def _head_ce_kernel(x_ref, dw_ref, db_ref, emb_ref, lab_ref, nll_ref, cnt_ref):
    """Fused dense+tanh, tied lm_head (un-transposed [V,H] weight via
    dot_general), masked cross-entropy; accumulates over the batch grid axis."""
    @pl.when(pl.program_id(0) == 0)
    def _():
        nll_ref[...] = jnp.zeros_like(nll_ref)
        cnt_ref[...] = jnp.zeros_like(cnt_ref)

    x = x_ref[0]                                        # [T-1, H]
    hidden = jnp.tanh(
        jnp.dot(x.astype(jnp.bfloat16), dw_ref[...].astype(jnp.bfloat16),
                preferred_element_type=jnp.float32) + db_ref[...])
    logits = jax.lax.dot_general(                       # [T-1, V]
        hidden.astype(jnp.bfloat16), emb_ref[...].astype(jnp.bfloat16),
        (((1,), (1,)), ((), ())), preferred_element_type=jnp.float32)
    labels = lab_ref[0]                                 # [T-1, 1] int32 (-1 = ignore)
    m = jnp.max(logits, axis=-1, keepdims=True)
    lse = jnp.log(jnp.sum(jnp.exp(logits - m), axis=-1, keepdims=True)) + m
    cols = jax.lax.broadcasted_iota(jnp.int32, logits.shape, 1)
    onehot = (cols == labels).astype(jnp.float32)
    picked = jnp.sum(logits * onehot, axis=-1, keepdims=True)
    valid = (labels != -1).astype(jnp.float32)
    nll = (lse - picked) * valid
    nll_ref[...] += jnp.sum(nll, axis=0, keepdims=True)
    cnt_ref[...] += jnp.sum(valid, axis=0, keepdims=True)


def fused_head_ce(x, dense_w, dense_b, word_emb, labels_eff):
    """x: [B, T-1, H], labels_eff: [B, T-1, 1] (label or -1) -> (nll_sum, count)."""
    Bd, Tm1, Hd = x.shape
    V = word_emb.shape[0]
    nll, cnt = pl.pallas_call(
        _head_ce_kernel,
        out_shape=(jax.ShapeDtypeStruct((1, 1), jnp.float32),
                   jax.ShapeDtypeStruct((1, 1), jnp.float32)),
        grid=(Bd,),
        in_specs=[
            pl.BlockSpec((1, Tm1, Hd), lambda b: (b, 0, 0)),
            pl.BlockSpec((Hd, Hd), lambda b: (0, 0)),
            pl.BlockSpec((1, Hd), lambda b: (0, 0)),
            pl.BlockSpec((V, Hd), lambda b: (0, 0)),
            pl.BlockSpec((1, Tm1, 1), lambda b: (b, 0, 0)),
        ],
        out_specs=(pl.BlockSpec((1, 1), lambda b: (0, 0)),
                   pl.BlockSpec((1, 1), lambda b: (0, 0))),
        compiler_params=pltpu.CompilerParams(dimension_semantics=("arbitrary",)),
    )(x, dense_w, dense_b.reshape(1, Hd), word_emb, labels_eff)
    return nll[0, 0], cnt[0, 0]


# ----------------------------- plain-JAX glue --------------------------------
def layer_norm(x, g, b, eps=1e-5):
    mu = jnp.mean(x, axis=-1, keepdims=True)
    var = jnp.mean((x - mu) ** 2, axis=-1, keepdims=True)
    return (x - mu) * jax.lax.rsqrt(var + eps) * g + b


# ----------------------------- parameters ------------------------------------
def init_linear(key, din, dout, scale=0.02):
    k1, k2 = jax.random.split(key)
    w = scale * jax.random.normal(k1, (din, dout), jnp.float32)
    b = scale * jax.random.normal(k2, (dout,), jnp.float32)
    return w, b


def init_mha(key):
    ks = jax.random.split(key, 3)
    p = {}
    p["wq"], p["bq"] = init_linear(ks[0], H, H)
    p["wkv"], p["bkv"] = init_linear(ks[1], H, 2 * H)   # fused K|V projection
    p["wo"], p["bo"] = init_linear(ks[2], H, H)
    return p


def init_ffn(key):
    k1, k2 = jax.random.split(key)
    p = {}
    p["w1"], p["b1"] = init_linear(k1, H, FFN)
    p["w2"], p["b2"] = init_linear(k2, FFN, H)
    return p


def init_ln(_key):
    return jnp.ones((H,), jnp.float32), jnp.zeros((H,), jnp.float32)


def init_params(key):
    ks = jax.random.split(key, 16)
    p = {}
    p["word_emb"] = 0.02 * jax.random.normal(ks[0], (VOCAB, H), jnp.float32)
    p["pos_emb"] = 0.02 * jax.random.normal(ks[1], (MAX_POS, H), jnp.float32)
    p["emb_ln"] = init_ln(ks[2])
    # encoder (single self-attn + FFN layer stand-in)
    p["enc_attn"] = init_mha(ks[3])
    p["enc_ln1"] = init_ln(ks[4])
    p["enc_ffn"] = init_ffn(ks[5])
    p["enc_ln2"] = init_ln(ks[6])
    # decoder (single TransformerDecoderLayer stand-in)
    p["dec_self"] = init_mha(ks[7])
    p["dec_ln1"] = init_ln(ks[8])
    p["dec_cross"] = init_mha(ks[9])
    p["dec_ln2"] = init_ln(ks[10])
    p["dec_ffn"] = init_ffn(ks[11])
    p["dec_ln3"] = init_ln(ks[12])
    # dense head; lm_head weight is tied to word_emb (used un-transposed in-kernel)
    p["dense_w"], p["dense_b"] = init_linear(ks[13], H, H)
    return p


# ----------------------------- Seq2Seq forward (training path) ---------------
def seq2seq_forward(params, source_ids, source_mask, position_idx, attn_mask,
                    rel_pos, target_ids, target_mask):
    # --- graph-guided embedding mix (GraphCodeBERT style) ---
    nodes_mask = (position_idx == -1)
    token_mask = (position_idx == -2)
    inputs_embeddings = params["word_emb"][source_ids]                    # [B,S,H]
    n2t = (nodes_mask[:, :, None] & token_mask[:, None, :]
           & attn_mask.astype(bool)).astype(jnp.float32)                  # [B,S,S]
    position_idx_c = jnp.clip(position_idx, 0, MAX_POS - 1)
    pos_e = params["pos_emb"][position_idx_c]                             # [B,S,H]

    # fused: graph mix + position add + embedding LayerNorm
    h = fused_embed(n2t, inputs_embeddings,
                    nodes_mask[:, :, None].astype(jnp.float32), pos_e,
                    *params["emb_ln"])

    # --- encoder stand-in (fused self-attn block + fused FFN block) ---
    attn_mask_f = attn_mask.astype(jnp.float32)
    h = fused_mha_block(h, h, params["enc_attn"], *params["enc_ln1"],
                        rel_pos=rel_pos, attn_mask2d=attn_mask_f)
    h = fused_ffn_block(h, params["enc_ffn"], *params["enc_ln2"])
    encoder_output = h                                                    # [B,S_src,H]

    # --- target embeddings (shared embedding module); LN fuses into XLA gathers ---
    T = target_ids.shape[1]
    tgt = params["word_emb"][target_ids] + params["pos_emb"][jnp.arange(T)][None]
    tgt = layer_norm(tgt, *params["emb_ln"])

    # --- decoder stand-in (fused self-attn + cross-attn + FFN blocks) ---
    tgt = fused_mha_block(tgt, tgt, params["dec_self"], *params["dec_ln1"],
                          causal=True)
    src_kpad = source_mask.astype(jnp.float32)[:, None, :]                # [B,1,S]
    tgt = fused_mha_block(tgt, encoder_output, params["dec_cross"],
                          *params["dec_ln2"], key_pad=src_kpad)
    out = fused_ffn_block(tgt, params["dec_ffn"], *params["dec_ln3"])     # [B,T,H]

    # --- fused head + shifted masked cross-entropy ---
    active = (target_mask[:, 1:] != 0)                                    # [B,T-1]
    shift_labels = target_ids[:, 1:]
    labels_eff = jnp.where(active, shift_labels, -1).astype(jnp.int32)[..., None]
    out_shift = out[:, :-1, :]                                            # [B,T-1,H]
    nll_sum, valid_cnt = fused_head_ce(out_shift, params["dense_w"],
                                       params["dense_b"], params["word_emb"],
                                       labels_eff)
    loss = nll_sum / jnp.maximum(valid_cnt, 1.0)                          # /0 guard
    active_sum = jnp.sum(active.astype(jnp.float32))
    return loss, loss * active_sum, active_sum


# ----------------------------- main ------------------------------------------
if __name__ == "__main__":
    key = jax.random.PRNGKey(0)
    kp, k1, k2, k3, k4, k5, k6 = jax.random.split(key, 7)

    params = init_params(kp)

    source_ids = jax.random.randint(k1, (B, S_SRC), 0, VOCAB, dtype=jnp.int32)
    # source_mask: last 3 positions padded
    source_mask = jnp.concatenate(
        [jnp.ones((B, S_SRC - 3), jnp.int32), jnp.zeros((B, 3), jnp.int32)], axis=1)
    # position_idx: first 10 tokens (-2), next 3 graph nodes (-1), rest normal.
    pos_row = jnp.concatenate([
        jnp.full((10,), -2, jnp.int32),
        jnp.full((3,), -1, jnp.int32),
        jnp.arange(3, dtype=jnp.int32) + 2,
    ])
    position_idx = jnp.tile(pos_row[None, :], (B, 1))
    attn_mask = jnp.ones((B, S_SRC, S_SRC), jnp.int32)
    rel_pos = 0.1 * jax.random.normal(k4, (B, N_HEADS, S_SRC, S_SRC), jnp.float32)
    target_ids = jax.random.randint(k5, (B, S_TGT), 0, VOCAB, dtype=jnp.int32)
    target_mask = jnp.concatenate(
        [jnp.ones((B, S_TGT - 2), jnp.int32), jnp.zeros((B, 2), jnp.int32)], axis=1)

    fwd = jax.jit(seq2seq_forward)
    loss, scaled_loss, active_sum = fwd(params, source_ids, source_mask,
                                        position_idx, attn_mask, rel_pos,
                                        target_ids, target_mask)
    jax.block_until_ready((loss, scaled_loss, active_sum))
    assert jnp.isfinite(loss), "loss is not finite"
    print("KERNEL_OK")
</pallas_src>

<mosaic_0001>
module attributes {stable_mosaic.version = 11 : i64} {
  func.func @_mha_block_kernel(%arg0: i32, %arg1: memref<1x8x32xf32, #tpu.memory_space<vmem>>, %arg2: memref<1x8x32xf32, #tpu.memory_space<vmem>>, %arg3: memref<32x32xf32, #tpu.memory_space<vmem>>, %arg4: memref<1x32xf32, #tpu.memory_space<vmem>>, %arg5: memref<32x64xf32, #tpu.memory_space<vmem>>, %arg6: memref<1x64xf32, #tpu.memory_space<vmem>>, %arg7: memref<32x32xf32, #tpu.memory_space<vmem>>, %arg8: memref<1x32xf32, #tpu.memory_space<vmem>>, %arg9: memref<1x32xf32, #tpu.memory_space<vmem>>, %arg10: memref<1x32xf32, #tpu.memory_space<vmem>>, %arg11: memref<1x8x32xf32, #tpu.memory_space<vmem>>) attributes {dimension_semantics = [#tpu.dimension_semantics<parallel>], iteration_bounds = array<i64: 2>, scalar_prefetch = 0 : i64, scratch_operands = 0 : i64, tpu.core_type = #tpu.core_type<tc>, window_params = [{transform_indices = @transform_0, window_bounds = array<i64: 1, 8, 32>}, {transform_indices = @transform_1, window_bounds = array<i64: 1, 8, 32>}, {pipeline_mode = #tpu.pipeline_mode<synchronous>, transform_indices = @transform_2, window_bounds = array<i64: 32, 32>}, {pipeline_mode = #tpu.pipeline_mode<synchronous>, transform_indices = @transform_3, window_bounds = array<i64: 1, 32>}, {pipeline_mode = #tpu.pipeline_mode<synchronous>, transform_indices = @transform_4, window_bounds = array<i64: 32, 64>}, {pipeline_mode = #tpu.pipeline_mode<synchronous>, transform_indices = @transform_5, window_bounds = array<i64: 1, 64>}, {pipeline_mode = #tpu.pipeline_mode<synchronous>, transform_indices = @transform_6, window_bounds = array<i64: 32, 32>}, {pipeline_mode = #tpu.pipeline_mode<synchronous>, transform_indices = @transform_7, window_bounds = array<i64: 1, 32>}, {pipeline_mode = #tpu.pipeline_mode<synchronous>, transform_indices = @transform_8, window_bounds = array<i64: 1, 32>}, {pipeline_mode = #tpu.pipeline_mode<synchronous>, transform_indices = @transform_9, window_bounds = array<i64: 1, 32>}, {transform_indices = @transform_10, window_bounds = array<i64: 1, 8, 32>}]} {
    %c0 = arith.constant 0 : index
    %c0_0 = arith.constant 0 : index
    %c0_1 = arith.constant 0 : index
    %0 = vector.load %arg1[%c0, %c0_0, %c0_1] : memref<1x8x32xf32, #tpu.memory_space<vmem>>, vector<1x8x32xf32>
    %1 = vector.shape_cast %0 : vector<1x8x32xf32> to vector<8x32xf32>
    %c0_2 = arith.constant 0 : index
    %c0_3 = arith.constant 0 : index
    %c0_4 = arith.constant 0 : index
    %2 = vector.load %arg2[%c0_2, %c0_3, %c0_4] : memref<1x8x32xf32, #tpu.memory_space<vmem>>, vector<1x8x32xf32>
    %3 = vector.shape_cast %2 : vector<1x8x32xf32> to vector<8x32xf32>
    %4 = arith.truncf %1 : vector<8x32xf32> to vector<8x32xbf16>
    %c0_5 = arith.constant 0 : index
    %c0_6 = arith.constant 0 : index
    %5 = vector.load %arg3[%c0_5, %c0_6] : memref<32x32xf32, #tpu.memory_space<vmem>>, vector<32x32xf32>
    %6 = arith.truncf %5 : vector<32x32xf32> to vector<32x32xbf16>
    %cst = arith.constant dense<0.000000e+00> : vector<8x32xf32>
    %7 = tpu.matmul %4, %6, %cst {dimension_numbers = #tpu.dot_dimension_numbers<[1], [0], [0], [1], [0, 0, 1, 1], [], []>} : vector<8x32xbf16>, vector<32x32xbf16>, vector<8x32xf32> -> vector<8x32xf32>
    %c0_7 = arith.constant 0 : index
    %c0_8 = arith.constant 0 : index
    %8 = vector.load %arg4[%c0_7, %c0_8] : memref<1x32xf32, #tpu.memory_space<vmem>>, vector<1x32xf32>
    %9 = vector.broadcast %8 : vector<1x32xf32> to vector<8x32xf32>
    %10 = arith.addf %7, %9 : vector<8x32xf32>
    %11 = arith.truncf %3 : vector<8x32xf32> to vector<8x32xbf16>
    %c0_9 = arith.constant 0 : index
    %c0_10 = arith.constant 0 : index
    %12 = vector.load %arg5[%c0_9, %c0_10] : memref<32x64xf32, #tpu.memory_space<vmem>>, vector<32x64xf32>
    %13 = arith.truncf %12 : vector<32x64xf32> to vector<32x64xbf16>
    %cst_11 = arith.constant dense<0.000000e+00> : vector<8x64xf32>
    %14 = tpu.matmul %11, %13, %cst_11 {dimension_numbers = #tpu.dot_dimension_numbers<[1], [0], [0], [1], [0, 0, 1, 1], [], []>} : vector<8x32xbf16>, vector<32x64xbf16>, vector<8x64xf32> -> vector<8x64xf32>
    %c0_12 = arith.constant 0 : index
    %c0_13 = arith.constant 0 : index
    %15 = vector.load %arg6[%c0_12, %c0_13] : memref<1x64xf32, #tpu.memory_space<vmem>>, vector<1x64xf32>
    %16 = vector.broadcast %15 : vector<1x64xf32> to vector<8x64xf32>
    %17 = arith.addf %14, %16 : vector<8x64xf32>
    %18 = vector.extract_strided_slice %17 {offsets = [0, 0], sizes = [8, 32], strides = [1, 1]} : vector<8x64xf32> to vector<8x32xf32>
    %19 = vector.extract_strided_slice %17 {offsets = [0, 32], sizes = [8, 32], strides = [1, 1]} : vector<8x64xf32> to vector<8x32xf32>
    %cst_14 = arith.constant 0.000000e+00 : f32
    %20 = vector.broadcast %cst_14 : f32 to vector<8x8xf32>
    %21 = tpu.iota {dimensions = array<i32: 0>} : vector<8x8xi32>
    %22 = tpu.iota {dimensions = array<i32: 1>} : vector<8x8xi32>
    %23 = arith.cmpi sle, %22, %21 : vector<8x8xi32>
    %cst_15 = arith.constant 0.000000e+00 : f32
    %cst_16 = arith.constant -1.000000e+04 : f32
    %24 = vector.broadcast %cst_15 : f32 to vector<8x8xf32>
    %25 = vector.broadcast %cst_16 : f32 to vector<8x8xf32>
    %26 = arith.select %23, %24, %25 : vector<8x8xi1>, vector<8x8xf32>
    %27 = arith.addf %20, %26 : vector<8x8xf32>
    %c0_17 = arith.constant 0 : index
    %c0_18 = arith.constant 0 : index
    %28 = vector.load %arg7[%c0_17, %c0_18] : memref<32x32xf32, #tpu.memory_space<vmem>>, vector<32x32xf32>
    %cst_19 = arith.constant 0.000000e+00 : f32
    %29 = vector.broadcast %cst_19 : f32 to vector<8x32xf32>
    %30 = vector.extract_strided_slice %10 {offsets = [0, 0], sizes = [8, 8], strides = [1, 1]} : vector<8x32xf32> to vector<8x8xf32>
    %31 = vector.extract_strided_slice %18 {offsets = [0, 0], sizes = [8, 8], strides = [1, 1]} : vector<8x32xf32> to vector<8x8xf32>
    %32 = vector.extract_strided_slice %19 {offsets = [0, 0], sizes = [8, 8], strides = [1, 1]} : vector<8x32xf32> to vector<8x8xf32>
    %33 = tpu.transpose %31, [1, 0] : vector<8x8xf32> -> vector<8x8xf32>
    %cst_20 = arith.constant dense<0.000000e+00> : vector<8x8xf32>
    %34 = tpu.matmul %30, %33, %cst_20 {dimension_numbers = #tpu.dot_dimension_numbers<[1], [0], [0], [1], [0, 0, 1, 1], [], []>} : vector<8x8xf32>, vector<8x8xf32>, vector<8x8xf32> -> vector<8x8xf32>
    %cst_21 = arith.constant 0.353553385 : f32
    %35 = vector.broadcast %cst_21 : f32 to vector<8x8xf32>
    %36 = arith.mulf %34, %35 : vector<8x8xf32>
    %37 = arith.addf %36, %27 : vector<8x8xf32>
    %cst_22 = arith.constant dense<0xFF800000> : vector<8xf32>
    %38 = vector.multi_reduction <maximumf>, %37, %cst_22 [1] : vector<8x8xf32> to vector<8xf32>
    %39 = vector.shape_cast %38 : vector<8xf32> to vector<8x1xf32>
    %40 = vector.broadcast %39 : vector<8x1xf32> to vector<8x8xf32>
    %41 = arith.subf %37, %40 : vector<8x8xf32>
    %42 = math.exp %41 : vector<8x8xf32>
    %cst_23 = arith.constant dense<0.000000e+00> : vector<8xf32>
    %43 = vector.multi_reduction <add>, %42, %cst_23 [1] : vector<8x8xf32> to vector<8xf32>
    %44 = vector.shape_cast %43 : vector<8xf32> to vector<8x1xf32>
    %45 = tpu.reciprocal %44 {approx = true} : vector<8x1xf32> -> vector<8x1xf32>
    %46 = vector.broadcast %45 : vector<8x1xf32> to vector<8x8xf32>
    %47 = arith.mulf %42, %46 : vector<8x8xf32>
    %cst_24 = arith.constant dense<0.000000e+00> : vector<8x8xf32>
    %48 = tpu.matmul %47, %32, %cst_24 {dimension_numbers = #tpu.dot_dimension_numbers<[1], [0], [0], [1], [0, 0, 1, 1], [], []>} : vector<8x8xf32>, vector<8x8xf32>, vector<8x8xf32> -> vector<8x8xf32>
    %49 = vector.extract_strided_slice %28 {offsets = [0, 0], sizes = [8, 32], strides = [1, 1]} : vector<32x32xf32> to vector<8x32xf32>
    %50 = arith.truncf %48 : vector<8x8xf32> to vector<8x8xbf16>
    %51 = arith.truncf %49 : vector<8x32xf32> to vector<8x32xbf16>
    %cst_25 = arith.constant dense<0.000000e+00> : vector<8x32xf32>
    %52 = tpu.matmul %50, %51, %cst_25 {dimension_numbers = #tpu.dot_dimension_numbers<[1], [0], [0], [1], [0, 0, 1, 1], [], []>} : vector<8x8xbf16>, vector<8x32xbf16>, vector<8x32xf32> -> vector<8x32xf32>
    %53 = arith.addf %29, %52 : vector<8x32xf32>
    %54 = vector.extract_strided_slice %10 {offsets = [0, 8], sizes = [8, 8], strides = [1, 1]} : vector<8x32xf32> to vector<8x8xf32>
    %55 = vector.extract_strided_slice %18 {offsets = [0, 8], sizes = [8, 8], strides = [1, 1]} : vector<8x32xf32> to vector<8x8xf32>
    %56 = vector.extract_strided_slice %19 {offsets = [0, 8], sizes = [8, 8], strides = [1, 1]} : vector<8x32xf32> to vector<8x8xf32>
    %57 = tpu.transpose %55, [1, 0] : vector<8x8xf32> -> vector<8x8xf32>
    %cst_26 = arith.constant dense<0.000000e+00> : vector<8x8xf32>
    %58 = tpu.matmul %54, %57, %cst_26 {dimension_numbers = #tpu.dot_dimension_numbers<[1], [0], [0], [1], [0, 0, 1, 1], [], []>} : vector<8x8xf32>, vector<8x8xf32>, vector<8x8xf32> -> vector<8x8xf32>
    %cst_27 = arith.constant 0.353553385 : f32
    %59 = vector.broadcast %cst_27 : f32 to vector<8x8xf32>
    %60 = arith.mulf %58, %59 : vector<8x8xf32>
    %61 = arith.addf %60, %27 : vector<8x8xf32>
    %cst_28 = arith.constant dense<0xFF800000> : vector<8xf32>
    %62 = vector.multi_reduction <maximumf>, %61, %cst_28 [1] : vector<8x8xf32> to vector<8xf32>
    %63 = vector.shape_cast %62 : vector<8xf32> to vector<8x1xf32>
    %64 = vector.broadcast %63 : vector<8x1xf32> to vector<8x8xf32>
    %65 = arith.subf %61, %64 : vector<8x8xf32>
    %66 = math.exp %65 : vector<8x8xf32>
    %cst_29 = arith.constant dense<0.000000e+00> : vector<8xf32>
    %67 = vector.multi_reduction <add>, %66, %cst_29 [1] : vector<8x8xf32> to vector<8xf32>
    %68 = vector.shape_cast %67 : vector<8xf32> to vector<8x1xf32>
    %69 = tpu.reciprocal %68 {approx = true} : vector<8x1xf32> -> vector<8x1xf32>
    %70 = vector.broadcast %69 : vector<8x1xf32> to vector<8x8xf32>
    %71 = arith.mulf %66, %70 : vector<8x8xf32>
    %cst_30 = arith.constant dense<0.000000e+00> : vector<8x8xf32>
    %72 = tpu.matmul %71, %56, %cst_30 {dimension_numbers = #tpu.dot_dimension_numbers<[1], [0], [0], [1], [0, 0, 1, 1], [], []>} : vector<8x8xf32>, vector<8x8xf32>, vector<8x8xf32> -> vector<8x8xf32>
    %73 = vector.extract_strided_slice %28 {offsets = [8, 0], sizes = [8, 32], strides = [1, 1]} : vector<32x32xf32> to vector<8x32xf32>
    %74 = arith.truncf %72 : vector<8x8xf32> to vector<8x8xbf16>
    %75 = arith.truncf %73 : vector<8x32xf32> to vector<8x32xbf16>
    %cst_31 = arith.constant dense<0.000000e+00> : vector<8x32xf32>
    %76 = tpu.matmul %74, %75, %cst_31 {dimension_numbers = #tpu.dot_dimension_numbers<[1], [0], [0], [1], [0, 0, 1, 1], [], []>} : vector<8x8xbf16>, vector<8x32xbf16>, vector<8x32xf32> -> vector<8x32xf32>
    %77 = arith.addf %53, %76 : vector<8x32xf32>
    %78 = vector.extract_strided_slice %10 {offsets = [0, 16], sizes = [8, 8], strides = [1, 1]} : vector<8x32xf32> to vector<8x8xf32>
    %79 = vector.extract_strided_slice %18 {offsets = [0, 16], sizes = [8, 8], strides = [1, 1]} : vector<8x32xf32> to vector<8x8xf32>
    %80 = vector.extract_strided_slice %19 {offsets = [0, 16], sizes = [8, 8], strides = [1, 1]} : vector<8x32xf32> to vector<8x8xf32>
    %81 = tpu.transpose %79, [1, 0] : vector<8x8xf32> -> vector<8x8xf32>
    %cst_32 = arith.constant dense<0.000000e+00> : vector<8x8xf32>
    %82 = tpu.matmul %78, %81, %cst_32 {dimension_numbers = #tpu.dot_dimension_numbers<[1], [0], [0], [1], [0, 0, 1, 1], [], []>} : vector<8x8xf32>, vector<8x8xf32>, vector<8x8xf32> -> vector<8x8xf32>
    %cst_33 = arith.constant 0.353553385 : f32
    %83 = vector.broadcast %cst_33 : f32 to vector<8x8xf32>
    %84 = arith.mulf %82, %83 : vector<8x8xf32>
    %85 = arith.addf %84, %27 : vector<8x8xf32>
    %cst_34 = arith.constant dense<0xFF800000> : vector<8xf32>
    %86 = vector.multi_reduction <maximumf>, %85, %cst_34 [1] : vector<8x8xf32> to vector<8xf32>
    %87 = vector.shape_cast %86 : vector<8xf32> to vector<8x1xf32>
    %88 = vector.broadcast %87 : vector<8x1xf32> to vector<8x8xf32>
    %89 = arith.subf %85, %88 : vector<8x8xf32>
    %90 = math.exp %89 : vector<8x8xf32>
    %cst_35 = arith.constant dense<0.000000e+00> : vector<8xf32>
    %91 = vector.multi_reduction <add>, %90, %cst_35 [1] : vector<8x8xf32> to vector<8xf32>
    %92 = vector.shape_cast %91 : vector<8xf32> to vector<8x1xf32>
    %93 = tpu.reciprocal %92 {approx = true} : vector<8x1xf32> -> vector<8x1xf32>
    %94 = vector.broadcast %93 : vector<8x1xf32> to vector<8x8xf32>
    %95 = arith.mulf %90, %94 : vector<8x8xf32>
    %cst_36 = arith.constant dense<0.000000e+00> : vector<8x8xf32>
    %96 = tpu.matmul %95, %80, %cst_36 {dimension_numbers = #tpu.dot_dimension_numbers<[1], [0], [0], [1], [0, 0, 1, 1], [], []>} : vector<8x8xf32>, vector<8x8xf32>, vector<8x8xf32> -> vector<8x8xf32>
    %97 = vector.extract_strided_slice %28 {offsets = [16, 0], sizes = [8, 32], strides = [1, 1]} : vector<32x32xf32> to vector<8x32xf32>
    %98 = arith.truncf %96 : vector<8x8xf32> to vector<8x8xbf16>
    %99 = arith.truncf %97 : vector<8x32xf32> to vector<8x32xbf16>
    %cst_37 = arith.constant dense<0.000000e+00> : vector<8x32xf32>
    %100 = tpu.matmul %98, %99, %cst_37 {dimension_numbers = #tpu.dot_dimension_numbers<[1], [0], [0], [1], [0, 0, 1, 1], [], []>} : vector<8x8xbf16>, vector<8x32xbf16>, vector<8x32xf32> -> vector<8x32xf32>
    %101 = arith.addf %77, %100 : vector<8x32xf32>
    %102 = vector.extract_strided_slice %10 {offsets = [0, 24], sizes = [8, 8], strides = [1, 1]} : vector<8x32xf32> to vector<8x8xf32>
    %103 = vector.extract_strided_slice %18 {offsets = [0, 24], sizes = [8, 8], strides = [1, 1]} : vector<8x32xf32> to vector<8x8xf32>
    %104 = vector.extract_strided_slice %19 {offsets = [0, 24], sizes = [8, 8], strides = [1, 1]} : vector<8x32xf32> to vector<8x8xf32>
    %105 = tpu.transpose %103, [1, 0] : vector<8x8xf32> -> vector<8x8xf32>
    %cst_38 = arith.constant dense<0.000000e+00> : vector<8x8xf32>
    %106 = tpu.matmul %102, %105, %cst_38 {dimension_numbers = #tpu.dot_dimension_numbers<[1], [0], [0], [1], [0, 0, 1, 1], [], []>} : vector<8x8xf32>, vector<8x8xf32>, vector<8x8xf32> -> vector<8x8xf32>
    %cst_39 = arith.constant 0.353553385 : f32
    %107 = vector.broadcast %cst_39 : f32 to vector<8x8xf32>
    %108 = arith.mulf %106, %107 : vector<8x8xf32>
    %109 = arith.addf %108, %27 : vector<8x8xf32>
    %cst_40 = arith.constant dense<0xFF800000> : vector<8xf32>
    %110 = vector.multi_reduction <maximumf>, %109, %cst_40 [1] : vector<8x8xf32> to vector<8xf32>
    %111 = vector.shape_cast %110 : vector<8xf32> to vector<8x1xf32>
    %112 = vector.broadcast %111 : vector<8x1xf32> to vector<8x8xf32>
    %113 = arith.subf %109, %112 : vector<8x8xf32>
    %114 = math.exp %113 : vector<8x8xf32>
    %cst_41 = arith.constant dense<0.000000e+00> : vector<8xf32>
    %115 = vector.multi_reduction <add>, %114, %cst_41 [1] : vector<8x8xf32> to vector<8xf32>
    %116 = vector.shape_cast %115 : vector<8xf32> to vector<8x1xf32>
    %117 = tpu.reciprocal %116 {approx = true} : vector<8x1xf32> -> vector<8x1xf32>
    %118 = vector.broadcast %117 : vector<8x1xf32> to vector<8x8xf32>
    %119 = arith.mulf %114, %118 : vector<8x8xf32>
    %cst_42 = arith.constant dense<0.000000e+00> : vector<8x8xf32>
    %120 = tpu.matmul %119, %104, %cst_42 {dimension_numbers = #tpu.dot_dimension_numbers<[1], [0], [0], [1], [0, 0, 1, 1], [], []>} : vector<8x8xf32>, vector<8x8xf32>, vector<8x8xf32> -> vector<8x8xf32>
    %121 = vector.extract_strided_slice %28 {offsets = [24, 0], sizes = [8, 32], strides = [1, 1]} : vector<32x32xf32> to vector<8x32xf32>
    %122 = arith.truncf %120 : vector<8x8xf32> to vector<8x8xbf16>
    %123 = arith.truncf %121 : vector<8x32xf32> to vector<8x32xbf16>
    %cst_43 = arith.constant dense<0.000000e+00> : vector<8x32xf32>
    %124 = tpu.matmul %122, %123, %cst_43 {dimension_numbers = #tpu.dot_dimension_numbers<[1], [0], [0], [1], [0, 0, 1, 1], [], []>} : vector<8x8xbf16>, vector<8x32xbf16>, vector<8x32xf32> -> vector<8x32xf32>
    %125 = arith.addf %101, %124 : vector<8x32xf32>
    %c0_44 = arith.constant 0 : index
    %c0_45 = arith.constant 0 : index
    %126 = vector.load %arg8[%c0_44, %c0_45] : memref<1x32xf32, #tpu.memory_space<vmem>>, vector<1x32xf32>
    %127 = vector.broadcast %126 : vector<1x32xf32> to vector<8x32xf32>
    %128 = arith.addf %125, %127 : vector<8x32xf32>
    %129 = arith.addf %1, %128 : vector<8x32xf32>
    %c0_46 = arith.constant 0 : index
    %c0_47 = arith.constant 0 : index
    %130 = vector.load %arg9[%c0_46, %c0_47] : memref<1x32xf32, #tpu.memory_space<vmem>>, vector<1x32xf32>
    %c0_48 = arith.constant 0 : index
    %c0_49 = arith.constant 0 : index
    %131 = vector.load %arg10[%c0_48, %c0_49] : memref<1x32xf32, #tpu.memory_space<vmem>>, vector<1x32xf32>
    %cst_50 = arith.constant dense<0.000000e+00> : vector<8xf32>
    %132 = vector.multi_reduction <add>, %129, %cst_50 [1] : vector<8x32xf32> to vector<8xf32>
    %133 = vector.shape_cast %132 : vector<8xf32> to vector<8x1xf32>
    %cst_51 = arith.constant 3.200000e+01 : f32
    %134 = vector.broadcast %cst_51 : f32 to vector<8x1xf32>
    %135 = arith.divf %133, %134 : vector<8x1xf32>
    %136 = vector.broadcast %135 : vector<8x1xf32> to vector<8x32xf32>
    %137 = arith.subf %129, %136 : vector<8x32xf32>
    %138 = arith.mulf %137, %137 : vector<8x32xf32>
    %cst_52 = arith.constant dense<0.000000e+00> : vector<8xf32>
    %139 = vector.multi_reduction <add>, %138, %cst_52 [1] : vector<8x32xf32> to vector<8xf32>
    %140 = vector.shape_cast %139 : vector<8xf32> to vector<8x1xf32>
    %cst_53 = arith.constant 3.200000e+01 : f32
    %141 = vector.broadcast %cst_53 : f32 to vector<8x1xf32>
    %142 = arith.divf %140, %141 : vector<8x1xf32>
    %143 = vector.broadcast %135 : vector<8x1xf32> to vector<8x32xf32>
    %144 = arith.subf %129, %143 : vector<8x32xf32>
    %cst_54 = arith.constant 9.99999974E-6 : f32
    %145 = vector.broadcast %cst_54 : f32 to vector<8x1xf32>
    %146 = arith.addf %142, %145 : vector<8x1xf32>
    %147 = math.rsqrt %146 : vector<8x1xf32>
    %148 = vector.broadcast %147 : vector<8x1xf32> to vector<8x32xf32>
    %149 = arith.mulf %144, %148 : vector<8x32xf32>
    %150 = vector.broadcast %130 : vector<1x32xf32> to vector<8x32xf32>
    %151 = arith.mulf %149, %150 : vector<8x32xf32>
    %152 = vector.broadcast %131 : vector<1x32xf32> to vector<8x32xf32>
    %153 = arith.addf %151, %152 : vector<8x32xf32>
    %c0_55 = arith.constant 0 : index
    %c0_56 = arith.constant 0 : index
    %c0_57 = arith.constant 0 : index
    %154 = vector.load %arg11[%c0_55, %c0_56, %c0_57] : memref<1x8x32xf32, #tpu.memory_space<vmem>>, vector<1x8x32xf32>
    %155 = vector.shape_cast %154 : vector<1x8x32xf32> to vector<8x32xf32>
    %156 = vector.shape_cast %153 : vector<8x32xf32> to vector<1x8x32xf32>
    tpu.vector_store %arg11[%c0_55, %c0_56, %c0_57], %156 {strides = array<i32>} : memref<1x8x32xf32, #tpu.memory_space<vmem>>, vector<1x8x32xf32>,
    return
  }
  func.func @transform_0(%arg0: i32) -> (i32, i32, i32) {
    %c0_i32 = arith.constant 0 : i32
    %c0_i32_0 = arith.constant 0 : i32
    %c0_i32_1 = arith.constant 0 : i32
    return %arg0, %c0_i32, %c0_i32_0 : i32, i32, i32
  }
  func.func @transform_1(%arg0: i32) -> (i32, i32, i32) {
    %c0_i32 = arith.constant 0 : i32
    %c0_i32_0 = arith.constant 0 : i32
    %c0_i32_1 = arith.constant 0 : i32
    return %arg0, %c0_i32, %c0_i32_0 : i32, i32, i32
  }
  func.func @transform_2(%arg0: i32) -> (i32, i32) {
    %c0_i32 = arith.constant 0 : i32
    %c0_i32_0 = arith.constant 0 : i32
    %c0_i32_1 = arith.constant 0 : i32
    return %c0_i32, %c0_i32_0 : i32, i32
  }
  func.func @transform_3(%arg0: i32) -> (i32, i32) {
    %c0_i32 = arith.constant 0 : i32
    %c0_i32_0 = arith.constant 0 : i32
    %c0_i32_1 = arith.constant 0 : i32
    return %c0_i32, %c0_i32_0 : i32, i32
  }
  func.func @transform_4(%arg0: i32) -> (i32, i32) {
    %c0_i32 = arith.constant 0 : i32
    %c0_i32_0 = arith.constant 0 : i32
    %c0_i32_1 = arith.constant 0 : i32
    return %c0_i32, %c0_i32_0 : i32, i32
  }
  func.func @transform_5(%arg0: i32) -> (i32, i32) {
    %c0_i32 = arith.constant 0 : i32
    %c0_i32_0 = arith.constant 0 : i32
    %c0_i32_1 = arith.constant 0 : i32
    return %c0_i32, %c0_i32_0 : i32, i32
  }
  func.func @transform_6(%arg0: i32) -> (i32, i32) {
    %c0_i32 = arith.constant 0 : i32
    %c0_i32_0 = arith.constant 0 : i32
    %c0_i32_1 = arith.constant 0 : i32
    return %c0_i32, %c0_i32_0 : i32, i32
  }
  func.func @transform_7(%arg0: i32) -> (i32, i32) {
    %c0_i32 = arith.constant 0 : i32
    %c0_i32_0 = arith.constant 0 : i32
    %c0_i32_1 = arith.constant 0 : i32
    return %c0_i32, %c0_i32_0 : i32, i32
  }
  func.func @transform_8(%arg0: i32) -> (i32, i32) {
    %c0_i32 = arith.constant 0 : i32
    %c0_i32_0 = arith.constant 0 : i32
    %c0_i32_1 = arith.constant 0 : i32
    return %c0_i32, %c0_i32_0 : i32, i32
  }
  func.func @transform_9(%arg0: i32) -> (i32, i32) {
    %c0_i32 = arith.constant 0 : i32
    %c0_i32_0 = arith.constant 0 : i32
    %c0_i32_1 = arith.constant 0 : i32
    return %c0_i32, %c0_i32_0 : i32, i32
  }
  func.func @transform_10(%arg0: i32) -> (i32, i32, i32) {
    %c0_i32 = arith.constant 0 : i32
    %c0_i32_0 = arith.constant 0 : i32
    %c0_i32_1 = arith.constant 0 : i32
    return %arg0, %c0_i32, %c0_i32_0 : i32, i32, i32
  }
}

module attributes {stable_mosaic.version = 11 : i64} {
  func.func @_embed_kernel(%arg0: i32, %arg1: memref<1x16x16xf32, #tpu.memory_space<vmem>>, %arg2: memref<1x16x32xf32, #tpu.memory_space<vmem>>, %arg3: memref<1x16x1xf32, #tpu.memory_space<vmem>>, %arg4: memref<1x16x32xf32, #tpu.memory_space<vmem>>, %arg5: memref<1x32xf32, #tpu.memory_space<vmem>>, %arg6: memref<1x32xf32, #tpu.memory_space<vmem>>, %arg7: memref<1x16x32xf32, #tpu.memory_space<vmem>>) attributes {dimension_semantics = [#tpu.dimension_semantics<parallel>], iteration_bounds = array<i64: 2>, scalar_prefetch = 0 : i64, scratch_operands = 0 : i64, tpu.core_type = #tpu.core_type<tc>, window_params = [{transform_indices = @transform_0, window_bounds = array<i64: 1, 16, 16>}, {transform_indices = @transform_1, window_bounds = array<i64: 1, 16, 32>}, {transform_indices = @transform_2, window_bounds = array<i64: 1, 16, 1>}, {transform_indices = @transform_3, window_bounds = array<i64: 1, 16, 32>}, {pipeline_mode = #tpu.pipeline_mode<synchronous>, transform_indices = @transform_4, window_bounds = array<i64: 1, 32>}, {pipeline_mode = #tpu.pipeline_mode<synchronous>, transform_indices = @transform_5, window_bounds = array<i64: 1, 32>}, {transform_indices = @transform_6, window_bounds = array<i64: 1, 16, 32>}]} {
    %c0 = arith.constant 0 : index
    %c0_0 = arith.constant 0 : index
    %c0_1 = arith.constant 0 : index
    %0 = vector.load %arg1[%c0, %c0_0, %c0_1] : memref<1x16x16xf32, #tpu.memory_space<vmem>>, vector<1x16x16xf32>
    %1 = vector.shape_cast %0 : vector<1x16x16xf32> to vector<16x16xf32>
    %c0_2 = arith.constant 0 : index
    %c0_3 = arith.constant 0 : index
    %c0_4 = arith.constant 0 : index
    %2 = vector.load %arg2[%c0_2, %c0_3, %c0_4] : memref<1x16x32xf32, #tpu.memory_space<vmem>>, vector<1x16x32xf32>
    %3 = vector.shape_cast %2 : vector<1x16x32xf32> to vector<16x32xf32>
    %c0_5 = arith.constant 0 : index
    %c0_6 = arith.constant 0 : index
    %c0_7 = arith.constant 0 : index
    %4 = vector.load %arg3[%c0_5, %c0_6, %c0_7] : memref<1x16x1xf32, #tpu.memory_space<vmem>>, vector<1x16x1xf32>
    %5 = vector.shape_cast %4 : vector<1x16x1xf32> to vector<16x1xf32>
    %c0_8 = arith.constant 0 : index
    %c0_9 = arith.constant 0 : index
    %c0_10 = arith.constant 0 : index
    %6 = vector.load %arg4[%c0_8, %c0_9, %c0_10] : memref<1x16x32xf32, #tpu.memory_space<vmem>>, vector<1x16x32xf32>
    %7 = vector.shape_cast %6 : vector<1x16x32xf32> to vector<16x32xf32>
    %cst = arith.constant dense<0.000000e+00> : vector<16xf32>
    %8 = vector.multi_reduction <add>, %1, %cst [1] : vector<16x16xf32> to vector<16xf32>
    %9 = vector.shape_cast %8 : vector<16xf32> to vector<16x1xf32>
    %cst_11 = arith.constant 1.000000e-10 : f32
    %10 = vector.broadcast %cst_11 : f32 to vector<16x1xf32>
    %11 = arith.addf %9, %10 : vector<16x1xf32>
    %12 = vector.broadcast %11 : vector<16x1xf32> to vector<16x16xf32>
    %13 = arith.divf %1, %12 : vector<16x16xf32>
    %cst_12 = arith.constant dense<0.000000e+00> : vector<16x32xf32>
    %14 = tpu.matmul %13, %3, %cst_12 {dimension_numbers = #tpu.dot_dimension_numbers<[1], [0], [0], [1], [0, 0, 1, 1], [], []>} : vector<16x16xf32>, vector<16x32xf32>, vector<16x32xf32> -> vector<16x32xf32>
    %cst_13 = arith.constant 1.000000e+00 : f32
    %15 = vector.broadcast %cst_13 : f32 to vector<16x1xf32>
    %16 = arith.subf %15, %5 : vector<16x1xf32>
    %17 = vector.broadcast %16 : vector<16x1xf32> to vector<16x32xf32>
    %18 = arith.mulf %3, %17 : vector<16x32xf32>
    %19 = vector.broadcast %5 : vector<16x1xf32> to vector<16x32xf32>
    %20 = arith.mulf %14, %19 : vector<16x32xf32>
    %21 = arith.addf %18, %20 : vector<16x32xf32>
    %22 = arith.addf %21, %7 : vector<16x32xf32>
    %c0_14 = arith.constant 0 : index
    %c0_15 = arith.constant 0 : index
    %23 = vector.load %arg5[%c0_14, %c0_15] : memref<1x32xf32, #tpu.memory_space<vmem>>, vector<1x32xf32>
    %c0_16 = arith.constant 0 : index
    %c0_17 = arith.constant 0 : index
    %24 = vector.load %arg6[%c0_16, %c0_17] : memref<1x32xf32, #tpu.memory_space<vmem>>, vector<1x32xf32>
    %cst_18 = arith.constant dense<0.000000e+00> : vector<16xf32>
    %25 = vector.multi_reduction <add>, %22, %cst_18 [1] : vector<16x32xf32> to vector<16xf32>
    %26 = vector.shape_cast %25 : vector<16xf32> to vector<16x1xf32>
    %cst_19 = arith.constant 3.200000e+01 : f32
    %27 = vector.broadcast %cst_19 : f32 to vector<16x1xf32>
    %28 = arith.divf %26, %27 : vector<16x1xf32>
    %29 = vector.broadcast %28 : vector<16x1xf32> to vector<16x32xf32>
    %30 = arith.subf %22, %29 : vector<16x32xf32>
    %31 = arith.mulf %30, %30 : vector<16x32xf32>
    %cst_20 = arith.constant dense<0.000000e+00> : vector<16xf32>
    %32 = vector.multi_reduction <add>, %31, %cst_20 [1] : vector<16x32xf32> to vector<16xf32>
    %33 = vector.shape_cast %32 : vector<16xf32> to vector<16x1xf32>
    %cst_21 = arith.constant 3.200000e+01 : f32
    %34 = vector.broadcast %cst_21 : f32 to vector<16x1xf32>
    %35 = arith.divf %33, %34 : vector<16x1xf32>
    %36 = vector.broadcast %28 : vector<16x1xf32> to vector<16x32xf32>
    %37 = arith.subf %22, %36 : vector<16x32xf32>
    %cst_22 = arith.constant 9.99999974E-6 : f32
    %38 = vector.broadcast %cst_22 : f32 to vector<16x1xf32>
    %39 = arith.addf %35, %38 : vector<16x1xf32>
    %40 = math.rsqrt %39 : vector<16x1xf32>
    %41 = vector.broadcast %40 : vector<16x1xf32> to vector<16x32xf32>
    %42 = arith.mulf %37, %41 : vector<16x32xf32>
    %43 = vector.broadcast %23 : vector<1x32xf32> to vector<16x32xf32>
    %44 = arith.mulf %42, %43 : vector<16x32xf32>
    %45 = vector.broadcast %24 : vector<1x32xf32> to vector<16x32xf32>
    %46 = arith.addf %44, %45 : vector<16x32xf32>
    %c0_23 = arith.constant 0 : index
    %c0_24 = arith.constant 0 : index
    %c0_25 = arith.constant 0 : index
    %47 = vector.load %arg7[%c0_23, %c0_24, %c0_25] : memref<1x16x32xf32, #tpu.memory_space<vmem>>, vector<1x16x32xf32>
    %48 = vector.shape_cast %47 : vector<1x16x32xf32> to vector<16x32xf32>
    %49 = vector.shape_cast %46 : vector<16x32xf32> to vector<1x16x32xf32>
    tpu.vector_store %arg7[%c0_23, %c0_24, %c0_25], %49 {strides = array<i32>} : memref<1x16x32xf32, #tpu.memory_space<vmem>>, vector<1x16x32xf32>,
    return
  }
  func.func @transform_0(%arg0: i32) -> (i32, i32, i32) {
    %c0_i32 = arith.constant 0 : i32
    %c0_i32_0 = arith.constant 0 : i32
    %c0_i32_1 = arith.constant 0 : i32
    return %arg0, %c0_i32, %c0_i32_0 : i32, i32, i32
  }
  func.func @transform_1(%arg0: i32) -> (i32, i32, i32) {
    %c0_i32 = arith.constant 0 : i32
    %c0_i32_0 = arith.constant 0 : i32
    %c0_i32_1 = arith.constant 0 : i32
    return %arg0, %c0_i32, %c0_i32_0 : i32, i32, i32
  }
  func.func @transform_2(%arg0: i32) -> (i32, i32, i32) {
    %c0_i32 = arith.constant 0 : i32
    %c0_i32_0 = arith.constant 0 : i32
    %c0_i32_1 = arith.constant 0 : i32
    return %arg0, %c0_i32, %c0_i32_0 : i32, i32, i32
  }
  func.func @transform_3(%arg0: i32) -> (i32, i32, i32) {
    %c0_i32 = arith.constant 0 : i32
    %c0_i32_0 = arith.constant 0 : i32
    %c0_i32_1 = arith.constant 0 : i32
    return %arg0, %c0_i32, %c0_i32_0 : i32, i32, i32
  }
  func.func @transform_4(%arg0: i32) -> (i32, i32) {
    %c0_i32 = arith.constant 0 : i32
    %c0_i32_0 = arith.constant 0 : i32
    %c0_i32_1 = arith.constant 0 : i32
    return %c0_i32, %c0_i32_0 : i32, i32
  }
  func.func @transform_5(%arg0: i32) -> (i32, i32) {
    %c0_i32 = arith.constant 0 : i32
    %c0_i32_0 = arith.constant 0 : i32
    %c0_i32_1 = arith.constant 0 : i32
    return %c0_i32, %c0_i32_0 : i32, i32
  }
  func.func @transform_6(%arg0: i32) -> (i32, i32, i32) {
    %c0_i32 = arith.constant 0 : i32
    %c0_i32_0 = arith.constant 0 : i32
    %c0_i32_1 = arith.constant 0 : i32
    return %arg0, %c0_i32, %c0_i32_0 : i32, i32, i32
  }
}

module attributes {stable_mosaic.version = 11 : i64} {
  func.func @_ffn_block_kernel(%arg0: i32, %arg1: memref<1x16x32xf32, #tpu.memory_space<vmem>>, %arg2: memref<32x64xf32, #tpu.memory_space<vmem>>, %arg3: memref<1x64xf32, #tpu.memory_space<vmem>>, %arg4: memref<64x32xf32, #tpu.memory_space<vmem>>, %arg5: memref<1x32xf32, #tpu.memory_space<vmem>>, %arg6: memref<1x32xf32, #tpu.memory_space<vmem>>, %arg7: memref<1x32xf32, #tpu.memory_space<vmem>>, %arg8: memref<1x16x32xf32, #tpu.memory_space<vmem>>) attributes {dimension_semantics = [#tpu.dimension_semantics<parallel>], iteration_bounds = array<i64: 2>, scalar_prefetch = 0 : i64, scratch_operands = 0 : i64, tpu.core_type = #tpu.core_type<tc>, window_params = [{transform_indices = @transform_0, window_bounds = array<i64: 1, 16, 32>}, {pipeline_mode = #tpu.pipeline_mode<synchronous>, transform_indices = @transform_1, window_bounds = array<i64: 32, 64>}, {pipeline_mode = #tpu.pipeline_mode<synchronous>, transform_indices = @transform_2, window_bounds = array<i64: 1, 64>}, {pipeline_mode = #tpu.pipeline_mode<synchronous>, transform_indices = @transform_3, window_bounds = array<i64: 64, 32>}, {pipeline_mode = #tpu.pipeline_mode<synchronous>, transform_indices = @transform_4, window_bounds = array<i64: 1, 32>}, {pipeline_mode = #tpu.pipeline_mode<synchronous>, transform_indices = @transform_5, window_bounds = array<i64: 1, 32>}, {pipeline_mode = #tpu.pipeline_mode<synchronous>, transform_indices = @transform_6, window_bounds = array<i64: 1, 32>}, {transform_indices = @transform_7, window_bounds = array<i64: 1, 16, 32>}]} {
    %c0 = arith.constant 0 : index
    %c0_0 = arith.constant 0 : index
    %c0_1 = arith.constant 0 : index
    %0 = vector.load %arg1[%c0, %c0_0, %c0_1] : memref<1x16x32xf32, #tpu.memory_space<vmem>>, vector<1x16x32xf32>
    %1 = vector.shape_cast %0 : vector<1x16x32xf32> to vector<16x32xf32>
    %2 = arith.truncf %1 : vector<16x32xf32> to vector<16x32xbf16>
    %c0_2 = arith.constant 0 : index
    %c0_3 = arith.constant 0 : index
    %3 = vector.load %arg2[%c0_2, %c0_3] : memref<32x64xf32, #tpu.memory_space<vmem>>, vector<32x64xf32>
    %4 = arith.truncf %3 : vector<32x64xf32> to vector<32x64xbf16>
    %cst = arith.constant dense<0.000000e+00> : vector<16x64xf32>
    %5 = tpu.matmul %2, %4, %cst {dimension_numbers = #tpu.dot_dimension_numbers<[1], [0], [0], [1], [0, 0, 1, 1], [], []>} : vector<16x32xbf16>, vector<32x64xbf16>, vector<16x64xf32> -> vector<16x64xf32>
    %c0_4 = arith.constant 0 : index
    %c0_5 = arith.constant 0 : index
    %6 = vector.load %arg3[%c0_4, %c0_5] : memref<1x64xf32, #tpu.memory_space<vmem>>, vector<1x64xf32>
    %7 = vector.broadcast %6 : vector<1x64xf32> to vector<16x64xf32>
    %8 = arith.addf %5, %7 : vector<16x64xf32>
    %cst_6 = arith.constant 0.000000e+00 : f32
    %9 = vector.broadcast %cst_6 : f32 to vector<16x64xf32>
    %10 = arith.maximumf %8, %9 : vector<16x64xf32>
    %11 = arith.truncf %10 : vector<16x64xf32> to vector<16x64xbf16>
    %c0_7 = arith.constant 0 : index
    %c0_8 = arith.constant 0 : index
    %12 = vector.load %arg4[%c0_7, %c0_8] : memref<64x32xf32, #tpu.memory_space<vmem>>, vector<64x32xf32>
    %13 = arith.truncf %12 : vector<64x32xf32> to vector<64x32xbf16>
    %cst_9 = arith.constant dense<0.000000e+00> : vector<16x32xf32>
    %14 = tpu.matmul %11, %13, %cst_9 {dimension_numbers = #tpu.dot_dimension_numbers<[1], [0], [0], [1], [0, 0, 1, 1], [], []>} : vector<16x64xbf16>, vector<64x32xbf16>, vector<16x32xf32> -> vector<16x32xf32>
    %c0_10 = arith.constant 0 : index
    %c0_11 = arith.constant 0 : index
    %15 = vector.load %arg5[%c0_10, %c0_11] : memref<1x32xf32, #tpu.memory_space<vmem>>, vector<1x32xf32>
    %16 = vector.broadcast %15 : vector<1x32xf32> to vector<16x32xf32>
    %17 = arith.addf %14, %16 : vector<16x32xf32>
    %18 = arith.addf %1, %17 : vector<16x32xf32>
    %c0_12 = arith.constant 0 : index
    %c0_13 = arith.constant 0 : index
    %19 = vector.load %arg6[%c0_12, %c0_13] : memref<1x32xf32, #tpu.memory_space<vmem>>, vector<1x32xf32>
    %c0_14 = arith.constant 0 : index
    %c0_15 = arith.constant 0 : index
    %20 = vector.load %arg7[%c0_14, %c0_15] : memref<1x32xf32, #tpu.memory_space<vmem>>, vector<1x32xf32>
    %cst_16 = arith.constant dense<0.000000e+00> : vector<16xf32>
    %21 = vector.multi_reduction <add>, %18, %cst_16 [1] : vector<16x32xf32> to vector<16xf32>
    %22 = vector.shape_cast %21 : vector<16xf32> to vector<16x1xf32>
    %cst_17 = arith.constant 3.200000e+01 : f32
    %23 = vector.broadcast %cst_17 : f32 to vector<16x1xf32>
    %24 = arith.divf %22, %23 : vector<16x1xf32>
    %25 = vector.broadcast %24 : vector<16x1xf32> to vector<16x32xf32>
    %26 = arith.subf %18, %25 : vector<16x32xf32>
    %27 = arith.mulf %26, %26 : vector<16x32xf32>
    %cst_18 = arith.constant dense<0.000000e+00> : vector<16xf32>
    %28 = vector.multi_reduction <add>, %27, %cst_18 [1] : vector<16x32xf32> to vector<16xf32>
    %29 = vector.shape_cast %28 : vector<16xf32> to vector<16x1xf32>
    %cst_19 = arith.constant 3.200000e+01 : f32
    %30 = vector.broadcast %cst_19 : f32 to vector<16x1xf32>
    %31 = arith.divf %29, %30 : vector<16x1xf32>
    %32 = vector.broadcast %24 : vector<16x1xf32> to vector<16x32xf32>
    %33 = arith.subf %18, %32 : vector<16x32xf32>
    %cst_20 = arith.constant 9.99999974E-6 : f32
    %34 = vector.broadcast %cst_20 : f32 to vector<16x1xf32>
    %35 = arith.addf %31, %34 : vector<16x1xf32>
    %36 = math.rsqrt %35 : vector<16x1xf32>
    %37 = vector.broadcast %36 : vector<16x1xf32> to vector<16x32xf32>
    %38 = arith.mulf %33, %37 : vector<16x32xf32>
    %39 = vector.broadcast %19 : vector<1x32xf32> to vector<16x32xf32>
    %40 = arith.mulf %38, %39 : vector<16x32xf32>
    %41 = vector.broadcast %20 : vector<1x32xf32> to vector<16x32xf32>
    %42 = arith.addf %40, %41 : vector<16x32xf32>
    %c0_21 = arith.constant 0 : index
    %c0_22 = arith.constant 0 : index
    %c0_23 = arith.constant 0 : index
    %43 = vector.load %arg8[%c0_21, %c0_22, %c0_23] : memref<1x16x32xf32, #tpu.memory_space<vmem>>, vector<1x16x32xf32>
    %44 = vector.shape_cast %43 : vector<1x16x32xf32> to vector<16x32xf32>
    %45 = vector.shape_cast %42 : vector<16x32xf32> to vector<1x16x32xf32>
    tpu.vector_store %arg8[%c0_21, %c0_22, %c0_23], %45 {strides = array<i32>} : memref<1x16x32xf32, #tpu.memory_space<vmem>>, vector<1x16x32xf32>,
    return
  }
  func.func @transform_0(%arg0: i32) -> (i32, i32, i32) {
    %c0_i32 = arith.constant 0 : i32
    %c0_i32_0 = arith.constant 0 : i32
    %c0_i32_1 = arith.constant 0 : i32
    return %arg0, %c0_i32, %c0_i32_0 : i32, i32, i32
  }
  func.func @transform_1(%arg0: i32) -> (i32, i32) {
    %c0_i32 = arith.constant 0 : i32
    %c0_i32_0 = arith.constant 0 : i32
    %c0_i32_1 = arith.constant 0 : i32
    return %c0_i32, %c0_i32_0 : i32, i32
  }
  func.func @transform_2(%arg0: i32) -> (i32, i32) {
    %c0_i32 = arith.constant 0 : i32
    %c0_i32_0 = arith.constant 0 : i32
    %c0_i32_1 = arith.constant 0 : i32
    return %c0_i32, %c0_i32_0 : i32, i32
  }
  func.func @transform_3(%arg0: i32) -> (i32, i32) {
    %c0_i32 = arith.constant 0 : i32
    %c0_i32_0 = arith.constant 0 : i32
    %c0_i32_1 = arith.constant 0 : i32
    return %c0_i32, %c0_i32_0 : i32, i32
  }
  func.func @transform_4(%arg0: i32) -> (i32, i32) {
    %c0_i32 = arith.constant 0 : i32
    %c0_i32_0 = arith.constant 0 : i32
    %c0_i32_1 = arith.constant 0 : i32
    return %c0_i32, %c0_i32_0 : i32, i32
  }
  func.func @transform_5(%arg0: i32) -> (i32, i32) {
    %c0_i32 = arith.constant 0 : i32
    %c0_i32_0 = arith.constant 0 : i32
    %c0_i32_1 = arith.constant 0 : i32
    return %c0_i32, %c0_i32_0 : i32, i32
  }
  func.func @transform_6(%arg0: i32) -> (i32, i32) {
    %c0_i32 = arith.constant 0 : i32
    %c0_i32_0 = arith.constant 0 : i32
    %c0_i32_1 = arith.constant 0 : i32
    return %c0_i32, %c0_i32_0 : i32, i32
  }
  func.func @transform_7(%arg0: i32) -> (i32, i32, i32) {
    %c0_i32 = arith.constant 0 : i32
    %c0_i32_0 = arith.constant 0 : i32
    %c0_i32_1 = arith.constant 0 : i32
    return %arg0, %c0_i32, %c0_i32_0 : i32, i32, i32
  }
}

module attributes {stable_mosaic.version = 11 : i64} {
  func.func @_mha_block_kernel(%arg0: i32, %arg1: memref<1x16x32xf32, #tpu.memory_space<vmem>>, %arg2: memref<1x16x32xf32, #tpu.memory_space<vmem>>, %arg3: memref<32x32xf32, #tpu.memory_space<vmem>>, %arg4: memref<1x32xf32, #tpu.memory_space<vmem>>, %arg5: memref<32x64xf32, #tpu.memory_space<vmem>>, %arg6: memref<1x64xf32, #tpu.memory_space<vmem>>, %arg7: memref<32x32xf32, #tpu.memory_space<vmem>>, %arg8: memref<1x32xf32, #tpu.memory_space<vmem>>, %arg9: memref<1x32xf32, #tpu.memory_space<vmem>>, %arg10: memref<1x32xf32, #tpu.memory_space<vmem>>, %arg11: memref<1x4x16x16xf32, #tpu.memory_space<vmem>>, %arg12: memref<1x16x16xf32, #tpu.memory_space<vmem>>, %arg13: memref<1x16x32xf32, #tpu.memory_space<vmem>>) attributes {dimension_semantics = [#tpu.dimension_semantics<parallel>], iteration_bounds = array<i64: 2>, scalar_prefetch = 0 : i64, scratch_operands = 0 : i64, tpu.core_type = #tpu.core_type<tc>, window_params = [{transform_indices = @transform_0, window_bounds = array<i64: 1, 16, 32>}, {transform_indices = @transform_1, window_bounds = array<i64: 1, 16, 32>}, {pipeline_mode = #tpu.pipeline_mode<synchronous>, transform_indices = @transform_2, window_bounds = array<i64: 32, 32>}, {pipeline_mode = #tpu.pipeline_mode<synchronous>, transform_indices = @transform_3, window_bounds = array<i64: 1, 32>}, {pipeline_mode = #tpu.pipeline_mode<synchronous>, transform_indices = @transform_4, window_bounds = array<i64: 32, 64>}, {pipeline_mode = #tpu.pipeline_mode<synchronous>, transform_indices = @transform_5, window_bounds = array<i64: 1, 64>}, {pipeline_mode = #tpu.pipeline_mode<synchronous>, transform_indices = @transform_6, window_bounds = array<i64: 32, 32>}, {pipeline_mode = #tpu.pipeline_mode<synchronous>, transform_indices = @transform_7, window_bounds = array<i64: 1, 32>}, {pipeline_mode = #tpu.pipeline_mode<synchronous>, transform_indices = @transform_8, window_bounds = array<i64: 1, 32>}, {pipeline_mode = #tpu.pipeline_mode<synchronous>, transform_indices = @transform_9, window_bounds = array<i64: 1, 32>}, {transform_indices = @transform_10, window_bounds = array<i64: 1, 4, 16, 16>}, {transform_indices = @transform_11, window_bounds = array<i64: 1, 16, 16>}, {transform_indices = @transform_12, window_bounds = array<i64: 1, 16, 32>}]} {
    %c0 = arith.constant 0 : index
    %c0_0 = arith.constant 0 : index
    %c0_1 = arith.constant 0 : index
    %0 = vector.load %arg1[%c0, %c0_0, %c0_1] : memref<1x16x32xf32, #tpu.memory_space<vmem>>, vector<1x16x32xf32>
    %1 = vector.shape_cast %0 : vector<1x16x32xf32> to vector<16x32xf32>
    %c0_2 = arith.constant 0 : index
    %c0_3 = arith.constant 0 : index
    %c0_4 = arith.constant 0 : index
    %2 = vector.load %arg2[%c0_2, %c0_3, %c0_4] : memref<1x16x32xf32, #tpu.memory_space<vmem>>, vector<1x16x32xf32>
    %3 = vector.shape_cast %2 : vector<1x16x32xf32> to vector<16x32xf32>
    %4 = arith.truncf %1 : vector<16x32xf32> to vector<16x32xbf16>
    %c0_5 = arith.constant 0 : index
    %c0_6 = arith.constant 0 : index
    %5 = vector.load %arg3[%c0_5, %c0_6] : memref<32x32xf32, #tpu.memory_space<vmem>>, vector<32x32xf32>
    %6 = arith.truncf %5 : vector<32x32xf32> to vector<32x32xbf16>
    %cst = arith.constant dense<0.000000e+00> : vector<16x32xf32>
    %7 = tpu.matmul %4, %6, %cst {dimension_numbers = #tpu.dot_dimension_numbers<[1], [0], [0], [1], [0, 0, 1, 1], [], []>} : vector<16x32xbf16>, vector<32x32xbf16>, vector<16x32xf32> -> vector<16x32xf32>
    %c0_7 = arith.constant 0 : index
    %c0_8 = arith.constant 0 : index
    %8 = vector.load %arg4[%c0_7, %c0_8] : memref<1x32xf32, #tpu.memory_space<vmem>>, vector<1x32xf32>
    %9 = vector.broadcast %8 : vector<1x32xf32> to vector<16x32xf32>
    %10 = arith.addf %7, %9 : vector<16x32xf32>
    %11 = arith.truncf %3 : vector<16x32xf32> to vector<16x32xbf16>
    %c0_9 = arith.constant 0 : index
    %c0_10 = arith.constant 0 : index
    %12 = vector.load %arg5[%c0_9, %c0_10] : memref<32x64xf32, #tpu.memory_space<vmem>>, vector<32x64xf32>
    %13 = arith.truncf %12 : vector<32x64xf32> to vector<32x64xbf16>
    %cst_11 = arith.constant dense<0.000000e+00> : vector<16x64xf32>
    %14 = tpu.matmul %11, %13, %cst_11 {dimension_numbers = #tpu.dot_dimension_numbers<[1], [0], [0], [1], [0, 0, 1, 1], [], []>} : vector<16x32xbf16>, vector<32x64xbf16>, vector<16x64xf32> -> vector<16x64xf32>
    %c0_12 = arith.constant 0 : index
    %c0_13 = arith.constant 0 : index
    %15 = vector.load %arg6[%c0_12, %c0_13] : memref<1x64xf32, #tpu.memory_space<vmem>>, vector<1x64xf32>
    %16 = vector.broadcast %15 : vector<1x64xf32> to vector<16x64xf32>
    %17 = arith.addf %14, %16 : vector<16x64xf32>
    %18 = vector.extract_strided_slice %17 {offsets = [0, 0], sizes = [16, 32], strides = [1, 1]} : vector<16x64xf32> to vector<16x32xf32>
    %19 = vector.extract_strided_slice %17 {offsets = [0, 32], sizes = [16, 32], strides = [1, 1]} : vector<16x64xf32> to vector<16x32xf32>
    %cst_14 = arith.constant 0.000000e+00 : f32
    %20 = vector.broadcast %cst_14 : f32 to vector<16x16xf32>
    %c0_15 = arith.constant 0 : index
    %c0_16 = arith.constant 0 : index
    %c0_17 = arith.constant 0 : index
    %21 = vector.load %arg12[%c0_15, %c0_16, %c0_17] : memref<1x16x16xf32, #tpu.memory_space<vmem>>, vector<1x16x16xf32>
    %22 = vector.shape_cast %21 : vector<1x16x16xf32> to vector<16x16xf32>
    %cst_18 = arith.constant 1.000000e+00 : f32
    %23 = vector.broadcast %cst_18 : f32 to vector<16x16xf32>
    %24 = arith.subf %23, %22 : vector<16x16xf32>
    %cst_19 = arith.constant -1.000000e+04 : f32
    %25 = vector.broadcast %cst_19 : f32 to vector<16x16xf32>
    %26 = arith.mulf %24, %25 : vector<16x16xf32>
    %27 = arith.addf %20, %26 : vector<16x16xf32>
    %c0_20 = arith.constant 0 : index
    %c0_21 = arith.constant 0 : index
    %c0_22 = arith.constant 0 : index
    %c0_23 = arith.constant 0 : index
    %28 = vector.load %arg11[%c0_20, %c0_21, %c0_22, %c0_23] : memref<1x4x16x16xf32, #tpu.memory_space<vmem>>, vector<1x4x16x16xf32>
    %29 = vector.shape_cast %28 : vector<1x4x16x16xf32> to vector<4x16x16xf32>
    %c0_24 = arith.constant 0 : index
    %c0_25 = arith.constant 0 : index
    %30 = vector.load %arg7[%c0_24, %c0_25] : memref<32x32xf32, #tpu.memory_space<vmem>>, vector<32x32xf32>
    %cst_26 = arith.constant 0.000000e+00 : f32
    %31 = vector.broadcast %cst_26 : f32 to vector<16x32xf32>
    %32 = vector.extract_strided_slice %10 {offsets = [0, 0], sizes = [16, 8], strides = [1, 1]} : vector<16x32xf32> to vector<16x8xf32>
    %33 = vector.extract_strided_slice %18 {offsets = [0, 0], sizes = [16, 8], strides = [1, 1]} : vector<16x32xf32> to vector<16x8xf32>
    %34 = vector.extract_strided_slice %19 {offsets = [0, 0], sizes = [16, 8], strides = [1, 1]} : vector<16x32xf32> to vector<16x8xf32>
    %35 = tpu.transpose %33, [1, 0] : vector<16x8xf32> -> vector<8x16xf32>
    %cst_27 = arith.constant dense<0.000000e+00> : vector<16x16xf32>
    %36 = tpu.matmul %32, %35, %cst_27 {dimension_numbers = #tpu.dot_dimension_numbers<[1], [0], [0], [1], [0, 0, 1, 1], [], []>} : vector<16x8xf32>, vector<8x16xf32>, vector<16x16xf32> -> vector<16x16xf32>
    %cst_28 = arith.constant 0.353553385 : f32
    %37 = vector.broadcast %cst_28 : f32 to vector<16x16xf32>
    %38 = arith.mulf %36, %37 : vector<16x16xf32>
    %39 = arith.addf %38, %27 : vector<16x16xf32>
    %40 = vector.extract_strided_slice %29 {offsets = [0, 0, 0], sizes = [1, 16, 16], strides = [1, 1, 1]} : vector<4x16x16xf32> to vector<1x16x16xf32>
    %41 = vector.shape_cast %40 : vector<1x16x16xf32> to vector<16x16xf32>
    %42 = arith.addf %39, %41 : vector<16x16xf32>
    %cst_29 = arith.constant dense<0xFF800000> : vector<16xf32>
    %43 = vector.multi_reduction <maximumf>, %42, %cst_29 [1] : vector<16x16xf32> to vector<16xf32>
    %44 = vector.shape_cast %43 : vector<16xf32> to vector<16x1xf32>
    %45 = vector.broadcast %44 : vector<16x1xf32> to vector<16x16xf32>
    %46 = arith.subf %42, %45 : vector<16x16xf32>
    %47 = math.exp %46 : vector<16x16xf32>
    %cst_30 = arith.constant dense<0.000000e+00> : vector<16xf32>
    %48 = vector.multi_reduction <add>, %47, %cst_30 [1] : vector<16x16xf32> to vector<16xf32>
    %49 = vector.shape_cast %48 : vector<16xf32> to vector<16x1xf32>
    %50 = tpu.reciprocal %49 {approx = true} : vector<16x1xf32> -> vector<16x1xf32>
    %51 = vector.broadcast %50 : vector<16x1xf32> to vector<16x16xf32>
    %52 = arith.mulf %47, %51 : vector<16x16xf32>
    %cst_31 = arith.constant dense<0.000000e+00> : vector<16x8xf32>
    %53 = tpu.matmul %52, %34, %cst_31 {dimension_numbers = #tpu.dot_dimension_numbers<[1], [0], [0], [1], [0, 0, 1, 1], [], []>} : vector<16x16xf32>, vector<16x8xf32>, vector<16x8xf32> -> vector<16x8xf32>
    %54 = vector.extract_strided_slice %30 {offsets = [0, 0], sizes = [8, 32], strides = [1, 1]} : vector<32x32xf32> to vector<8x32xf32>
    %55 = arith.truncf %53 : vector<16x8xf32> to vector<16x8xbf16>
    %56 = arith.truncf %54 : vector<8x32xf32> to vector<8x32xbf16>
    %cst_32 = arith.constant dense<0.000000e+00> : vector<16x32xf32>
    %57 = tpu.matmul %55, %56, %cst_32 {dimension_numbers = #tpu.dot_dimension_numbers<[1], [0], [0], [1], [0, 0, 1, 1], [], []>} : vector<16x8xbf16>, vector<8x32xbf16>, vector<16x32xf32> -> vector<16x32xf32>
    %58 = arith.addf %31, %57 : vector<16x32xf32>
    %59 = vector.extract_strided_slice %10 {offsets = [0, 8], sizes = [16, 8], strides = [1, 1]} : vector<16x32xf32> to vector<16x8xf32>
    %60 = vector.extract_strided_slice %18 {offsets = [0, 8], sizes = [16, 8], strides = [1, 1]} : vector<16x32xf32> to vector<16x8xf32>
    %61 = vector.extract_strided_slice %19 {offsets = [0, 8], sizes = [16, 8], strides = [1, 1]} : vector<16x32xf32> to vector<16x8xf32>
    %62 = tpu.transpose %60, [1, 0] : vector<16x8xf32> -> vector<8x16xf32>
    %cst_33 = arith.constant dense<0.000000e+00> : vector<16x16xf32>
    %63 = tpu.matmul %59, %62, %cst_33 {dimension_numbers = #tpu.dot_dimension_numbers<[1], [0], [0], [1], [0, 0, 1, 1], [], []>} : vector<16x8xf32>, vector<8x16xf32>, vector<16x16xf32> -> vector<16x16xf32>
    %cst_34 = arith.constant 0.353553385 : f32
    %64 = vector.broadcast %cst_34 : f32 to vector<16x16xf32>
    %65 = arith.mulf %63, %64 : vector<16x16xf32>
    %66 = arith.addf %65, %27 : vector<16x16xf32>
    %67 = vector.extract_strided_slice %29 {offsets = [1, 0, 0], sizes = [1, 16, 16], strides = [1, 1, 1]} : vector<4x16x16xf32> to vector<1x16x16xf32>
    %68 = vector.shape_cast %67 : vector<1x16x16xf32> to vector<16x16xf32>
    %69 = arith.addf %66, %68 : vector<16x16xf32>
    %cst_35 = arith.constant dense<0xFF800000> : vector<16xf32>
    %70 = vector.multi_reduction <maximumf>, %69, %cst_35 [1] : vector<16x16xf32> to vector<16xf32>
    %71 = vector.shape_cast %70 : vector<16xf32> to vector<16x1xf32>
    %72 = vector.broadcast %71 : vector<16x1xf32> to vector<16x16xf32>
    %73 = arith.subf %69, %72 : vector<16x16xf32>
    %74 = math.exp %73 : vector<16x16xf32>
    %cst_36 = arith.constant dense<0.000000e+00> : vector<16xf32>
    %75 = vector.multi_reduction <add>, %74, %cst_36 [1] : vector<16x16xf32> to vector<16xf32>
    %76 = vector.shape_cast %75 : vector<16xf32> to vector<16x1xf32>
    %77 = tpu.reciprocal %76 {approx = true} : vector<16x1xf32> -> vector<16x1xf32>
    %78 = vector.broadcast %77 : vector<16x1xf32> to vector<16x16xf32>
    %79 = arith.mulf %74, %78 : vector<16x16xf32>
    %cst_37 = arith.constant dense<0.000000e+00> : vector<16x8xf32>
    %80 = tpu.matmul %79, %61, %cst_37 {dimension_numbers = #tpu.dot_dimension_numbers<[1], [0], [0], [1], [0, 0, 1, 1], [], []>} : vector<16x16xf32>, vector<16x8xf32>, vector<16x8xf32> -> vector<16x8xf32>
    %81 = vector.extract_strided_slice %30 {offsets = [8, 0], sizes = [8, 32], strides = [1, 1]} : vector<32x32xf32> to vector<8x32xf32>
    %82 = arith.truncf %80 : vector<16x8xf32> to vector<16x8xbf16>
    %83 = arith.truncf %81 : vector<8x32xf32> to vector<8x32xbf16>
    %cst_38 = arith.constant dense<0.000000e+00> : vector<16x32xf32>
    %84 = tpu.matmul %82, %83, %cst_38 {dimension_numbers = #tpu.dot_dimension_numbers<[1], [0], [0], [1], [0, 0, 1, 1], [], []>} : vector<16x8xbf16>, vector<8x32xbf16>, vector<16x32xf32> -> vector<16x32xf32>
    %85 = arith.addf %58, %84 : vector<16x32xf32>
    %86 = vector.extract_strided_slice %10 {offsets = [0, 16], sizes = [16, 8], strides = [1, 1]} : vector<16x32xf32> to vector<16x8xf32>
    %87 = vector.extract_strided_slice %18 {offsets = [0, 16], sizes = [16, 8], strides = [1, 1]} : vector<16x32xf32> to vector<16x8xf32>
    %88 = vector.extract_strided_slice %19 {offsets = [0, 16], sizes = [16, 8], strides = [1, 1]} : vector<16x32xf32> to vector<16x8xf32>
    %89 = tpu.transpose %87, [1, 0] : vector<16x8xf32> -> vector<8x16xf32>
    %cst_39 = arith.constant dense<0.000000e+00> : vector<16x16xf32>
    %90 = tpu.matmul %86, %89, %cst_39 {dimension_numbers = #tpu.dot_dimension_numbers<[1], [0], [0], [1], [0, 0, 1, 1], [], []>} : vector<16x8xf32>, vector<8x16xf32>, vector<16x16xf32> -> vector<16x16xf32>
    %cst_40 = arith.constant 0.353553385 : f32
    %91 = vector.broadcast %cst_40 : f32 to vector<16x16xf32>
    %92 = arith.mulf %90, %91 : vector<16x16xf32>
    %93 = arith.addf %92, %27 : vector<16x16xf32>
    %94 = vector.extract_strided_slice %29 {offsets = [2, 0, 0], sizes = [1, 16, 16], strides = [1, 1, 1]} : vector<4x16x16xf32> to vector<1x16x16xf32>
    %95 = vector.shape_cast %94 : vector<1x16x16xf32> to vector<16x16xf32>
    %96 = arith.addf %93, %95 : vector<16x16xf32>
    %cst_41 = arith.constant dense<0xFF800000> : vector<16xf32>
    %97 = vector.multi_reduction <maximumf>, %96, %cst_41 [1] : vector<16x16xf32> to vector<16xf32>
    %98 = vector.shape_cast %97 : vector<16xf32> to vector<16x1xf32>
    %99 = vector.broadcast %98 : vector<16x1xf32> to vector<16x16xf32>
    %100 = arith.subf %96, %99 : vector<16x16xf32>
    %101 = math.exp %100 : vector<16x16xf32>
    %cst_42 = arith.constant dense<0.000000e+00> : vector<16xf32>
    %102 = vector.multi_reduction <add>, %101, %cst_42 [1] : vector<16x16xf32> to vector<16xf32>
    %103 = vector.shape_cast %102 : vector<16xf32> to vector<16x1xf32>
    %104 = tpu.reciprocal %103 {approx = true} : vector<16x1xf32> -> vector<16x1xf32>
    %105 = vector.broadcast %104 : vector<16x1xf32> to vector<16x16xf32>
    %106 = arith.mulf %101, %105 : vector<16x16xf32>
    %cst_43 = arith.constant dense<0.000000e+00> : vector<16x8xf32>
    %107 = tpu.matmul %106, %88, %cst_43 {dimension_numbers = #tpu.dot_dimension_numbers<[1], [0], [0], [1], [0, 0, 1, 1], [], []>} : vector<16x16xf32>, vector<16x8xf32>, vector<16x8xf32> -> vector<16x8xf32>
    %108 = vector.extract_strided_slice %30 {offsets = [16, 0], sizes = [8, 32], strides = [1, 1]} : vector<32x32xf32> to vector<8x32xf32>
    %109 = arith.truncf %107 : vector<16x8xf32> to vector<16x8xbf16>
    %110 = arith.truncf %108 : vector<8x32xf32> to vector<8x32xbf16>
    %cst_44 = arith.constant dense<0.000000e+00> : vector<16x32xf32>
    %111 = tpu.matmul %109, %110, %cst_44 {dimension_numbers = #tpu.dot_dimension_numbers<[1], [0], [0], [1], [0, 0, 1, 1], [], []>} : vector<16x8xbf16>, vector<8x32xbf16>, vector<16x32xf32> -> vector<16x32xf32>
    %112 = arith.addf %85, %111 : vector<16x32xf32>
    %113 = vector.extract_strided_slice %10 {offsets = [0, 24], sizes = [16, 8], strides = [1, 1]} : vector<16x32xf32> to vector<16x8xf32>
    %114 = vector.extract_strided_slice %18 {offsets = [0, 24], sizes = [16, 8], strides = [1, 1]} : vector<16x32xf32> to vector<16x8xf32>
    %115 = vector.extract_strided_slice %19 {offsets = [0, 24], sizes = [16, 8], strides = [1, 1]} : vector<16x32xf32> to vector<16x8xf32>
    %116 = tpu.transpose %114, [1, 0] : vector<16x8xf32> -> vector<8x16xf32>
    %cst_45 = arith.constant dense<0.000000e+00> : vector<16x16xf32>
    %117 = tpu.matmul %113, %116, %cst_45 {dimension_numbers = #tpu.dot_dimension_numbers<[1], [0], [0], [1], [0, 0, 1, 1], [], []>} : vector<16x8xf32>, vector<8x16xf32>, vector<16x16xf32> -> vector<16x16xf32>
    %cst_46 = arith.constant 0.353553385 : f32
    %118 = vector.broadcast %cst_46 : f32 to vector<16x16xf32>
    %119 = arith.mulf %117, %118 : vector<16x16xf32>
    %120 = arith.addf %119, %27 : vector<16x16xf32>
    %121 = vector.extract_strided_slice %29 {offsets = [3, 0, 0], sizes = [1, 16, 16], strides = [1, 1, 1]} : vector<4x16x16xf32> to vector<1x16x16xf32>
    %122 = vector.shape_cast %121 : vector<1x16x16xf32> to vector<16x16xf32>
    %123 = arith.addf %120, %122 : vector<16x16xf32>
    %cst_47 = arith.constant dense<0xFF800000> : vector<16xf32>
    %124 = vector.multi_reduction <maximumf>, %123, %cst_47 [1] : vector<16x16xf32> to vector<16xf32>
    %125 = vector.shape_cast %124 : vector<16xf32> to vector<16x1xf32>
    %126 = vector.broadcast %125 : vector<16x1xf32> to vector<16x16xf32>
    %127 = arith.subf %123, %126 : vector<16x16xf32>
    %128 = math.exp %127 : vector<16x16xf32>
    %cst_48 = arith.constant dense<0.000000e+00> : vector<16xf32>
    %129 = vector.multi_reduction <add>, %128, %cst_48 [1] : vector<16x16xf32> to vector<16xf32>
    %130 = vector.shape_cast %129 : vector<16xf32> to vector<16x1xf32>
    %131 = tpu.reciprocal %130 {approx = true} : vector<16x1xf32> -> vector<16x1xf32>
    %132 = vector.broadcast %131 : vector<16x1xf32> to vector<16x16xf32>
    %133 = arith.mulf %128, %132 : vector<16x16xf32>
    %cst_49 = arith.constant dense<0.000000e+00> : vector<16x8xf32>
    %134 = tpu.matmul %133, %115, %cst_49 {dimension_numbers = #tpu.dot_dimension_numbers<[1], [0], [0], [1], [0, 0, 1, 1], [], []>} : vector<16x16xf32>, vector<16x8xf32>, vector<16x8xf32> -> vector<16x8xf32>
    %135 = vector.extract_strided_slice %30 {offsets = [24, 0], sizes = [8, 32], strides = [1, 1]} : vector<32x32xf32> to vector<8x32xf32>
    %136 = arith.truncf %134 : vector<16x8xf32> to vector<16x8xbf16>
    %137 = arith.truncf %135 : vector<8x32xf32> to vector<8x32xbf16>
    %cst_50 = arith.constant dense<0.000000e+00> : vector<16x32xf32>
    %138 = tpu.matmul %136, %137, %cst_50 {dimension_numbers = #tpu.dot_dimension_numbers<[1], [0], [0], [1], [0, 0, 1, 1], [], []>} : vector<16x8xbf16>, vector<8x32xbf16>, vector<16x32xf32> -> vector<16x32xf32>
    %139 = arith.addf %112, %138 : vector<16x32xf32>
    %c0_51 = arith.constant 0 : index
    %c0_52 = arith.constant 0 : index
    %140 = vector.load %arg8[%c0_51, %c0_52] : memref<1x32xf32, #tpu.memory_space<vmem>>, vector<1x32xf32>
    %141 = vector.broadcast %140 : vector<1x32xf32> to vector<16x32xf32>
    %142 = arith.addf %139, %141 : vector<16x32xf32>
    %143 = arith.addf %1, %142 : vector<16x32xf32>
    %c0_53 = arith.constant 0 : index
    %c0_54 = arith.constant 0 : index
    %144 = vector.load %arg9[%c0_53, %c0_54] : memref<1x32xf32, #tpu.memory_space<vmem>>, vector<1x32xf32>
    %c0_55 = arith.constant 0 : index
    %c0_56 = arith.constant 0 : index
    %145 = vector.load %arg10[%c0_55, %c0_56] : memref<1x32xf32, #tpu.memory_space<vmem>>, vector<1x32xf32>
    %cst_57 = arith.constant dense<0.000000e+00> : vector<16xf32>
    %146 = vector.multi_reduction <add>, %143, %cst_57 [1] : vector<16x32xf32> to vector<16xf32>
    %147 = vector.shape_cast %146 : vector<16xf32> to vector<16x1xf32>
    %cst_58 = arith.constant 3.200000e+01 : f32
    %148 = vector.broadcast %cst_58 : f32 to vector<16x1xf32>
    %149 = arith.divf %147, %148 : vector<16x1xf32>
    %150 = vector.broadcast %149 : vector<16x1xf32> to vector<16x32xf32>
    %151 = arith.subf %143, %150 : vector<16x32xf32>
    %152 = arith.mulf %151, %151 : vector<16x32xf32>
    %cst_59 = arith.constant dense<0.000000e+00> : vector<16xf32>
    %153 = vector.multi_reduction <add>, %152, %cst_59 [1] : vector<16x32xf32> to vector<16xf32>
    %154 = vector.shape_cast %153 : vector<16xf32> to vector<16x1xf32>
    %cst_60 = arith.constant 3.200000e+01 : f32
    %155 = vector.broadcast %cst_60 : f32 to vector<16x1xf32>
    %156 = arith.divf %154, %155 : vector<16x1xf32>
    %157 = vector.broadcast %149 : vector<16x1xf32> to vector<16x32xf32>
    %158 = arith.subf %143, %157 : vector<16x32xf32>
    %cst_61 = arith.constant 9.99999974E-6 : f32
    %159 = vector.broadcast %cst_61 : f32 to vector<16x1xf32>
    %160 = arith.addf %156, %159 : vector<16x1xf32>
    %161 = math.rsqrt %160 : vector<16x1xf32>
    %162 = vector.broadcast %161 : vector<16x1xf32> to vector<16x32xf32>
    %163 = arith.mulf %158, %162 : vector<16x32xf32>
    %164 = vector.broadcast %144 : vector<1x32xf32> to vector<16x32xf32>
    %165 = arith.mulf %163, %164 : vector<16x32xf32>
    %166 = vector.broadcast %145 : vector<1x32xf32> to vector<16x32xf32>
    %167 = arith.addf %165, %166 : vector<16x32xf32>
    %c0_62 = arith.constant 0 : index
    %c0_63 = arith.constant 0 : index
    %c0_64 = arith.constant 0 : index
    %168 = vector.load %arg13[%c0_62, %c0_63, %c0_64] : memref<1x16x32xf32, #tpu.memory_space<vmem>>, vector<1x16x32xf32>
    %169 = vector.shape_cast %168 : vector<1x16x32xf32> to vector<16x32xf32>
    %170 = vector.shape_cast %167 : vector<16x32xf32> to vector<1x16x32xf32>
    tpu.vector_store %arg13[%c0_62, %c0_63, %c0_64], %170 {strides = array<i32>} : memref<1x16x32xf32, #tpu.memory_space<vmem>>, vector<1x16x32xf32>,
    return
  }
  func.func @transform_0(%arg0: i32) -> (i32, i32, i32) {
    %c0_i32 = arith.constant 0 : i32
    %c0_i32_0 = arith.constant 0 : i32
    %c0_i32_1 = arith.constant 0 : i32
    return %arg0, %c0_i32, %c0_i32_0 : i32, i32, i32
  }
  func.func @transform_1(%arg0: i32) -> (i32, i32, i32) {
    %c0_i32 = arith.constant 0 : i32
    %c0_i32_0 = arith.constant 0 : i32
    %c0_i32_1 = arith.constant 0 : i32
    return %arg0, %c0_i32, %c0_i32_0 : i32, i32, i32
  }
  func.func @transform_2(%arg0: i32) -> (i32, i32) {
    %c0_i32 = arith.constant 0 : i32
    %c0_i32_0 = arith.constant 0 : i32
    %c0_i32_1 = arith.constant 0 : i32
    return %c0_i32, %c0_i32_0 : i32, i32
  }
  func.func @transform_3(%arg0: i32) -> (i32, i32) {
    %c0_i32 = arith.constant 0 : i32
    %c0_i32_0 = arith.constant 0 : i32
    %c0_i32_1 = arith.constant 0 : i32
    return %c0_i32, %c0_i32_0 : i32, i32
  }
  func.func @transform_4(%arg0: i32) -> (i32, i32) {
    %c0_i32 = arith.constant 0 : i32
    %c0_i32_0 = arith.constant 0 : i32
    %c0_i32_1 = arith.constant 0 : i32
    return %c0_i32, %c0_i32_0 : i32, i32
  }
  func.func @transform_5(%arg0: i32) -> (i32, i32) {
    %c0_i32 = arith.constant 0 : i32
    %c0_i32_0 = arith.constant 0 : i32
    %c0_i32_1 = arith.constant 0 : i32
    return %c0_i32, %c0_i32_0 : i32, i32
  }
  func.func @transform_6(%arg0: i32) -> (i32, i32) {
    %c0_i32 = arith.constant 0 : i32
    %c0_i32_0 = arith.constant 0 : i32
    %c0_i32_1 = arith.constant 0 : i32
    return %c0_i32, %c0_i32_0 : i32, i32
  }
  func.func @transform_7(%arg0: i32) -> (i32, i32) {
    %c0_i32 = arith.constant 0 : i32
    %c0_i32_0 = arith.constant 0 : i32
    %c0_i32_1 = arith.constant 0 : i32
    return %c0_i32, %c0_i32_0 : i32, i32
  }
  func.func @transform_8(%arg0: i32) -> (i32, i32) {
    %c0_i32 = arith.constant 0 : i32
    %c0_i32_0 = arith.constant 0 : i32
    %c0_i32_1 = arith.constant 0 : i32
    return %c0_i32, %c0_i32_0 : i32, i32
  }
  func.func @transform_9(%arg0: i32) -> (i32, i32) {
    %c0_i32 = arith.constant 0 : i32
    %c0_i32_0 = arith.constant 0 : i32
    %c0_i32_1 = arith.constant 0 : i32
    return %c0_i32, %c0_i32_0 : i32, i32
  }
  func.func @transform_10(%arg0: i32) -> (i32, i32, i32, i32) {
    %c0_i32 = arith.constant 0 : i32
    %c0_i32_0 = arith.constant 0 : i32
    %c0_i32_1 = arith.constant 0 : i32
    %c0_i32_2 = arith.constant 0 : i32
    return %arg0, %c0_i32, %c0_i32_0, %c0_i32_1 : i32, i32, i32, i32
  }
  func.func @transform_11(%arg0: i32) -> (i32, i32, i32) {
    %c0_i32 = arith.constant 0 : i32
    %c0_i32_0 = arith.constant 0 : i32
    %c0_i32_1 = arith.constant 0 : i32
    return %arg0, %c0_i32, %c0_i32_0 : i32, i32, i32
  }
  func.func @transform_12(%arg0: i32) -> (i32, i32, i32) {
    %c0_i32 = arith.constant 0 : i32
    %c0_i32_0 = arith.constant 0 : i32
    %c0_i32_1 = arith.constant 0 : i32
    return %arg0, %c0_i32, %c0_i32_0 : i32, i32, i32
  }
}

module attributes {stable_mosaic.version = 11 : i64} {
  func.func @_ffn_block_kernel(%arg0: i32, %arg1: memref<1x8x32xf32, #tpu.memory_space<vmem>>, %arg2: memref<32x64xf32, #tpu.memory_space<vmem>>, %arg3: memref<1x64xf32, #tpu.memory_space<vmem>>, %arg4: memref<64x32xf32, #tpu.memory_space<vmem>>, %arg5: memref<1x32xf32, #tpu.memory_space<vmem>>, %arg6: memref<1x32xf32, #tpu.memory_space<vmem>>, %arg7: memref<1x32xf32, #tpu.memory_space<vmem>>, %arg8: memref<1x8x32xf32, #tpu.memory_space<vmem>>) attributes {dimension_semantics = [#tpu.dimension_semantics<parallel>], iteration_bounds = array<i64: 2>, scalar_prefetch = 0 : i64, scratch_operands = 0 : i64, tpu.core_type = #tpu.core_type<tc>, window_params = [{transform_indices = @transform_0, window_bounds = array<i64: 1, 8, 32>}, {pipeline_mode = #tpu.pipeline_mode<synchronous>, transform_indices = @transform_1, window_bounds = array<i64: 32, 64>}, {pipeline_mode = #tpu.pipeline_mode<synchronous>, transform_indices = @transform_2, window_bounds = array<i64: 1, 64>}, {pipeline_mode = #tpu.pipeline_mode<synchronous>, transform_indices = @transform_3, window_bounds = array<i64: 64, 32>}, {pipeline_mode = #tpu.pipeline_mode<synchronous>, transform_indices = @transform_4, window_bounds = array<i64: 1, 32>}, {pipeline_mode = #tpu.pipeline_mode<synchronous>, transform_indices = @transform_5, window_bounds = array<i64: 1, 32>}, {pipeline_mode = #tpu.pipeline_mode<synchronous>, transform_indices = @transform_6, window_bounds = array<i64: 1, 32>}, {transform_indices = @transform_7, window_bounds = array<i64: 1, 8, 32>}]} {
    %c0 = arith.constant 0 : index
    %c0_0 = arith.constant 0 : index
    %c0_1 = arith.constant 0 : index
    %0 = vector.load %arg1[%c0, %c0_0, %c0_1] : memref<1x8x32xf32, #tpu.memory_space<vmem>>, vector<1x8x32xf32>
    %1 = vector.shape_cast %0 : vector<1x8x32xf32> to vector<8x32xf32>
    %2 = arith.truncf %1 : vector<8x32xf32> to vector<8x32xbf16>
    %c0_2 = arith.constant 0 : index
    %c0_3 = arith.constant 0 : index
    %3 = vector.load %arg2[%c0_2, %c0_3] : memref<32x64xf32, #tpu.memory_space<vmem>>, vector<32x64xf32>
    %4 = arith.truncf %3 : vector<32x64xf32> to vector<32x64xbf16>
    %cst = arith.constant dense<0.000000e+00> : vector<8x64xf32>
    %5 = tpu.matmul %2, %4, %cst {dimension_numbers = #tpu.dot_dimension_numbers<[1], [0], [0], [1], [0, 0, 1, 1], [], []>} : vector<8x32xbf16>, vector<32x64xbf16>, vector<8x64xf32> -> vector<8x64xf32>
    %c0_4 = arith.constant 0 : index
    %c0_5 = arith.constant 0 : index
    %6 = vector.load %arg3[%c0_4, %c0_5] : memref<1x64xf32, #tpu.memory_space<vmem>>, vector<1x64xf32>
    %7 = vector.broadcast %6 : vector<1x64xf32> to vector<8x64xf32>
    %8 = arith.addf %5, %7 : vector<8x64xf32>
    %cst_6 = arith.constant 0.000000e+00 : f32
    %9 = vector.broadcast %cst_6 : f32 to vector<8x64xf32>
    %10 = arith.maximumf %8, %9 : vector<8x64xf32>
    %11 = arith.truncf %10 : vector<8x64xf32> to vector<8x64xbf16>
    %c0_7 = arith.constant 0 : index
    %c0_8 = arith.constant 0 : index
    %12 = vector.load %arg4[%c0_7, %c0_8] : memref<64x32xf32, #tpu.memory_space<vmem>>, vector<64x32xf32>
    %13 = arith.truncf %12 : vector<64x32xf32> to vector<64x32xbf16>
    %cst_9 = arith.constant dense<0.000000e+00> : vector<8x32xf32>
    %14 = tpu.matmul %11, %13, %cst_9 {dimension_numbers = #tpu.dot_dimension_numbers<[1], [0], [0], [1], [0, 0, 1, 1], [], []>} : vector<8x64xbf16>, vector<64x32xbf16>, vector<8x32xf32> -> vector<8x32xf32>
    %c0_10 = arith.constant 0 : index
    %c0_11 = arith.constant 0 : index
    %15 = vector.load %arg5[%c0_10, %c0_11] : memref<1x32xf32, #tpu.memory_space<vmem>>, vector<1x32xf32>
    %16 = vector.broadcast %15 : vector<1x32xf32> to vector<8x32xf32>
    %17 = arith.addf %14, %16 : vector<8x32xf32>
    %18 = arith.addf %1, %17 : vector<8x32xf32>
    %c0_12 = arith.constant 0 : index
    %c0_13 = arith.constant 0 : index
    %19 = vector.load %arg6[%c0_12, %c0_13] : memref<1x32xf32, #tpu.memory_space<vmem>>, vector<1x32xf32>
    %c0_14 = arith.constant 0 : index
    %c0_15 = arith.constant 0 : index
    %20 = vector.load %arg7[%c0_14, %c0_15] : memref<1x32xf32, #tpu.memory_space<vmem>>, vector<1x32xf32>
    %cst_16 = arith.constant dense<0.000000e+00> : vector<8xf32>
    %21 = vector.multi_reduction <add>, %18, %cst_16 [1] : vector<8x32xf32> to vector<8xf32>
    %22 = vector.shape_cast %21 : vector<8xf32> to vector<8x1xf32>
    %cst_17 = arith.constant 3.200000e+01 : f32
    %23 = vector.broadcast %cst_17 : f32 to vector<8x1xf32>
    %24 = arith.divf %22, %23 : vector<8x1xf32>
    %25 = vector.broadcast %24 : vector<8x1xf32> to vector<8x32xf32>
    %26 = arith.subf %18, %25 : vector<8x32xf32>
    %27 = arith.mulf %26, %26 : vector<8x32xf32>
    %cst_18 = arith.constant dense<0.000000e+00> : vector<8xf32>
    %28 = vector.multi_reduction <add>, %27, %cst_18 [1] : vector<8x32xf32> to vector<8xf32>
    %29 = vector.shape_cast %28 : vector<8xf32> to vector<8x1xf32>
    %cst_19 = arith.constant 3.200000e+01 : f32
    %30 = vector.broadcast %cst_19 : f32 to vector<8x1xf32>
    %31 = arith.divf %29, %30 : vector<8x1xf32>
    %32 = vector.broadcast %24 : vector<8x1xf32> to vector<8x32xf32>
    %33 = arith.subf %18, %32 : vector<8x32xf32>
    %cst_20 = arith.constant 9.99999974E-6 : f32
    %34 = vector.broadcast %cst_20 : f32 to vector<8x1xf32>
    %35 = arith.addf %31, %34 : vector<8x1xf32>
    %36 = math.rsqrt %35 : vector<8x1xf32>
    %37 = vector.broadcast %36 : vector<8x1xf32> to vector<8x32xf32>
    %38 = arith.mulf %33, %37 : vector<8x32xf32>
    %39 = vector.broadcast %19 : vector<1x32xf32> to vector<8x32xf32>
    %40 = arith.mulf %38, %39 : vector<8x32xf32>
    %41 = vector.broadcast %20 : vector<1x32xf32> to vector<8x32xf32>
    %42 = arith.addf %40, %41 : vector<8x32xf32>
    %c0_21 = arith.constant 0 : index
    %c0_22 = arith.constant 0 : index
    %c0_23 = arith.constant 0 : index
    %43 = vector.load %arg8[%c0_21, %c0_22, %c0_23] : memref<1x8x32xf32, #tpu.memory_space<vmem>>, vector<1x8x32xf32>
    %44 = vector.shape_cast %43 : vector<1x8x32xf32> to vector<8x32xf32>
    %45 = vector.shape_cast %42 : vector<8x32xf32> to vector<1x8x32xf32>
    tpu.vector_store %arg8[%c0_21, %c0_22, %c0_23], %45 {strides = array<i32>} : memref<1x8x32xf32, #tpu.memory_space<vmem>>, vector<1x8x32xf32>,
    return
  }
  func.func @transform_0(%arg0: i32) -> (i32, i32, i32) {
    %c0_i32 = arith.constant 0 : i32
    %c0_i32_0 = arith.constant 0 : i32
    %c0_i32_1 = arith.constant 0 : i32
    return %arg0, %c0_i32, %c0_i32_0 : i32, i32, i32
  }
  func.func @transform_1(%arg0: i32) -> (i32, i32) {
    %c0_i32 = arith.constant 0 : i32
    %c0_i32_0 = arith.constant 0 : i32
    %c0_i32_1 = arith.constant 0 : i32
    return %c0_i32, %c0_i32_0 : i32, i32
  }
  func.func @transform_2(%arg0: i32) -> (i32, i32) {
    %c0_i32 = arith.constant 0 : i32
    %c0_i32_0 = arith.constant 0 : i32
    %c0_i32_1 = arith.constant 0 : i32
    return %c0_i32, %c0_i32_0 : i32, i32
  }
  func.func @transform_3(%arg0: i32) -> (i32, i32) {
    %c0_i32 = arith.constant 0 : i32
    %c0_i32_0 = arith.constant 0 : i32
    %c0_i32_1 = arith.constant 0 : i32
    return %c0_i32, %c0_i32_0 : i32, i32
  }
  func.func @transform_4(%arg0: i32) -> (i32, i32) {
    %c0_i32 = arith.constant 0 : i32
    %c0_i32_0 = arith.constant 0 : i32
    %c0_i32_1 = arith.constant 0 : i32
    return %c0_i32, %c0_i32_0 : i32, i32
  }
  func.func @transform_5(%arg0: i32) -> (i32, i32) {
    %c0_i32 = arith.constant 0 : i32
    %c0_i32_0 = arith.constant 0 : i32
    %c0_i32_1 = arith.constant 0 : i32
    return %c0_i32, %c0_i32_0 : i32, i32
  }
  func.func @transform_6(%arg0: i32) -> (i32, i32) {
    %c0_i32 = arith.constant 0 : i32
    %c0_i32_0 = arith.constant 0 : i32
    %c0_i32_1 = arith.constant 0 : i32
    return %c0_i32, %c0_i32_0 : i32, i32
  }
  func.func @transform_7(%arg0: i32) -> (i32, i32, i32) {
    %c0_i32 = arith.constant 0 : i32
    %c0_i32_0 = arith.constant 0 : i32
    %c0_i32_1 = arith.constant 0 : i32
    return %arg0, %c0_i32, %c0_i32_0 : i32, i32, i32
  }
}

module attributes {stable_mosaic.version = 11 : i64} {
  func.func @_mha_block_kernel(%arg0: i32, %arg1: memref<1x8x32xf32, #tpu.memory_space<vmem>>, %arg2: memref<1x16x32xf32, #tpu.memory_space<vmem>>, %arg3: memref<32x32xf32, #tpu.memory_space<vmem>>, %arg4: memref<1x32xf32, #tpu.memory_space<vmem>>, %arg5: memref<32x64xf32, #tpu.memory_space<vmem>>, %arg6: memref<1x64xf32, #tpu.memory_space<vmem>>, %arg7: memref<32x32xf32, #tpu.memory_space<vmem>>, %arg8: memref<1x32xf32, #tpu.memory_space<vmem>>, %arg9: memref<1x32xf32, #tpu.memory_space<vmem>>, %arg10: memref<1x32xf32, #tpu.memory_space<vmem>>, %arg11: memref<1x1x16xf32, #tpu.memory_space<vmem>>, %arg12: memref<1x8x32xf32, #tpu.memory_space<vmem>>) attributes {dimension_semantics = [#tpu.dimension_semantics<parallel>], iteration_bounds = array<i64: 2>, scalar_prefetch = 0 : i64, scratch_operands = 0 : i64, tpu.core_type = #tpu.core_type<tc>, window_params = [{transform_indices = @transform_0, window_bounds = array<i64: 1, 8, 32>}, {transform_indices = @transform_1, window_bounds = array<i64: 1, 16, 32>}, {pipeline_mode = #tpu.pipeline_mode<synchronous>, transform_indices = @transform_2, window_bounds = array<i64: 32, 32>}, {pipeline_mode = #tpu.pipeline_mode<synchronous>, transform_indices = @transform_3, window_bounds = array<i64: 1, 32>}, {pipeline_mode = #tpu.pipeline_mode<synchronous>, transform_indices = @transform_4, window_bounds = array<i64: 32, 64>}, {pipeline_mode = #tpu.pipeline_mode<synchronous>, transform_indices = @transform_5, window_bounds = array<i64: 1, 64>}, {pipeline_mode = #tpu.pipeline_mode<synchronous>, transform_indices = @transform_6, window_bounds = array<i64: 32, 32>}, {pipeline_mode = #tpu.pipeline_mode<synchronous>, transform_indices = @transform_7, window_bounds = array<i64: 1, 32>}, {pipeline_mode = #tpu.pipeline_mode<synchronous>, transform_indices = @transform_8, window_bounds = array<i64: 1, 32>}, {pipeline_mode = #tpu.pipeline_mode<synchronous>, transform_indices = @transform_9, window_bounds = array<i64: 1, 32>}, {transform_indices = @transform_10, window_bounds = array<i64: 1, 1, 16>}, {transform_indices = @transform_11, window_bounds = array<i64: 1, 8, 32>}]} {
    %c0 = arith.constant 0 : index
    %c0_0 = arith.constant 0 : index
    %c0_1 = arith.constant 0 : index
    %0 = vector.load %arg1[%c0, %c0_0, %c0_1] : memref<1x8x32xf32, #tpu.memory_space<vmem>>, vector<1x8x32xf32>
    %1 = vector.shape_cast %0 : vector<1x8x32xf32> to vector<8x32xf32>
    %c0_2 = arith.constant 0 : index
    %c0_3 = arith.constant 0 : index
    %c0_4 = arith.constant 0 : index
    %2 = vector.load %arg2[%c0_2, %c0_3, %c0_4] : memref<1x16x32xf32, #tpu.memory_space<vmem>>, vector<1x16x32xf32>
    %3 = vector.shape_cast %2 : vector<1x16x32xf32> to vector<16x32xf32>
    %4 = arith.truncf %1 : vector<8x32xf32> to vector<8x32xbf16>
    %c0_5 = arith.constant 0 : index
    %c0_6 = arith.constant 0 : index
    %5 = vector.load %arg3[%c0_5, %c0_6] : memref<32x32xf32, #tpu.memory_space<vmem>>, vector<32x32xf32>
    %6 = arith.truncf %5 : vector<32x32xf32> to vector<32x32xbf16>
    %cst = arith.constant dense<0.000000e+00> : vector<8x32xf32>
    %7 = tpu.matmul %4, %6, %cst {dimension_numbers = #tpu.dot_dimension_numbers<[1], [0], [0], [1], [0, 0, 1, 1], [], []>} : vector<8x32xbf16>, vector<32x32xbf16>, vector<8x32xf32> -> vector<8x32xf32>
    %c0_7 = arith.constant 0 : index
    %c0_8 = arith.constant 0 : index
    %8 = vector.load %arg4[%c0_7, %c0_8] : memref<1x32xf32, #tpu.memory_space<vmem>>, vector<1x32xf32>
    %9 = vector.broadcast %8 : vector<1x32xf32> to vector<8x32xf32>
    %10 = arith.addf %7, %9 : vector<8x32xf32>
    %11 = arith.truncf %3 : vector<16x32xf32> to vector<16x32xbf16>
    %c0_9 = arith.constant 0 : index
    %c0_10 = arith.constant 0 : index
    %12 = vector.load %arg5[%c0_9, %c0_10] : memref<32x64xf32, #tpu.memory_space<vmem>>, vector<32x64xf32>
    %13 = arith.truncf %12 : vector<32x64xf32> to vector<32x64xbf16>
    %cst_11 = arith.constant dense<0.000000e+00> : vector<16x64xf32>
    %14 = tpu.matmul %11, %13, %cst_11 {dimension_numbers = #tpu.dot_dimension_numbers<[1], [0], [0], [1], [0, 0, 1, 1], [], []>} : vector<16x32xbf16>, vector<32x64xbf16>, vector<16x64xf32> -> vector<16x64xf32>
    %c0_12 = arith.constant 0 : index
    %c0_13 = arith.constant 0 : index
    %15 = vector.load %arg6[%c0_12, %c0_13] : memref<1x64xf32, #tpu.memory_space<vmem>>, vector<1x64xf32>
    %16 = vector.broadcast %15 : vector<1x64xf32> to vector<16x64xf32>
    %17 = arith.addf %14, %16 : vector<16x64xf32>
    %18 = vector.extract_strided_slice %17 {offsets = [0, 0], sizes = [16, 32], strides = [1, 1]} : vector<16x64xf32> to vector<16x32xf32>
    %19 = vector.extract_strided_slice %17 {offsets = [0, 32], sizes = [16, 32], strides = [1, 1]} : vector<16x64xf32> to vector<16x32xf32>
    %cst_14 = arith.constant 0.000000e+00 : f32
    %20 = vector.broadcast %cst_14 : f32 to vector<8x16xf32>
    %c0_15 = arith.constant 0 : index
    %c0_16 = arith.constant 0 : index
    %c0_17 = arith.constant 0 : index
    %21 = vector.load %arg11[%c0_15, %c0_16, %c0_17] : memref<1x1x16xf32, #tpu.memory_space<vmem>>, vector<1x1x16xf32>
    %22 = vector.shape_cast %21 : vector<1x1x16xf32> to vector<1x16xf32>
    %cst_18 = arith.constant 1.000000e+00 : f32
    %23 = vector.broadcast %cst_18 : f32 to vector<1x16xf32>
    %24 = arith.subf %23, %22 : vector<1x16xf32>
    %cst_19 = arith.constant -1.000000e+04 : f32
    %25 = vector.broadcast %cst_19 : f32 to vector<1x16xf32>
    %26 = arith.mulf %24, %25 : vector<1x16xf32>
    %27 = vector.broadcast %26 : vector<1x16xf32> to vector<8x16xf32>
    %28 = arith.addf %20, %27 : vector<8x16xf32>
    %c0_20 = arith.constant 0 : index
    %c0_21 = arith.constant 0 : index
    %29 = vector.load %arg7[%c0_20, %c0_21] : memref<32x32xf32, #tpu.memory_space<vmem>>, vector<32x32xf32>
    %cst_22 = arith.constant 0.000000e+00 : f32
    %30 = vector.broadcast %cst_22 : f32 to vector<8x32xf32>
    %31 = vector.extract_strided_slice %10 {offsets = [0, 0], sizes = [8, 8], strides = [1, 1]} : vector<8x32xf32> to vector<8x8xf32>
    %32 = vector.extract_strided_slice %18 {offsets = [0, 0], sizes = [16, 8], strides = [1, 1]} : vector<16x32xf32> to vector<16x8xf32>
    %33 = vector.extract_strided_slice %19 {offsets = [0, 0], sizes = [16, 8], strides = [1, 1]} : vector<16x32xf32> to vector<16x8xf32>
    %34 = tpu.transpose %32, [1, 0] : vector<16x8xf32> -> vector<8x16xf32>
    %cst_23 = arith.constant dense<0.000000e+00> : vector<8x16xf32>
    %35 = tpu.matmul %31, %34, %cst_23 {dimension_numbers = #tpu.dot_dimension_numbers<[1], [0], [0], [1], [0, 0, 1, 1], [], []>} : vector<8x8xf32>, vector<8x16xf32>, vector<8x16xf32> -> vector<8x16xf32>
    %cst_24 = arith.constant 0.353553385 : f32
    %36 = vector.broadcast %cst_24 : f32 to vector<8x16xf32>
    %37 = arith.mulf %35, %36 : vector<8x16xf32>
    %38 = arith.addf %37, %28 : vector<8x16xf32>
    %cst_25 = arith.constant dense<0xFF800000> : vector<8xf32>
    %39 = vector.multi_reduction <maximumf>, %38, %cst_25 [1] : vector<8x16xf32> to vector<8xf32>
    %40 = vector.shape_cast %39 : vector<8xf32> to vector<8x1xf32>
    %41 = vector.broadcast %40 : vector<8x1xf32> to vector<8x16xf32>
    %42 = arith.subf %38, %41 : vector<8x16xf32>
    %43 = math.exp %42 : vector<8x16xf32>
    %cst_26 = arith.constant dense<0.000000e+00> : vector<8xf32>
    %44 = vector.multi_reduction <add>, %43, %cst_26 [1] : vector<8x16xf32> to vector<8xf32>
    %45 = vector.shape_cast %44 : vector<8xf32> to vector<8x1xf32>
    %46 = tpu.reciprocal %45 {approx = true} : vector<8x1xf32> -> vector<8x1xf32>
    %47 = vector.broadcast %46 : vector<8x1xf32> to vector<8x16xf32>
    %48 = arith.mulf %43, %47 : vector<8x16xf32>
    %cst_27 = arith.constant dense<0.000000e+00> : vector<8x8xf32>
    %49 = tpu.matmul %48, %33, %cst_27 {dimension_numbers = #tpu.dot_dimension_numbers<[1], [0], [0], [1], [0, 0, 1, 1], [], []>} : vector<8x16xf32>, vector<16x8xf32>, vector<8x8xf32> -> vector<8x8xf32>
    %50 = vector.extract_strided_slice %29 {offsets = [0, 0], sizes = [8, 32], strides = [1, 1]} : vector<32x32xf32> to vector<8x32xf32>
    %51 = arith.truncf %49 : vector<8x8xf32> to vector<8x8xbf16>
    %52 = arith.truncf %50 : vector<8x32xf32> to vector<8x32xbf16>
    %cst_28 = arith.constant dense<0.000000e+00> : vector<8x32xf32>
    %53 = tpu.matmul %51, %52, %cst_28 {dimension_numbers = #tpu.dot_dimension_numbers<[1], [0], [0], [1], [0, 0, 1, 1], [], []>} : vector<8x8xbf16>, vector<8x32xbf16>, vector<8x32xf32> -> vector<8x32xf32>
    %54 = arith.addf %30, %53 : vector<8x32xf32>
    %55 = vector.extract_strided_slice %10 {offsets = [0, 8], sizes = [8, 8], strides = [1, 1]} : vector<8x32xf32> to vector<8x8xf32>
    %56 = vector.extract_strided_slice %18 {offsets = [0, 8], sizes = [16, 8], strides = [1, 1]} : vector<16x32xf32> to vector<16x8xf32>
    %57 = vector.extract_strided_slice %19 {offsets = [0, 8], sizes = [16, 8], strides = [1, 1]} : vector<16x32xf32> to vector<16x8xf32>
    %58 = tpu.transpose %56, [1, 0] : vector<16x8xf32> -> vector<8x16xf32>
    %cst_29 = arith.constant dense<0.000000e+00> : vector<8x16xf32>
    %59 = tpu.matmul %55, %58, %cst_29 {dimension_numbers = #tpu.dot_dimension_numbers<[1], [0], [0], [1], [0, 0, 1, 1], [], []>} : vector<8x8xf32>, vector<8x16xf32>, vector<8x16xf32> -> vector<8x16xf32>
    %cst_30 = arith.constant 0.353553385 : f32
    %60 = vector.broadcast %cst_30 : f32 to vector<8x16xf32>
    %61 = arith.mulf %59, %60 : vector<8x16xf32>
    %62 = arith.addf %61, %28 : vector<8x16xf32>
    %cst_31 = arith.constant dense<0xFF800000> : vector<8xf32>
    %63 = vector.multi_reduction <maximumf>, %62, %cst_31 [1] : vector<8x16xf32> to vector<8xf32>
    %64 = vector.shape_cast %63 : vector<8xf32> to vector<8x1xf32>
    %65 = vector.broadcast %64 : vector<8x1xf32> to vector<8x16xf32>
    %66 = arith.subf %62, %65 : vector<8x16xf32>
    %67 = math.exp %66 : vector<8x16xf32>
    %cst_32 = arith.constant dense<0.000000e+00> : vector<8xf32>
    %68 = vector.multi_reduction <add>, %67, %cst_32 [1] : vector<8x16xf32> to vector<8xf32>
    %69 = vector.shape_cast %68 : vector<8xf32> to vector<8x1xf32>
    %70 = tpu.reciprocal %69 {approx = true} : vector<8x1xf32> -> vector<8x1xf32>
    %71 = vector.broadcast %70 : vector<8x1xf32> to vector<8x16xf32>
    %72 = arith.mulf %67, %71 : vector<8x16xf32>
    %cst_33 = arith.constant dense<0.000000e+00> : vector<8x8xf32>
    %73 = tpu.matmul %72, %57, %cst_33 {dimension_numbers = #tpu.dot_dimension_numbers<[1], [0], [0], [1], [0, 0, 1, 1], [], []>} : vector<8x16xf32>, vector<16x8xf32>, vector<8x8xf32> -> vector<8x8xf32>
    %74 = vector.extract_strided_slice %29 {offsets = [8, 0], sizes = [8, 32], strides = [1, 1]} : vector<32x32xf32> to vector<8x32xf32>
    %75 = arith.truncf %73 : vector<8x8xf32> to vector<8x8xbf16>
    %76 = arith.truncf %74 : vector<8x32xf32> to vector<8x32xbf16>
    %cst_34 = arith.constant dense<0.000000e+00> : vector<8x32xf32>
    %77 = tpu.matmul %75, %76, %cst_34 {dimension_numbers = #tpu.dot_dimension_numbers<[1], [0], [0], [1], [0, 0, 1, 1], [], []>} : vector<8x8xbf16>, vector<8x32xbf16>, vector<8x32xf32> -> vector<8x32xf32>
    %78 = arith.addf %54, %77 : vector<8x32xf32>
    %79 = vector.extract_strided_slice %10 {offsets = [0, 16], sizes = [8, 8], strides = [1, 1]} : vector<8x32xf32> to vector<8x8xf32>
    %80 = vector.extract_strided_slice %18 {offsets = [0, 16], sizes = [16, 8], strides = [1, 1]} : vector<16x32xf32> to vector<16x8xf32>
    %81 = vector.extract_strided_slice %19 {offsets = [0, 16], sizes = [16, 8], strides = [1, 1]} : vector<16x32xf32> to vector<16x8xf32>
    %82 = tpu.transpose %80, [1, 0] : vector<16x8xf32> -> vector<8x16xf32>
    %cst_35 = arith.constant dense<0.000000e+00> : vector<8x16xf32>
    %83 = tpu.matmul %79, %82, %cst_35 {dimension_numbers = #tpu.dot_dimension_numbers<[1], [0], [0], [1], [0, 0, 1, 1], [], []>} : vector<8x8xf32>, vector<8x16xf32>, vector<8x16xf32> -> vector<8x16xf32>
    %cst_36 = arith.constant 0.353553385 : f32
    %84 = vector.broadcast %cst_36 : f32 to vector<8x16xf32>
    %85 = arith.mulf %83, %84 : vector<8x16xf32>
    %86 = arith.addf %85, %28 : vector<8x16xf32>
    %cst_37 = arith.constant dense<0xFF800000> : vector<8xf32>
    %87 = vector.multi_reduction <maximumf>, %86, %cst_37 [1] : vector<8x16xf32> to vector<8xf32>
    %88 = vector.shape_cast %87 : vector<8xf32> to vector<8x1xf32>
    %89 = vector.broadcast %88 : vector<8x1xf32> to vector<8x16xf32>
    %90 = arith.subf %86, %89 : vector<8x16xf32>
    %91 = math.exp %90 : vector<8x16xf32>
    %cst_38 = arith.constant dense<0.000000e+00> : vector<8xf32>
    %92 = vector.multi_reduction <add>, %91, %cst_38 [1] : vector<8x16xf32> to vector<8xf32>
    %93 = vector.shape_cast %92 : vector<8xf32> to vector<8x1xf32>
    %94 = tpu.reciprocal %93 {approx = true} : vector<8x1xf32> -> vector<8x1xf32>
    %95 = vector.broadcast %94 : vector<8x1xf32> to vector<8x16xf32>
    %96 = arith.mulf %91, %95 : vector<8x16xf32>
    %cst_39 = arith.constant dense<0.000000e+00> : vector<8x8xf32>
    %97 = tpu.matmul %96, %81, %cst_39 {dimension_numbers = #tpu.dot_dimension_numbers<[1], [0], [0], [1], [0, 0, 1, 1], [], []>} : vector<8x16xf32>, vector<16x8xf32>, vector<8x8xf32> -> vector<8x8xf32>
    %98 = vector.extract_strided_slice %29 {offsets = [16, 0], sizes = [8, 32], strides = [1, 1]} : vector<32x32xf32> to vector<8x32xf32>
    %99 = arith.truncf %97 : vector<8x8xf32> to vector<8x8xbf16>
    %100 = arith.truncf %98 : vector<8x32xf32> to vector<8x32xbf16>
    %cst_40 = arith.constant dense<0.000000e+00> : vector<8x32xf32>
    %101 = tpu.matmul %99, %100, %cst_40 {dimension_numbers = #tpu.dot_dimension_numbers<[1], [0], [0], [1], [0, 0, 1, 1], [], []>} : vector<8x8xbf16>, vector<8x32xbf16>, vector<8x32xf32> -> vector<8x32xf32>
    %102 = arith.addf %78, %101 : vector<8x32xf32>
    %103 = vector.extract_strided_slice %10 {offsets = [0, 24], sizes = [8, 8], strides = [1, 1]} : vector<8x32xf32> to vector<8x8xf32>
    %104 = vector.extract_strided_slice %18 {offsets = [0, 24], sizes = [16, 8], strides = [1, 1]} : vector<16x32xf32> to vector<16x8xf32>
    %105 = vector.extract_strided_slice %19 {offsets = [0, 24], sizes = [16, 8], strides = [1, 1]} : vector<16x32xf32> to vector<16x8xf32>
    %106 = tpu.transpose %104, [1, 0] : vector<16x8xf32> -> vector<8x16xf32>
    %cst_41 = arith.constant dense<0.000000e+00> : vector<8x16xf32>
    %107 = tpu.matmul %103, %106, %cst_41 {dimension_numbers = #tpu.dot_dimension_numbers<[1], [0], [0], [1], [0, 0, 1, 1], [], []>} : vector<8x8xf32>, vector<8x16xf32>, vector<8x16xf32> -> vector<8x16xf32>
    %cst_42 = arith.constant 0.353553385 : f32
    %108 = vector.broadcast %cst_42 : f32 to vector<8x16xf32>
    %109 = arith.mulf %107, %108 : vector<8x16xf32>
    %110 = arith.addf %109, %28 : vector<8x16xf32>
    %cst_43 = arith.constant dense<0xFF800000> : vector<8xf32>
    %111 = vector.multi_reduction <maximumf>, %110, %cst_43 [1] : vector<8x16xf32> to vector<8xf32>
    %112 = vector.shape_cast %111 : vector<8xf32> to vector<8x1xf32>
    %113 = vector.broadcast %112 : vector<8x1xf32> to vector<8x16xf32>
    %114 = arith.subf %110, %113 : vector<8x16xf32>
    %115 = math.exp %114 : vector<8x16xf32>
    %cst_44 = arith.constant dense<0.000000e+00> : vector<8xf32>
    %116 = vector.multi_reduction <add>, %115, %cst_44 [1] : vector<8x16xf32> to vector<8xf32>
    %117 = vector.shape_cast %116 : vector<8xf32> to vector<8x1xf32>
    %118 = tpu.reciprocal %117 {approx = true} : vector<8x1xf32> -> vector<8x1xf32>
    %119 = vector.broadcast %118 : vector<8x1xf32> to vector<8x16xf32>
    %120 = arith.mulf %115, %119 : vector<8x16xf32>
    %cst_45 = arith.constant dense<0.000000e+00> : vector<8x8xf32>
    %121 = tpu.matmul %120, %105, %cst_45 {dimension_numbers = #tpu.dot_dimension_numbers<[1], [0], [0], [1], [0, 0, 1, 1], [], []>} : vector<8x16xf32>, vector<16x8xf32>, vector<8x8xf32> -> vector<8x8xf32>
    %122 = vector.extract_strided_slice %29 {offsets = [24, 0], sizes = [8, 32], strides = [1, 1]} : vector<32x32xf32> to vector<8x32xf32>
    %123 = arith.truncf %121 : vector<8x8xf32> to vector<8x8xbf16>
    %124 = arith.truncf %122 : vector<8x32xf32> to vector<8x32xbf16>
    %cst_46 = arith.constant dense<0.000000e+00> : vector<8x32xf32>
    %125 = tpu.matmul %123, %124, %cst_46 {dimension_numbers = #tpu.dot_dimension_numbers<[1], [0], [0], [1], [0, 0, 1, 1], [], []>} : vector<8x8xbf16>, vector<8x32xbf16>, vector<8x32xf32> -> vector<8x32xf32>
    %126 = arith.addf %102, %125 : vector<8x32xf32>
    %c0_47 = arith.constant 0 : index
    %c0_48 = arith.constant 0 : index
    %127 = vector.load %arg8[%c0_47, %c0_48] : memref<1x32xf32, #tpu.memory_space<vmem>>, vector<1x32xf32>
    %128 = vector.broadcast %127 : vector<1x32xf32> to vector<8x32xf32>
    %129 = arith.addf %126, %128 : vector<8x32xf32>
    %130 = arith.addf %1, %129 : vector<8x32xf32>
    %c0_49 = arith.constant 0 : index
    %c0_50 = arith.constant 0 : index
    %131 = vector.load %arg9[%c0_49, %c0_50] : memref<1x32xf32, #tpu.memory_space<vmem>>, vector<1x32xf32>
    %c0_51 = arith.constant 0 : index
    %c0_52 = arith.constant 0 : index
    %132 = vector.load %arg10[%c0_51, %c0_52] : memref<1x32xf32, #tpu.memory_space<vmem>>, vector<1x32xf32>
    %cst_53 = arith.constant dense<0.000000e+00> : vector<8xf32>
    %133 = vector.multi_reduction <add>, %130, %cst_53 [1] : vector<8x32xf32> to vector<8xf32>
    %134 = vector.shape_cast %133 : vector<8xf32> to vector<8x1xf32>
    %cst_54 = arith.constant 3.200000e+01 : f32
    %135 = vector.broadcast %cst_54 : f32 to vector<8x1xf32>
    %136 = arith.divf %134, %135 : vector<8x1xf32>
    %137 = vector.broadcast %136 : vector<8x1xf32> to vector<8x32xf32>
    %138 = arith.subf %130, %137 : vector<8x32xf32>
    %139 = arith.mulf %138, %138 : vector<8x32xf32>
    %cst_55 = arith.constant dense<0.000000e+00> : vector<8xf32>
    %140 = vector.multi_reduction <add>, %139, %cst_55 [1] : vector<8x32xf32> to vector<8xf32>
    %141 = vector.shape_cast %140 : vector<8xf32> to vector<8x1xf32>
    %cst_56 = arith.constant 3.200000e+01 : f32
    %142 = vector.broadcast %cst_56 : f32 to vector<8x1xf32>
    %143 = arith.divf %141, %142 : vector<8x1xf32>
    %144 = vector.broadcast %136 : vector<8x1xf32> to vector<8x32xf32>
    %145 = arith.subf %130, %144 : vector<8x32xf32>
    %cst_57 = arith.constant 9.99999974E-6 : f32
    %146 = vector.broadcast %cst_57 : f32 to vector<8x1xf32>
    %147 = arith.addf %143, %146 : vector<8x1xf32>
    %148 = math.rsqrt %147 : vector<8x1xf32>
    %149 = vector.broadcast %148 : vector<8x1xf32> to vector<8x32xf32>
    %150 = arith.mulf %145, %149 : vector<8x32xf32>
    %151 = vector.broadcast %131 : vector<1x32xf32> to vector<8x32xf32>
    %152 = arith.mulf %150, %151 : vector<8x32xf32>
    %153 = vector.broadcast %132 : vector<1x32xf32> to vector<8x32xf32>
    %154 = arith.addf %152, %153 : vector<8x32xf32>
    %c0_58 = arith.constant 0 : index
    %c0_59 = arith.constant 0 : index
    %c0_60 = arith.constant 0 : index
    %155 = vector.load %arg12[%c0_58, %c0_59, %c0_60] : memref<1x8x32xf32, #tpu.memory_space<vmem>>, vector<1x8x32xf32>
    %156 = vector.shape_cast %155 : vector<1x8x32xf32> to vector<8x32xf32>
    %157 = vector.shape_cast %154 : vector<8x32xf32> to vector<1x8x32xf32>
    tpu.vector_store %arg12[%c0_58, %c0_59, %c0_60], %157 {strides = array<i32>} : memref<1x8x32xf32, #tpu.memory_space<vmem>>, vector<1x8x32xf32>,
    return
  }
  func.func @transform_0(%arg0: i32) -> (i32, i32, i32) {
    %c0_i32 = arith.constant 0 : i32
    %c0_i32_0 = arith.constant 0 : i32
    %c0_i32_1 = arith.constant 0 : i32
    return %arg0, %c0_i32, %c0_i32_0 : i32, i32, i32
  }
  func.func @transform_1(%arg0: i32) -> (i32, i32, i32) {
    %c0_i32 = arith.constant 0 : i32
    %c0_i32_0 = arith.constant 0 : i32
    %c0_i32_1 = arith.constant 0 : i32
    return %arg0, %c0_i32, %c0_i32_0 : i32, i32, i32
  }
  func.func @transform_2(%arg0: i32) -> (i32, i32) {
    %c0_i32 = arith.constant 0 : i32
    %c0_i32_0 = arith.constant 0 : i32
    %c0_i32_1 = arith.constant 0 : i32
    return %c0_i32, %c0_i32_0 : i32, i32
  }
  func.func @transform_3(%arg0: i32) -> (i32, i32) {
    %c0_i32 = arith.constant 0 : i32
    %c0_i32_0 = arith.constant 0 : i32
    %c0_i32_1 = arith.constant 0 : i32
    return %c0_i32, %c0_i32_0 : i32, i32
  }
  func.func @transform_4(%arg0: i32) -> (i32, i32) {
    %c0_i32 = arith.constant 0 : i32
    %c0_i32_0 = arith.constant 0 : i32
    %c0_i32_1 = arith.constant 0 : i32
    return %c0_i32, %c0_i32_0 : i32, i32
  }
  func.func @transform_5(%arg0: i32) -> (i32, i32) {
    %c0_i32 = arith.constant 0 : i32
    %c0_i32_0 = arith.constant 0 : i32
    %c0_i32_1 = arith.constant 0 : i32
    return %c0_i32, %c0_i32_0 : i32, i32
  }
  func.func @transform_6(%arg0: i32) -> (i32, i32) {
    %c0_i32 = arith.constant 0 : i32
    %c0_i32_0 = arith.constant 0 : i32
    %c0_i32_1 = arith.constant 0 : i32
    return %c0_i32, %c0_i32_0 : i32, i32
  }
  func.func @transform_7(%arg0: i32) -> (i32, i32) {
    %c0_i32 = arith.constant 0 : i32
    %c0_i32_0 = arith.constant 0 : i32
    %c0_i32_1 = arith.constant 0 : i32
    return %c0_i32, %c0_i32_0 : i32, i32
  }
  func.func @transform_8(%arg0: i32) -> (i32, i32) {
    %c0_i32 = arith.constant 0 : i32
    %c0_i32_0 = arith.constant 0 : i32
    %c0_i32_1 = arith.constant 0 : i32
    return %c0_i32, %c0_i32_0 : i32, i32
  }
  func.func @transform_9(%arg0: i32) -> (i32, i32) {
    %c0_i32 = arith.constant 0 : i32
    %c0_i32_0 = arith.constant 0 : i32
    %c0_i32_1 = arith.constant 0 : i32
    return %c0_i32, %c0_i32_0 : i32, i32
  }
  func.func @transform_10(%arg0: i32) -> (i32, i32, i32) {
    %c0_i32 = arith.constant 0 : i32
    %c0_i32_0 = arith.constant 0 : i32
    %c0_i32_1 = arith.constant 0 : i32
    return %arg0, %c0_i32, %c0_i32_0 : i32, i32, i32
  }
  func.func @transform_11(%arg0: i32) -> (i32, i32, i32) {
    %c0_i32 = arith.constant 0 : i32
    %c0_i32_0 = arith.constant 0 : i32
    %c0_i32_1 = arith.constant 0 : i32
    return %arg0, %c0_i32, %c0_i32_0 : i32, i32, i32
  }
}

module attributes {stable_mosaic.version = 11 : i64} {
  func.func @_head_ce_kernel(%arg0: i32, %arg1: memref<1x7x32xf32, #tpu.memory_space<vmem>>, %arg2: memref<32x32xf32, #tpu.memory_space<vmem>>, %arg3: memref<1x32xf32, #tpu.memory_space<vmem>>, %arg4: memref<64x32xf32, #tpu.memory_space<vmem>>, %arg5: memref<1x7x1xi32, #tpu.memory_space<vmem>>, %arg6: memref<1x1xf32, #tpu.memory_space<vmem>>, %arg7: memref<1x1xf32, #tpu.memory_space<vmem>>) attributes {dimension_semantics = [#tpu.dimension_semantics<arbitrary>], iteration_bounds = array<i64: 2>, scalar_prefetch = 0 : i64, scratch_operands = 0 : i64, tpu.core_type = #tpu.core_type<tc>, window_params = [{transform_indices = @transform_0, window_bounds = array<i64: 1, 7, 32>}, {pipeline_mode = #tpu.pipeline_mode<synchronous>, transform_indices = @transform_1, window_bounds = array<i64: 32, 32>}, {pipeline_mode = #tpu.pipeline_mode<synchronous>, transform_indices = @transform_2, window_bounds = array<i64: 1, 32>}, {pipeline_mode = #tpu.pipeline_mode<synchronous>, transform_indices = @transform_3, window_bounds = array<i64: 64, 32>}, {transform_indices = @transform_4, window_bounds = array<i64: 1, 7, 1>}, {pipeline_mode = #tpu.pipeline_mode<synchronous>, transform_indices = @transform_5, window_bounds = array<i64: 1, 1>}, {pipeline_mode = #tpu.pipeline_mode<synchronous>, transform_indices = @transform_6, window_bounds = array<i64: 1, 1>}]} {
    %c0_i32 = arith.constant 0 : i32
    %0 = arith.cmpi eq, %arg0, %c0_i32 : i32
    %1 = arith.extui %0 : i1 to i32
    %c0_i32_0 = arith.constant 0 : i32
    %2 = arith.cmpi ne, %1, %c0_i32_0 : i32
    scf.if %2 {
      %cst_26 = arith.constant 0.000000e+00 : f32
      %52 = vector.broadcast %cst_26 : f32 to vector<1x1xf32>
      %c0_27 = arith.constant 0 : index
      %c0_28 = arith.constant 0 : index
      %53 = vector.load %arg6[%c0_27, %c0_28] : memref<1x1xf32, #tpu.memory_space<vmem>>, vector<1x1xf32>
      tpu.vector_store %arg6[%c0_27, %c0_28], %52 {strides = array<i32>} : memref<1x1xf32, #tpu.memory_space<vmem>>, vector<1x1xf32>,
      %cst_29 = arith.constant 0.000000e+00 : f32
      %54 = vector.broadcast %cst_29 : f32 to vector<1x1xf32>
      %c0_30 = arith.constant 0 : index
      %c0_31 = arith.constant 0 : index
      %55 = vector.load %arg7[%c0_30, %c0_31] : memref<1x1xf32, #tpu.memory_space<vmem>>, vector<1x1xf32>
      tpu.vector_store %arg7[%c0_30, %c0_31], %54 {strides = array<i32>} : memref<1x1xf32, #tpu.memory_space<vmem>>, vector<1x1xf32>,
    } else {
    }
    %c0 = arith.constant 0 : index
    %c0_1 = arith.constant 0 : index
    %c0_2 = arith.constant 0 : index
    %3 = vector.load %arg1[%c0, %c0_1, %c0_2] : memref<1x7x32xf32, #tpu.memory_space<vmem>>, vector<1x7x32xf32>
    %4 = vector.shape_cast %3 : vector<1x7x32xf32> to vector<7x32xf32>
    %5 = arith.truncf %4 : vector<7x32xf32> to vector<7x32xbf16>
    %c0_3 = arith.constant 0 : index
    %c0_4 = arith.constant 0 : index
    %6 = vector.load %arg2[%c0_3, %c0_4] : memref<32x32xf32, #tpu.memory_space<vmem>>, vector<32x32xf32>
    %7 = arith.truncf %6 : vector<32x32xf32> to vector<32x32xbf16>
    %cst = arith.constant dense<0.000000e+00> : vector<7x32xf32>
    %8 = tpu.matmul %5, %7, %cst {dimension_numbers = #tpu.dot_dimension_numbers<[1], [0], [0], [1], [0, 0, 1, 1], [], []>} : vector<7x32xbf16>, vector<32x32xbf16>, vector<7x32xf32> -> vector<7x32xf32>
    %c0_5 = arith.constant 0 : index
    %c0_6 = arith.constant 0 : index
    %9 = vector.load %arg3[%c0_5, %c0_6] : memref<1x32xf32, #tpu.memory_space<vmem>>, vector<1x32xf32>
    %10 = vector.broadcast %9 : vector<1x32xf32> to vector<7x32xf32>
    %11 = arith.addf %8, %10 : vector<7x32xf32>
    %12 = math.tanh %11 : vector<7x32xf32>
    %13 = arith.truncf %12 : vector<7x32xf32> to vector<7x32xbf16>
    %c0_7 = arith.constant 0 : index
    %c0_8 = arith.constant 0 : index
    %14 = vector.load %arg4[%c0_7, %c0_8] : memref<64x32xf32, #tpu.memory_space<vmem>>, vector<64x32xf32>
    %15 = arith.truncf %14 : vector<64x32xf32> to vector<64x32xbf16>
    %cst_9 = arith.constant dense<0.000000e+00> : vector<7x64xf32>
    %16 = tpu.matmul %13, %15, %cst_9 {dimension_numbers = #tpu.dot_dimension_numbers<[1], [1], [0], [0], [0, 0, 1, 0], [], []>} : vector<7x32xbf16>, vector<64x32xbf16>, vector<7x64xf32> -> vector<7x64xf32>
    %c0_10 = arith.constant 0 : index
    %c0_11 = arith.constant 0 : index
    %c0_12 = arith.constant 0 : index
    %17 = vector.load %arg5[%c0_10, %c0_11, %c0_12] : memref<1x7x1xi32, #tpu.memory_space<vmem>>, vector<1x7x1xi32>
    %18 = vector.shape_cast %17 : vector<1x7x1xi32> to vector<7x1xi32>
    %cst_13 = arith.constant dense<0xFF800000> : vector<7xf32>
    %19 = vector.multi_reduction <maximumf>, %16, %cst_13 [1] : vector<7x64xf32> to vector<7xf32>
    %20 = vector.shape_cast %19 : vector<7xf32> to vector<7x1xf32>
    %21 = vector.broadcast %20 : vector<7x1xf32> to vector<7x64xf32>
    %22 = arith.subf %16, %21 : vector<7x64xf32>
    %23 = math.exp %22 : vector<7x64xf32>
    %cst_14 = arith.constant dense<0.000000e+00> : vector<7xf32>
    %24 = vector.multi_reduction <add>, %23, %cst_14 [1] : vector<7x64xf32> to vector<7xf32>
    %25 = vector.shape_cast %24 : vector<7xf32> to vector<7x1xf32>
    %26 = math.log %25 : vector<7x1xf32>
    %27 = arith.addf %26, %20 : vector<7x1xf32>
    %28 = tpu.iota {dimensions = array<i32: 1>} : vector<7x64xi32>
    %29 = vector.broadcast %18 : vector<7x1xi32> to vector<7x64xi32>
    %30 = arith.cmpi eq, %28, %29 : vector<7x64xi32>
    %31 = arith.extui %30 : vector<7x64xi1> to vector<7x64xi32>
    %32 = arith.sitofp %31 : vector<7x64xi32> to vector<7x64xf32>
    %33 = arith.mulf %16, %32 : vector<7x64xf32>
    %cst_15 = arith.constant dense<0.000000e+00> : vector<7xf32>
    %34 = vector.multi_reduction <add>, %33, %cst_15 [1] : vector<7x64xf32> to vector<7xf32>
    %35 = vector.shape_cast %34 : vector<7xf32> to vector<7x1xf32>
    %c-1_i32 = arith.constant -1 : i32
    %36 = vector.broadcast %c-1_i32 : i32 to vector<7x1xi32>
    %37 = arith.cmpi ne, %18, %36 : vector<7x1xi32>
    %38 = arith.extui %37 : vector<7x1xi1> to vector<7x1xi32>
    %39 = arith.sitofp %38 : vector<7x1xi32> to vector<7x1xf32>
    %40 = arith.subf %27, %35 : vector<7x1xf32>
    %41 = arith.mulf %40, %39 : vector<7x1xf32>
    %c0_16 = arith.constant 0 : index
    %c0_17 = arith.constant 0 : index
    %42 = vector.load %arg6[%c0_16, %c0_17] : memref<1x1xf32, #tpu.memory_space<vmem>>, vector<1x1xf32>
    %cst_18 = arith.constant dense<0.000000e+00> : vector<1xf32>
    %43 = vector.multi_reduction <add>, %41, %cst_18 [0] : vector<7x1xf32> to vector<1xf32>
    %44 = vector.shape_cast %43 : vector<1xf32> to vector<1x1xf32>
    %45 = arith.addf %42, %44 : vector<1x1xf32>
    %c0_19 = arith.constant 0 : index
    %c0_20 = arith.constant 0 : index
    %46 = vector.load %arg6[%c0_19, %c0_20] : memref<1x1xf32, #tpu.memory_space<vmem>>, vector<1x1xf32>
    tpu.vector_store %arg6[%c0_19, %c0_20], %45 {strides = array<i32>} : memref<1x1xf32, #tpu.memory_space<vmem>>, vector<1x1xf32>,
    %c0_21 = arith.constant 0 : index
    %c0_22 = arith.constant 0 : index
    %47 = vector.load %arg7[%c0_21, %c0_22] : memref<1x1xf32, #tpu.memory_space<vmem>>, vector<1x1xf32>
    %cst_23 = arith.constant dense<0.000000e+00> : vector<1xf32>
    %48 = vector.multi_reduction <add>, %39, %cst_23 [0] : vector<7x1xf32> to vector<1xf32>
    %49 = vector.shape_cast %48 : vector<1xf32> to vector<1x1xf32>
    %50 = arith.addf %47, %49 : vector<1x1xf32>
    %c0_24 = arith.constant 0 : index
    %c0_25 = arith.constant 0 : index
    %51 = vector.load %arg7[%c0_24, %c0_25] : memref<1x1xf32, #tpu.memory_space<vmem>>, vector<1x1xf32>
    tpu.vector_store %arg7[%c0_24, %c0_25], %50 {strides = array<i32>} : memref<1x1xf32, #tpu.memory_space<vmem>>, vector<1x1xf32>,
    return
  }
  func.func @transform_0(%arg0: i32) -> (i32, i32, i32) {
    %c0_i32 = arith.constant 0 : i32
    %c0_i32_0 = arith.constant 0 : i32
    %c0_i32_1 = arith.constant 0 : i32
    return %arg0, %c0_i32, %c0_i32_0 : i32, i32, i32
  }
  func.func @transform_1(%arg0: i32) -> (i32, i32) {
    %c0_i32 = arith.constant 0 : i32
    %c0_i32_0 = arith.constant 0 : i32
    %c0_i32_1 = arith.constant 0 : i32
    return %c0_i32, %c0_i32_0 : i32, i32
  }
  func.func @transform_2(%arg0: i32) -> (i32, i32) {
    %c0_i32 = arith.constant 0 : i32
    %c0_i32_0 = arith.constant 0 : i32
    %c0_i32_1 = arith.constant 0 : i32
    return %c0_i32, %c0_i32_0 : i32, i32
  }
  func.func @transform_3(%arg0: i32) -> (i32, i32) {
    %c0_i32 = arith.constant 0 : i32
    %c0_i32_0 = arith.constant 0 : i32
    %c0_i32_1 = arith.constant 0 : i32
    return %c0_i32, %c0_i32_0 : i32, i32
  }
  func.func @transform_4(%arg0: i32) -> (i32, i32, i32) {
    %c0_i32 = arith.constant 0 : i32
    %c0_i32_0 = arith.constant 0 : i32
    %c0_i32_1 = arith.constant 0 : i32
    return %arg0, %c0_i32, %c0_i32_0 : i32, i32, i32
  }
  func.func @transform_5(%arg0: i32) -> (i32, i32) {
    %c0_i32 = arith.constant 0 : i32
    %c0_i32_0 = arith.constant 0 : i32
    %c0_i32_1 = arith.constant 0 : i32
    return %c0_i32, %c0_i32_0 : i32, i32
  }
  func.func @transform_6(%arg0: i32) -> (i32, i32) {
    %c0_i32 = arith.constant 0 : i32
    %c0_i32_0 = arith.constant 0 : i32
    %c0_i32_1 = arith.constant 0 : i32
    return %c0_i32, %c0_i32_0 : i32, i32
  }
}

</mosaic_0001>

<bundles_post_ra>
// kernel: seq2seq_forward.7
= control target key start
LH: loop header
LB: loop body
LE: loop exit
PB: predicated region body
PF: predicated region fallthrough
CT: control target
= control target key end

     0   :  { %s683_s21 = smov 0   ;;  %s732_s0 = inlined_call_operand.vmem [shape: f32[2,16,16], index: 0, kind: input, shape index: {}]   ;;  %s733_s1 = inlined_call_operand.vmem [shape: f32[2,16,32], index: 1, kind: input, shape index: {}]   ;;  %s734_s2 = inlined_call_operand.vmem [shape: f32[2,16,1], index: 2, kind: input, shape index: {}]   ;;  %s735_s3 = inlined_call_operand.vmem [shape: f32[2,16,32], index: 3, kind: input, shape index: {}]   ;;  %s736_s4 = inlined_call_operand.vmem [shape: f32[1,32], index: 4, kind: input, shape index: {}]   ;;  %s737_s5 = inlined_call_operand.vmem [shape: f32[1,32], index: 5, kind: input, shape index: {}]   ;;  %s738_s6 = inlined_call_operand.vmem [shape: f32[2,16,32], index: 6, kind: output, shape index: {}]  }
   0x1 LB: > { %s583_s22 = sadd.s32 4294967295, %s645_s21   ;;  %p587_p0 = scmp.ge.s32.totalorder %s645_s21, 1  ;;  %s645_s21 = sphi %s683_s21, %s16_s21  }
   0x2   : > { %p242_p1 = scmp.lt.s32.totalorder %s645_s21, 3 }
   0x4   : > { %p243_p2 = pnand %p587_p0, %p242_p1 }
   0x5   : > { %p287_p3 = scmp.lt.s32.totalorder (!%p243_p2), %s583_s22, 1 }
   0x6   : > { %246 = sbr.rel (%p243_p2) target bundleno = 690 (0x2b2), region = 44 }
   0xb   : > { %s740_s22 = smov (!%p287_p3, %s583_s22), 1  ;;  %vm320_vm0 = vcmask 130048   ;;  %v647_v6 = vmov 0   ;;  %vm446_vm1 = vcmask 261120   ;;  %v600_v54 = vld [vmem:[%s736_s4] ss:$0 sm:$0xff] }
   0xc   : > { %s691_s23 = sshll.u32 %s740_s22, 4  ;;  %630 = vset.pattern.permute.xlu1 %v647_v6  ;;  %629 = vset.pattern.permute.xlu0 %v647_v6  ;;  %v601_v56 = vld [vmem:[%s737_s5] ss:$0 sm:$0xff] }
   0xd   : > { %s291_s26 = scalar_lea.vmem %s732_s0, %s691_s23  ;;  %s296_s29 = scalar_lea.vmem %s733_s1, %s691_s23 }
   0xe   : > { %v312_v0 = vld [vmem:[%s291_s26] sm:$0xff]  ;;  %v313_v1 = vld [vmem:[%s291_s26 + $0x8] sm:$0xff]  ;;  %s301_s8 = scalar_lea.vmem %s734_s2, %s691_s23  ;;  %s306_s11 = scalar_lea.vmem %s735_s3, %s691_s23 }
   0xf   : > { %v321_v2 = vsel %vm320_vm0, %v312_v0, 0.0  ;;  %v324_v3 = vsel %vm320_vm0, %v313_v1, 0.0  ;;  %v315_v4 = vld [vmem:[%s296_s29 + $0x8] sm:$0xff]  ;;  %v314_v5 = vld [vmem:[%s296_s29] sm:$0xff]  ;;  %s311_s18 = scalar_lea.vmem %s738_s6, %s691_s23 }
  0x10   : > { %322 = vadd.xlane.f32.xlu0 %v321_v2  ;;  %613 = vmatprep.subr.mxu0 %v315_v4  ;;  %v316_v7 = vld [vmem:[%s301_s8] sm:$0xff]  ;;  %v317_v8 = vld [vmem:[%s301_s8 + $0x8] sm:$0xff] }
  0x11   : > { %614 = vmatpush3.msra.mxu0 %v315_v4  ;;  %v414_v9 = vsub.f32 1.0, %v316_v7  ;;  %v415_v10 = vsub.f32 1.0, %v317_v8  ;;  %v318_v29 = vld [vmem:[%s306_s11] sm:$0xff]  ;;  %v319_v32 = vld [vmem:[%s306_s11 + $0x8] sm:$0xff] }
  0x12   : > { %615 = vmatprep.subr.mxu0 %v314_v5 }
  0x13   : > { %616 = vmatpush3.msra.mxu0 %v314_v5  ;;  %418 = vperm.xlu1 %630, %v414_v9  }
  0x14   : > { %325 = vadd.xlane.f32.xlu0 %v324_v3 }
  0x17   : > { %423 = vperm.xlu1 %630, %v415_v10  }
  0x1b   : > { %435 = vperm.xlu1 %630, %v317_v8  }
  0x2a   : > { %430 = vperm.xlu0 %629, %v316_v7  }
  0x8e   : > { %v419_v19 = vpop.permute.xlu1 %418 }
  0x8f   : > { %v426_v26 = vmul.f32 %v419_v19, %v314_v5 }
  0x92   : > { %v424_v20 = vpop.permute.xlu1 %423 }
  0x93   : > { %v427_v27 = vmul.f32 %v424_v20, %v315_v4 }
  0x96   : > { %v436_v21 = vpop.permute.xlu1 %435 }
  0x99   : > { %v323_v11 = vpop.xlane.xlu0 %322 }
  0x9a   : > { %v327_v12 = vadd.f32 1e-10, %v323_v11 }
  0x9c   : > { %631 = vrcp.f32 %v327_v12 }
  0x9d   : > { %v326_v13 = vpop.xlane.xlu0 %325 }
  0x9e   : > { %v328_v14 = vadd.f32 1e-10, %v326_v13 }
  0xa0   : > { %633 = vrcp.f32 %v328_v14 }
  0xa5   : > { %v431_v23 = vpop.permute.xlu0 %430 }
  0xa9   : > { %v632_v15 = vpop.eup %631 }
  0xaa   : > { %v330_v16 = vmul.f32 %v632_v15, %v312_v0 }
  0xac   : > { %617 = vmatprep.mubr.msk.f32.mxu0 %vm320_vm0, %v330_v16 }
  0xad   : > { %v634_v17 = vpop.eup %633 }
  0xae   : > { %v332_v18 = vmul.f32 %v634_v17, %v313_v1 }
  0xb0   : > { %618 = vmatmul.mubr.msk.f32.vlgmr.msra.gmra.mxu0 %vm320_vm0, %v332_v18 }
 0x170   : > { %v619_v22 = vpop.f32.mrf.mxu0 }
 0x171   : > { %v439_v24 = vmul.f32 %v619_v22, %v436_v21 }
 0x172   : > { %v405_v25 = vpop.f32.mrf.mxu0 }
 0x173   : > { %v438_v28 = vmul.f32 %v431_v23, %v405_v25  ;;  %v441_v30 = vadd.f32 %v439_v24, %v427_v27 }
 0x175   : > { %v440_v31 = vadd.f32 %v438_v28, %v426_v26  ;;  %v443_v35 = vadd.f32 %v441_v30, %v319_v32 }
 0x177   : > { %v442_v33 = vadd.f32 %v440_v31, %v318_v29  ;;  %v450_v36 = vsel %vm446_vm1, %v443_v35, 0.0 }
 0x179   : > { %v447_v34 = vsel %vm446_vm1, %v442_v33, 0.0 }
 0x17a   : > { %448 = vadd.xlane.f32.xlu1 %v447_v34 }
 0x17e   : > { %451 = vadd.xlane.f32.xlu1 %v450_v36 }
 0x203   : > { %v449_v37 = vpop.xlane.xlu1 %448 }
 0x204   : > { %v454_v38 = vmul.f32 0.03125, %v449_v37 }
 0x206   : > { %v456_v39 = vsub.f32 %v442_v33, %v454_v38 }
 0x207   : > { %v452_v40 = vpop.xlane.xlu1 %451 }
 0x208   : > { %v455_v41 = vmul.f32 0.03125, %v452_v40  ;;  %v458_v42 = vmul.f32 %v456_v39, %v456_v39 }
 0x20a   : > { %v457_v43 = vsub.f32 %v443_v35, %v455_v41  ;;  %v460_v44 = vsel %vm446_vm1, %v458_v42, 0.0 }
 0x20b   : > { %461 = vadd.xlane.f32.xlu0 %v460_v44 }
 0x20c   : > { %v459_v45 = vmul.f32 %v457_v43, %v457_v43 }
 0x20e   : > { %v463_v46 = vsel %vm446_vm1, %v459_v45, 0.0 }
 0x20f   : > { %464 = vadd.xlane.f32.xlu1 %v463_v46 }
 0x294   : > { %v462_v47 = vpop.xlane.xlu0 %461 }
 0x295   : > { %v466_v48 = vmul.f32 0.03125, %v462_v47 }
 0x297   : > { %v468_v49 = vadd.f32 1e-05, %v466_v48 }
 0x298   : > { %v465_v50 = vpop.xlane.xlu1 %464 }
 0x299   : > { %635 = vrsqrt.f32 %v468_v49  ;;  %v467_v51 = vmul.f32 0.03125, %v465_v50 }
 0x29b   : > { %v469_v52 = vadd.f32 1e-05, %v467_v51 }
 0x29d   : > { %637 = vrsqrt.f32 %v469_v52 }
 0x2a6   : > { %v636_v53 = vpop.eup %635 }
 0x2a7   : > { %v472_v55 = vmul.f32 %v636_v53, %v456_v39 }
 0x2a9   : > { %v480_v57 = vmul.f32 %v600_v54, %v472_v55 }
 0x2aa   : > { %v638_v58 = vpop.eup %637 }
 0x2ab   : > { %v488_v59 = vadd.f32 %v601_v56, %v480_v57  ;;  %v473_v60 = vmul.f32 %v638_v58, %v457_v43 }
 0x2ad   : > { %490 = vst.msk [vmem:[%s311_s18] sm:$0xff] %vm446_vm1, %v488_v59  ;;  %v481_v61 = vmul.f32 %v600_v54, %v473_v60 }
 0x2af   : > { %v489_v62 = vadd.f32 %v601_v56, %v481_v61 }
 0x2b1   : > { %491 = vst.msk [vmem:[%s311_s18 + $0x8] sm:$0xff] %vm446_vm1, %v489_v62 }
 0x2b2 PF: > { %s16_s21 = sadd.s32 1, %s645_s21  }
 0x2b3   : > { %p13_p4 = scmp.ge.s32.totalorder %s16_s21, 4  }
 0x2b5   :  { %15 = sbr.rel (!%p13_p4) target bundleno = 1 (0x1), region = 83 }

// kernel: seq2seq_forward.9
= control target key start
LH: loop header
LB: loop body
LE: loop exit
PB: predicated region body
PF: predicated region fallthrough
CT: control target
= control target key end

     0   :  { %s623_s24 = smov 0   ;;  %s702_s0 = inlined_call_operand.vmem [shape: f32[2,16,32], index: 0, kind: input, shape index: {}]   ;;  %s703_s1 = inlined_call_operand.vmem [shape: f32[32,64], index: 1, kind: input, shape index: {}]   ;;  %s704_s2 = inlined_call_operand.vmem [shape: f32[1,64], index: 2, kind: input, shape index: {}]   ;;  %s705_s3 = inlined_call_operand.vmem [shape: f32[64,32], index: 3, kind: input, shape index: {}]   ;;  %s706_s4 = inlined_call_operand.vmem [shape: f32[1,32], index: 4, kind: input, shape index: {}]   ;;  %s707_s5 = inlined_call_operand.vmem [shape: f32[1,32], index: 5, kind: input, shape index: {}]   ;;  %s708_s6 = inlined_call_operand.vmem [shape: f32[1,32], index: 6, kind: input, shape index: {}]   ;;  %s709_s7 = inlined_call_operand.vmem [shape: f32[2,16,32], index: 7, kind: output, shape index: {}]  }
   0x1 LB: > { %s512_s25 = sadd.s32 4294967295, %s579_s24   ;;  %p516_p0 = scmp.ge.s32.totalorder %s579_s24, 1  ;;  %s579_s24 = sphi %s623_s24, %s17_s24  }
   0x2   : > { %p237_p1 = scmp.lt.s32.totalorder %s579_s24, 3 }
   0x4   : > { %p238_p2 = pnand %p516_p0, %p237_p1 }
   0x5   : > { %p269_p3 = scmp.lt.s32.totalorder (!%p238_p2), %s512_s25, 1 }
   0x6   : > { %241 = sbr.rel (%p238_p2) target bundleno = 734 (0x2de), region = 48 }
   0xb   : > { %v285_v0 = vld [vmem:[%s703_s1 + $0x10] sm:$0xff]  ;;  %v286_v1 = vld [vmem:[%s703_s1 + $0x18] sm:$0xff]  ;;  %v283_v2 = vld [vmem:[%s703_s1] sm:$0xff]  ;;  %v581_v3 = vmov 0.0   ;;  %vm582_vm0 = vmmov 0   ;;  %s711_s25 = smov (!%p269_p3, %s512_s25), 1 }
   0xc   : > { %539 = vmatprep.subr.bf16.mxu0 %v581_v3  ;;  %v288_v4 = vpack.c.bf16 %v286_v1, %v285_v0  ;;  %v284_v5 = vld [vmem:[%s703_s1 + $0x8] sm:$0xff]  ;;  %543 = vmatprep.mubr.msk.bf16.mxu0 %vm582_vm0, %v581_v3  ;;  %v350_v6 = vld [vmem:[%s705_s3 + $0x30] sm:$0xff]  ;;  %v351_v7 = vld [vmem:[%s705_s3 + $0x38] sm:$0xff]  ;;  %s529_s15 = sshll.u32 %s711_s25, 4  ;;  %vm296_vm1 = vcmask 261120   ;;  %vm363_vm2 = vcmask 523264  }
   0xd   : > { %547 = vmatprep.subr.bf16.mxu1 %v581_v3  ;;  %v355_v8 = vpack.c.bf16 %v351_v7, %v350_v6  ;;  %555 = vmatprep.mubr.msk.bf16.mxu1 %vm582_vm0, %v581_v3  ;;  %v287_v9 = vpack.c.bf16 %v284_v5, %v283_v2  ;;  %s273_s18 = scalar_lea.vmem %s702_s0, %s529_s15  ;;  %v348_v13 = vld [vmem:[%s705_s3 + $0x20] sm:$0xff]  ;;  %v349_v14 = vld [vmem:[%s705_s3 + $0x28] sm:$0xff]  ;;  %v346_v16 = vld [vmem:[%s705_s3 + $0x10] sm:$0xff]  ;;  %s278_s21 = scalar_lea.vmem %s709_s7, %s529_s15 }
   0xe   : > { %540 = vmatpush3.bf16.msra.mxu0 %v288_v4  ;;  %v280_v10 = vld [vmem:[%s273_s18] sm:$0xff]  ;;  %v281_v11 = vld [vmem:[%s273_s18 + $0x8] sm:$0xff]  ;;  %v354_v15 = vpack.c.bf16 %v349_v14, %v348_v13  ;;  %v347_v17 = vld [vmem:[%s705_s3 + $0x18] sm:$0xff] }
   0xf   : > { %541 = vmatprep.subr.bf16.mxu0 %v581_v3  ;;  %548 = vmatpush3.bf16.msra.mxu1 %v355_v8  ;;  %v282_v12 = vpack.c.bf16 %v281_v11, %v280_v10  ;;  %v353_v18 = vpack.c.bf16 %v347_v17, %v346_v16  ;;  %v344_v19 = vld [vmem:[%s705_s3] sm:$0xff]  ;;  %v345_v20 = vld [vmem:[%s705_s3 + $0x8] sm:$0xff] }
  0x10   : > { %549 = vmatprep.subr.bf16.mxu1 %v581_v3  ;;  %v352_v21 = vpack.c.bf16 %v345_v20, %v344_v19  ;;  %v521_v22 = vld [vmem:[%s704_s2] ss:$0 sm:$0xff] }
  0x11   : > { %v523_v32 = vld [vmem:[%s706_s4] ss:$0 sm:$0xff] }
  0x12   : > { %542 = vmatpush3.bf16.msra.mxu0 %v287_v9  ;;  %v525_v60 = vld [vmem:[%s707_s5] ss:$0 sm:$0xff] }
  0x13   : > { %550 = vmatpush3.bf16.msra.mxu1 %v354_v15  ;;  %v526_v62 = vld [vmem:[%s708_s6] ss:$0 sm:$0xff] }
  0x14   : > { %551 = vmatprep.subr.bf16.mxu1 %v581_v3 }
  0x15   : > { %544 = vmatmul.mubr.msk.bf16.vlgmr.msra.gmra.mxu0 %vm296_vm1, %v282_v12 }
  0x17   : > { %552 = vmatpush3.bf16.msra.mxu1 %v353_v18 }
  0x18   : > { %553 = vmatprep.subr.bf16.mxu1 %v581_v3 }
  0x1b   : > { %554 = vmatpush3.bf16.msra.mxu1 %v352_v21 }
  0xd5   : > { %v334_v23 = vpop.f32.mrf.mxu0 }
  0xd6   : > { %v335_v25 = vadd.f32 %v521_v22, %v334_v23 }
  0xd7   : > { %v545_v24 = vpop.f32.mrf.mxu0 }
  0xd8   : > { %v341_v29 = vmax.f32 %v335_v25, 0.0 }
  0xd9   : > { %v337_v26 = vpop.f32.mrf.mxu0 }
  0xda   : > { %v338_v27 = vadd.f32 %v521_v22, %v337_v26 }
  0xdb   : > { %v546_v28 = vpop.f32.mrf.mxu0 }
  0xdc   : > { %v342_v30 = vmax.f32 %v338_v27, 0.0 }
  0xde   : > { %v343_v31 = vpack.c.bf16 %v342_v30, %v341_v29 }
  0xe0   : > { %556 = vmatmul.mubr.msk.bf16.vlgmr.msra.gmra.mxu1 %vm363_vm2, %v343_v31 }
 0x1a0   : > { %v401_v33 = vpop.f32.mrf.mxu1 }
 0x1a1   : > { %v402_v34 = vadd.f32 %v523_v32, %v401_v33 }
 0x1a2   : > { %v557_v35 = vpop.f32.mrf.mxu1 }
 0x1a3   : > { %v408_v36 = vadd.f32 %v402_v34, %v280_v10 }
 0x1a4   : > { %v404_v37 = vpop.f32.mrf.mxu1 }
 0x1a5   : > { %v405_v38 = vadd.f32 %v523_v32, %v404_v37  ;;  %v412_v39 = vsel %vm296_vm1, %v408_v36, 0.0 }
 0x1a6   : > { %413 = vadd.xlane.f32.xlu0 %v412_v39  ;;  %v558_v40 = vpop.f32.mrf.mxu1 }
 0x1a7   : > { %v409_v41 = vadd.f32 %v405_v38, %v281_v11 }
 0x1a9   : > { %v415_v42 = vsel %vm296_vm1, %v409_v41, 0.0 }
 0x1aa   : > { %416 = vadd.xlane.f32.xlu0 %v415_v42 }
 0x22f   : > { %v414_v43 = vpop.xlane.xlu0 %413 }
 0x230   : > { %v419_v44 = vmul.f32 0.03125, %v414_v43 }
 0x232   : > { %v421_v45 = vsub.f32 %v408_v36, %v419_v44 }
 0x233   : > { %v417_v46 = vpop.xlane.xlu0 %416 }
 0x234   : > { %v420_v47 = vmul.f32 0.03125, %v417_v46  ;;  %v423_v48 = vmul.f32 %v421_v45, %v421_v45 }
 0x236   : > { %v422_v49 = vsub.f32 %v409_v41, %v420_v47  ;;  %v425_v50 = vsel %vm296_vm1, %v423_v48, 0.0 }
 0x237   : > { %426 = vadd.xlane.f32.xlu1 %v425_v50 }
 0x238   : > { %v424_v51 = vmul.f32 %v422_v49, %v422_v49 }
 0x23a   : > { %v428_v52 = vsel %vm296_vm1, %v424_v51, 0.0 }
 0x23b   : > { %429 = vadd.xlane.f32.xlu1 %v428_v52 }
 0x2c0   : > { %v427_v53 = vpop.xlane.xlu1 %426 }
 0x2c1   : > { %v431_v54 = vmul.f32 0.03125, %v427_v53 }
 0x2c3   : > { %v433_v55 = vadd.f32 1e-05, %v431_v54 }
 0x2c4   : > { %v430_v56 = vpop.xlane.xlu1 %429 }
 0x2c5   : > { %569 = vrsqrt.f32 %v433_v55  ;;  %v432_v57 = vmul.f32 0.03125, %v430_v56 }
 0x2c7   : > { %v434_v58 = vadd.f32 1e-05, %v432_v57 }
 0x2c9   : > { %571 = vrsqrt.f32 %v434_v58 }
 0x2d2   : > { %v570_v59 = vpop.eup %569 }
 0x2d3   : > { %v437_v61 = vmul.f32 %v570_v59, %v421_v45 }
 0x2d5   : > { %v445_v63 = vmul.f32 %v525_v60, %v437_v61 }
 0x2d6   : > { %v572_v0 = vpop.eup %571 }
 0x2d7   : > { %v453_v1 = vadd.f32 %v526_v62, %v445_v63  ;;  %v438_v2 = vmul.f32 %v572_v0, %v422_v49 }
 0x2d9   : > { %455 = vst.msk [vmem:[%s278_s21] sm:$0xff] %vm296_vm1, %v453_v1  ;;  %v446_v3 = vmul.f32 %v525_v60, %v438_v2 }
 0x2db   : > { %v454_v4 = vadd.f32 %v526_v62, %v446_v3 }
 0x2dd   : > { %456 = vst.msk [vmem:[%s278_s21 + $0x8] sm:$0xff] %vm296_vm1, %v454_v4 }
 0x2de PF: > { %s17_s24 = sadd.s32 1, %s579_s24  }
 0x2df   : > { %p14_p4 = scmp.ge.s32.totalorder %s17_s24, 4  }
 0x2e1   :  { %16 = sbr.rel (!%p14_p4) target bundleno = 1 (0x1), region = 78 }

// kernel: seq2seq_forward.10
= control target key start
LH: loop header
LB: loop body
LE: loop exit
PB: predicated region body
PF: predicated region fallthrough
CT: control target
= control target key end

     0   :  { %s1720_s13 = smov 0   ;;  %s1906_s0 = inlined_call_operand.vmem [shape: f32[2,8,32], index: 0, kind: input, shape index: {}, may-alias: {0,1}]   ;;  %s1907_s1 = inlined_call_operand.vmem [shape: f32[2,8,32], index: 1, kind: input, shape index: {}, may-alias: {0,1}]   ;;  %s1908_s2 = inlined_call_operand.vmem [shape: f32[32,32], index: 2, kind: input, shape index: {}]   ;;  %s1909_s3 = inlined_call_operand.vmem [shape: f32[1,32], index: 3, kind: input, shape index: {}]   ;;  %s1910_s4 = inlined_call_operand.vmem [shape: f32[32,64], index: 4, kind: input, shape index: {}]   ;;  %s1911_s5 = inlined_call_operand.vmem [shape: f32[1,64], index: 5, kind: input, shape index: {}]   ;;  %s1912_s6 = inlined_call_operand.vmem [shape: f32[32,32], index: 6, kind: input, shape index: {}]   ;;  %s1913_s7 = inlined_call_operand.vmem [shape: f32[1,32], index: 7, kind: input, shape index: {}]   ;;  %s1914_s8 = inlined_call_operand.vmem [shape: f32[1,32], index: 8, kind: input, shape index: {}]   ;;  %s1915_s9 = inlined_call_operand.vmem [shape: f32[1,32], index: 9, kind: input, shape index: {}]   ;;  %s1916_s10 = inlined_call_operand.vmem [shape: f32[2,8,32], index: 10, kind: output, shape index: {}]  }
   0x1 LB: > { %s1468_s14 = sadd.s32 4294967295, %s1653_s13   ;;  %p1472_p0 = scmp.ge.s32.totalorder %s1653_s13, 1  ;;  %s1653_s13 = sphi %s1720_s13, %s20_s13  }
   0x2   : > { %p320_p1 = scmp.lt.s32.totalorder %s1653_s13, 3 }
   0x4   : > { %p321_p2 = pnand %p1472_p0, %p320_p1 }
   0x5   : > { %p360_p3 = scmp.lt.s32.totalorder (!%p321_p2), %s1468_s14, 1  ;;  %s1657_s23 = smov (!%p321_p2), 120  }
   0x6   : > { %324 = sbr.rel (%p321_p2) target bundleno = 2772 (0xad4), region = 60  ;;  %s1659_s24 = smov (!%p321_p2), 96  }
   0x7   : > { %s1660_s25 = smov (!%p321_p2), 88   ;;  %s1661_s26 = smov (!%p321_p2), 112  }
   0x8   : > { %s1662_s12 = smov (!%p321_p2), 80   ;;  %s1663_s15 = smov (!%p321_p2), 104  }
   0x9   : > { %s1664_s18 = smov (!%p321_p2), 72  }
   0xb   : > { %v436_v0 = vld [vmem:[%s1910_s4 + $0x10] sm:$0xff]  ;;  %v437_v1 = vld [vmem:[%s1910_s4 + $0x18] sm:$0xff]  ;;  %v1655_v3 = vmov 0.0   ;;  %v434_v6 = vld [vmem:[%s1910_s4] sm:$0xff]  ;;  %vm1656_vm0 = vmmov 0   ;;  %s1918_s14 = smov (!%p360_p3, %s1468_s14), 1  ;;  %v490_v31 = vlaneseq }
   0xc   : > { %v378_v2 = vld [vmem:[%s1908_s2 + $0x10] sm:$0xff]  ;;  %1539 = vmatprep.subr.bf16.mxu1 %v1655_v3  ;;  %v439_v4 = vpack.c.bf16 %v437_v1, %v436_v0  ;;  %1531 = vmatprep.subr.bf16.mxu0 %v1655_v3  ;;  %v379_v5 = vld [vmem:[%s1908_s2 + $0x18] sm:$0xff]  ;;  %v435_v7 = vld [vmem:[%s1910_s4 + $0x8] sm:$0xff]  ;;  %s1759_s11 = sshll.u32 %s1918_s14, 3  ;;  %vm389_vm1 = vcmask 261120   ;;  %vm501_vm2 = vcmask 64512  }
   0xd   : > { %v381_v8 = vpack.c.bf16 %v379_v5, %v378_v2  ;;  %v376_v9 = vld [vmem:[%s1908_s2] sm:$0xff]  ;;  %v377_v10 = vld [vmem:[%s1908_s2 + $0x8] sm:$0xff]  ;;  %1543 = vmatprep.mubr.msk.bf16.mxu1 %vm1656_vm0, %v1655_v3  ;;  %1535 = vmatprep.mubr.msk.bf16.mxu0 %vm1656_vm0, %v1655_v3  ;;  %v438_v11 = vpack.c.bf16 %v435_v7, %v434_v6  ;;  %s367_s16 = scalar_lea.vmem %s1907_s1, %s1759_s11  ;;  %s363_s19 = scalar_lea.vmem %s1906_s0, %s1759_s11  ;;  %v491_v32 = vshrl.u32 %v490_v31, 7  ;;  %v493_v33 = vand.u32 127, %v490_v31 }
   0xe   : > { %1540 = vmatpush3.bf16.msra.mxu1 %v439_v4  ;;  %v380_v12 = vpack.c.bf16 %v377_v10, %v376_v9  ;;  %v374_v13 = vld [vmem:[%s367_s16] sm:$0xff]  ;;  %v1658_v35 = vmov -10000.0   ;;  %v498_v60 = vld [vmem:[%s1912_s6 + $0x8] sm:$0xff]  ;;  %vm841_vm4 = vcmask 1043456   ;;  %s371_s28 = scalar_lea.vmem %s1916_s10, %s1759_s11 }
   0xf   : > { %1532 = vmatpush3.bf16.msra.mxu0 %v381_v8  ;;  %1541 = vmatprep.subr.bf16.mxu1 %v1655_v3  ;;  %v433_v14 = vpack.c.bf16 %v374_v13, %v374_v13  ;;  %v1770_v15 = vld [vmem:[%s363_s19] sm:$0xff]  ;;  %vm494_vm3 = vcmp.le.s32.totalorder %v493_v33, %v491_v32  ;;  %v837_v61 = vpack.c.bf16 %v498_v60, %v498_v60 }
  0x10   : > { %1533 = vmatprep.subr.bf16.mxu0 %v1655_v3  ;;  %v375_v16 = vpack.c.bf16 %v1770_v15, %v1770_v15  ;;  %v1478_v17 = vld [vmem:[%s1911_s5] ss:$0 sm:$0xff]  ;;  %v1806_v36 = vsel %vm494_vm3, 0.0, %v1658_v35 }
  0x11   : > { %v1476_v18 = vld [vmem:[%s1909_s3] ss:$0 sm:$0xff]  ;;  %v843_v62 = vsel %vm841_vm4, %v837_v61, 0 }
  0x12   : > { %1542 = vmatpush3.bf16.msra.mxu1 %v438_v11  ;;  %v497_v1 = vld [vmem:[%s1912_s6] sm:$0xff] }
  0x13   : > { %1534 = vmatpush3.bf16.msra.mxu0 %v380_v12  ;;  %1547 = vmatprep.subr.mxu1 %v1655_v3  ;;  %v668_v2 = vpack.c.bf16 %v497_v1, %v497_v1 }
  0x14   : > { %1557 = vmatprep.subr.mxu0 %v1655_v3 }
  0x15   : > { %1544 = vmatmul.mubr.msk.bf16.vlgmr.msra.gmra.mxu1 %vm389_vm1, %v433_v14  ;;  %v889_v6 = vsel %vm841_vm4, %v668_v2, 0 }
  0x16   : > { %1536 = vmatmul.mubr.msk.bf16.vlgmr.msra.gmra.mxu0 %vm389_vm1, %v375_v16  ;;  %1549 = vmatprep.mubr.msk.f32.mxu1 %vm1656_vm0, %v1655_v3 }
  0x17   : > { %1559 = vmatprep.mubr.msk.f32.mxu0 %vm1656_vm0, %v1655_v3 }
  0xd5   : > { %v484_v19 = vpop.f32.mrf.mxu1 }
  0xd6   : > { %v1788_v20 = vadd.f32 %v1478_v17, %v484_v19  ;;  %v427_v21 = vpop.f32.mrf.mxu0 }
  0xd7   : > { %v1790_v22 = vadd.f32 %v1476_v18, %v427_v21  ;;  %v1545_v23 = vpop.f32.mrf.mxu1 }
  0xd8   : > { %671 = vrot.lane.b32.xlu0 %v1788_v20, %s1657_s23  ;;  %1548 = vmatpush3.xpose.msk.msra.mxu1 %vm501_vm2, %v1788_v20  ;;  %v1537_v24 = vpop.f32.mrf.mxu0 }
  0xd9   : > { %v487_v25 = vpop.f32.mrf.mxu1  ;;  %1552 = vmatprep.subr.mxu1 %v1655_v3 }
  0xda   : > { %v430_v26 = vpop.f32.mrf.mxu0 }
  0xdb   : > { %v1546_v27 = vpop.f32.mrf.mxu1  ;;  %1550 = vmatmul.mubr.msk.f32.vlgmr.msra.gmra.mxu1 %vm501_vm2, %v1790_v22 }
  0xdc   : > { %669 = vrot.lane.b32.xlu0 %v1790_v22, %s1657_s23  ;;  %v1538_v28 = vpop.f32.mrf.mxu0  ;;  %1554 = vmatprep.mubr.msk.f32.mxu1 %vm1656_vm0, %v1655_v3 }
 0x14a   : > { %v672_v29 = vpop.permute.xlu0 %671 }
 0x14b   : > { %1558 = vmatpush3.xpose.msk.msra.mxu0 %vm501_vm2, %v672_v29 }
 0x14c   : > { %1567 = vmatprep.subr.bf16.mxu0 %v1655_v3 }
 0x14e   : > { %v670_v30 = vpop.permute.xlu0 %669 }
 0x14f   : > { %1560 = vmatmul.mubr.msk.f32.vlgmr.msra.gmra.mxu0 %vm501_vm2, %v670_v30 }
 0x150   : > { %1569 = vmatprep.mubr.msk.bf16.mxu0 %vm1656_vm0, %v1655_v3  ;;  %1568 = vmatpush3.bf16.msra.mxu0 %v843_v62 }
 0x151   : > { %1579 = vmatprep.subr.mxu0 %v1655_v3 }
 0x19b   : > { %v574_v34 = vpop.f32.mrf.mxu1 }
 0x19c   : > { %v578_v37 = vmul.f32 0.35355338, %v574_v34 }
 0x19d   : > { %v1551_v38 = vpop.f32.mrf.mxu1 }
 0x19e   : > { %v579_v39 = vadd.f32 %v578_v37, %v1806_v36 }
 0x1a0   : > { %v580_v40 = vsel %vm501_vm2, %v579_v39, -inf }
 0x1a1   : > { %581 = vmax.xlane.f32.xlu1 %v580_v40 }
 0x20f   : > { %v743_v41 = vpop.f32.mrf.mxu0 }
 0x210   : > { %v747_v42 = vmul.f32 0.35355338, %v743_v41 }
 0x211   : > { %v1561_v43 = vpop.f32.mrf.mxu0 }
 0x212   : > { %v748_v44 = vadd.f32 %v747_v42, %v1806_v36  ;;  %v499_v42 = vld [vmem:[%s1912_s6 + $0x10] sm:$0xff] }
 0x213   : > { %v1099_v43 = vpack.c.bf16 %v499_v42, %v499_v42 }
 0x214   : > { %v749_v45 = vsel %vm501_vm2, %v748_v44, -inf }
 0x215   : > { %750 = vmax.xlane.f32.xlu1 %v749_v45 }
 0x226   : > { %591 = vrot.lane.b32.xlu1 %v1788_v20, %s1659_s24 }
 0x22a   : > { %v582_v46 = vpop.xlane.xlu1 %581 }
 0x22b   : > { %v583_v47 = vsub.f32 %v579_v39, %v582_v46 }
 0x22d   : > { %v584_v48 = vmul.f32 1.442695, %v583_v47 }
 0x22f   : > { %1629 = vpow2.f32 %v584_v48 }
 0x23c   : > { %v1630_v49 = vpop.eup %1629 }
 0x23d   : > { %v586_v50 = vsel %vm501_vm2, %v1630_v49, 0.0 }
 0x23e   : > { %587 = vadd.xlane.f32.xlu0 %v586_v50 }
 0x29e   : > { %v751_v51 = vpop.xlane.xlu1 %750 }
 0x29f   : > { %v752_v52 = vsub.f32 %v748_v44, %v751_v51  ;;  %v1104_v44 = vsel %vm841_vm4, %v1099_v43, 0 }
 0x2a1   : > { %v753_v53 = vmul.f32 1.442695, %v752_v52 }
 0x2a2   : > { %v592_v54 = vpop.permute.xlu1 %591 }
 0x2a3   : > { %1631 = vpow2.f32 %v753_v53  ;;  %1553 = vmatpush3.msra.mxu1 %v592_v54 }
 0x2a4   : > { %1562 = vmatprep.subr.mxu1 %v1655_v3 }
 0x2b0   : > { %v1632_v55 = vpop.eup %1631 }
 0x2b1   : > { %v755_v56 = vsel %vm501_vm2, %v1632_v55, 0.0 }
 0x2b2   : > { %756 = vadd.xlane.f32.xlu1 %v755_v56 }
 0x2c3   : > { %760 = vrot.lane.b32.xlu1 %v1788_v20, %s1660_s25 }
 0x2c7   : > { %v588_v57 = vpop.xlane.xlu0 %587  ;;  %933 = vrot.lane.b32.xlu1 %v1788_v20, %s1661_s26 }
 0x2c8   : > { %1633 = vrcp.f32 %v588_v57 }
 0x2cb   : > { %931 = vrot.lane.b32.xlu1 %v1790_v22, %s1661_s26 }
 0x2d5   : > { %v1634_v58 = vpop.eup %1633 }
 0x2d6   : > { %v590_v59 = vmul.f32 %v1634_v58, %v1630_v49 }
 0x2d8   : > { %1555 = vmatmul.mubr.msk.f32.vlgmr.msra.gmra.mxu1 %vm501_vm2, %v590_v59 }
 0x2d9   : > { %1564 = vmatprep.mubr.msk.f32.mxu1 %vm1656_vm0, %v1655_v3 }
 0x33b   : > { %v757_v63 = vpop.xlane.xlu1 %756 }
 0x33c   : > { %1635 = vrcp.f32 %v757_v63 }
 0x33f   : > { %v761_v0 = vpop.permute.xlu1 %760 }
 0x340   : > { %1563 = vmatpush3.msra.mxu1 %v761_v0 }
 0x341   : > { %1573 = vmatprep.subr.bf16.mxu1 %v1655_v3 }
 0x343   : > { %v934_v13 = vpop.permute.xlu1 %933 }
 0x347   : > { %v932_v14 = vpop.permute.xlu1 %931 }
 0x349   : > { %v1636_v4 = vpop.eup %1635 }
 0x34a   : > { %v759_v5 = vmul.f32 %v1636_v4, %v1632_v55 }
 0x34c   : > { %1565 = vmatmul.mubr.msk.f32.vlgmr.msra.gmra.mxu1 %vm501_vm2, %v759_v5 }
 0x34d   : > { %1574 = vmatpush3.bf16.msra.mxu1 %v889_v6  ;;  %1575 = vmatprep.mubr.msk.bf16.mxu1 %vm1656_vm0, %v1655_v3 }
 0x34e   : > { %1584 = vmatprep.subr.mxu1 %v1655_v3 }
 0x398   : > { %v663_v7 = vpop.f32.mrf.mxu1 }
 0x399   : > { %v667_v8 = vpack.c.bf16 %v663_v7, %v663_v7 }
 0x39a   : > { %v1556_v9 = vpop.f32.mrf.mxu1 }
 0x39b   : > { %1576 = vmatmul.mubr.msk.bf16.vlgmr.msra.gmra.mxu1 %vm501_vm2, %v667_v8  ;;  %v1496_v9 = vld [vmem:[%s1913_s7] ss:$0 sm:$0xff] }
 0x39c   : > { %1586 = vmatprep.mubr.msk.f32.mxu1 %vm1656_vm0, %v1655_v3 }
 0x40c   : > { %v832_v10 = vpop.f32.mrf.mxu1 }
 0x40d   : > { %v836_v11 = vpack.c.bf16 %v832_v10, %v832_v10 }
 0x40e   : > { %v1566_v12 = vpop.f32.mrf.mxu1 }
 0x40f   : > { %1570 = vmatmul.mubr.msk.bf16.vlgmr.msra.gmra.mxu0 %vm501_vm2, %v836_v11 }
 0x410   : > { %1580 = vmatpush3.xpose.msk.msra.mxu0 %vm501_vm2, %v934_v13  ;;  %1581 = vmatprep.mubr.msk.f32.mxu0 %vm1656_vm0, %v1655_v3 }
 0x411   : > { %1589 = vmatprep.subr.bf16.mxu0 %v1655_v3 }
 0x417   : > { %1582 = vmatmul.mubr.msk.f32.vlgmr.msra.gmra.mxu0 %vm501_vm2, %v932_v14 }
 0x418   : > { %1591 = vmatprep.mubr.msk.bf16.mxu0 %vm1656_vm0, %v1655_v3  ;;  %1590 = vmatpush3.bf16.msra.mxu0 %v1104_v44 }
 0x419   : > { %1605 = vmatprep.subr.bf16.mxu0 %v1655_v3 }
 0x45b   : > { %v1847_v16 = vpop.f32.mrf.mxu1 }
 0x45d   : > { %v1577_v17 = vpop.f32.mrf.mxu1 }
 0x45f   : > { %v928_v18 = vpop.f32.mrf.mxu1 }
 0x461   : > { %v1578_v19 = vpop.f32.mrf.mxu1 }
 0x4cf   : > { %v1849_v21 = vpop.f32.mrf.mxu0 }
 0x4d1   : > { %v1571_v23 = vpop.f32.mrf.mxu0 }
 0x4d3   : > { %v882_v24 = vpop.f32.mrf.mxu0 }
 0x4d5   : > { %v1572_v25 = vpop.f32.mrf.mxu0 }
 0x4d7   : > { %v1005_v26 = vpop.f32.mrf.mxu0 }
 0x4d8   : > { %v1009_v27 = vmul.f32 0.35355338, %v1005_v26 }
 0x4d9   : > { %v1583_v28 = vpop.f32.mrf.mxu0 }
 0x4da   : > { %v1010_v29 = vadd.f32 %v1009_v27, %v1806_v36 }
 0x4dc   : > { %v1011_v30 = vsel %vm501_vm2, %v1010_v29, -inf }
 0x4dd   : > { %1012 = vmax.xlane.f32.xlu0 %v1011_v30  ;;  %v1498_v30 = vld [vmem:[%s1915_s9] ss:$0 sm:$0xff] }
 0x4f3   : > { %1022 = vrot.lane.b32.xlu0 %v1788_v20, %s1662_s12 }
 0x4f7   : > { %1149 = vrot.lane.b32.xlu0 %v1788_v20, %s1663_s15 }
 0x4fb   : > { %1147 = vrot.lane.b32.xlu0 %v1790_v22, %s1663_s15 }
 0x566   : > { %v1013_v31 = vpop.xlane.xlu0 %1012 }
 0x567   : > { %v1014_v32 = vsub.f32 %v1010_v29, %v1013_v31 }
 0x569   : > { %v1015_v33 = vmul.f32 1.442695, %v1014_v32 }
 0x56a   : > { %v1023_v34 = vpop.permute.xlu0 %1022 }
 0x56b   : > { %1637 = vpow2.f32 %v1015_v33  ;;  %1585 = vmatpush3.msra.mxu1 %v1023_v34 }
 0x56c   : > { %1595 = vmatprep.subr.mxu1 %v1655_v3 }
 0x56e   : > { %v1150_v40 = vpop.permute.xlu0 %1149 }
 0x572   : > { %v1148_v22 = vpop.permute.xlu0 %1147 }
 0x578   : > { %v1638_v35 = vpop.eup %1637 }
 0x579   : > { %v1017_v37 = vsel %vm501_vm2, %v1638_v35, 0.0 }
 0x57a   : > { %1018 = vadd.xlane.f32.xlu1 %v1017_v37 }
 0x603   : > { %v1019_v38 = vpop.xlane.xlu1 %1018 }
 0x604   : > { %1639 = vrcp.f32 %v1019_v38 }
 0x611   : > { %v1640_v39 = vpop.eup %1639 }
 0x612   : > { %v1021_v41 = vmul.f32 %v1640_v39, %v1638_v35 }
 0x614   : > { %1587 = vmatmul.mubr.msk.f32.vlgmr.msra.gmra.mxu1 %vm501_vm2, %v1021_v41 }
 0x615   : > { %1596 = vmatpush3.xpose.msk.msra.mxu1 %vm501_vm2, %v1150_v40  ;;  %1597 = vmatprep.mubr.msk.f32.mxu1 %vm1656_vm0, %v1655_v3 }
 0x616   : > { %1600 = vmatprep.subr.mxu1 %v1655_v3 }
 0x618   : > { %1598 = vmatmul.mubr.msk.f32.vlgmr.msra.gmra.mxu1 %vm501_vm2, %v1148_v22 }
 0x619   : > { %1602 = vmatprep.mubr.msk.f32.mxu1 %vm1656_vm0, %v1655_v3 }
 0x6d4   : > { %v1094_v45 = vpop.f32.mrf.mxu1 }
 0x6d5   : > { %v1098_v46 = vpack.c.bf16 %v1094_v45, %v1094_v45 }
 0x6d6   : > { %v1588_v47 = vpop.f32.mrf.mxu1 }
 0x6d7   : > { %1592 = vmatmul.mubr.msk.bf16.vlgmr.msra.gmra.mxu0 %vm501_vm2, %v1098_v46 }
 0x6d8   : > { %v1221_v48 = vpop.f32.mrf.mxu1  ;;  %1607 = vmatprep.mubr.msk.bf16.mxu0 %vm1656_vm0, %v1655_v3  ;;  %v500_v3 = vld [vmem:[%s1912_s6 + $0x18] sm:$0xff] }
 0x6d9   : > { %v1225_v49 = vmul.f32 0.35355338, %v1221_v48  ;;  %v1315_v58 = vpack.c.bf16 %v500_v3, %v500_v3 }
 0x6da   : > { %v1599_v50 = vpop.f32.mrf.mxu1 }
 0x6db   : > { %v1226_v51 = vadd.f32 %v1225_v49, %v1806_v36  ;;  %v926_v36 = vadd.f32 %v1847_v16, %v1849_v21  ;;  %v1320_v61 = vsel %vm841_vm4, %v1315_v58, 0 }
 0x6dc   : > { %1606 = vmatpush3.bf16.msra.mxu0 %v1320_v61 }
 0x6dd   : > { %v1227_v52 = vsel %vm501_vm2, %v1226_v51, -inf }
 0x6de   : > { %1228 = vmax.xlane.f32.xlu0 %v1227_v52 }
 0x767   : > { %v1229_v53 = vpop.xlane.xlu0 %1228 }
 0x768   : > { %v1230_v54 = vsub.f32 %v1226_v51, %v1229_v53 }
 0x76a   : > { %v1231_v55 = vmul.f32 1.442695, %v1230_v54 }
 0x76c   : > { %1641 = vpow2.f32 %v1231_v55 }
 0x779   : > { %v1642_v56 = vpop.eup %1641 }
 0x77a   : > { %v1233_v57 = vsel %vm501_vm2, %v1642_v56, 0.0 }
 0x77b   : > { %1234 = vadd.xlane.f32.xlu1 %v1233_v57 }
 0x78c   : > { %1238 = vrot.lane.b32.xlu1 %v1788_v20, %s1664_s18 }
 0x797   : > { %v1140_v59 = vpop.f32.mrf.mxu0 }
 0x798   : > { %v1146_v60 = vadd.f32 %v1140_v59, %v926_v36 }
 0x799   : > { %v1593_v62 = vpop.f32.mrf.mxu0 }
 0x79b   : > { %v1143_v63 = vpop.f32.mrf.mxu0 }
 0x79d   : > { %v1594_v0 = vpop.f32.mrf.mxu0 }
 0x804   : > { %v1235_v1 = vpop.xlane.xlu1 %1234 }
 0x805   : > { %1643 = vrcp.f32 %v1235_v1 }
 0x808   : > { %v1239_v2 = vpop.permute.xlu1 %1238 }
 0x809   : > { %1601 = vmatpush3.msra.mxu1 %v1239_v2 }
 0x812   : > { %v1644_v20 = vpop.eup %1643 }
 0x813   : > { %v1237_v4 = vmul.f32 %v1644_v20, %v1642_v56 }
 0x815   : > { %1603 = vmatmul.mubr.msk.f32.vlgmr.msra.gmra.mxu1 %vm501_vm2, %v1237_v4 }
 0x8d5   : > { %v1310_v5 = vpop.f32.mrf.mxu1 }
 0x8d6   : > { %v1314_v6 = vpack.c.bf16 %v1310_v5, %v1310_v5 }
 0x8d7   : > { %v1604_v7 = vpop.f32.mrf.mxu1 }
 0x8d8   : > { %1608 = vmatmul.mubr.msk.bf16.vlgmr.msra.gmra.mxu0 %vm501_vm2, %v1314_v6 }
 0x998   : > { %v1356_v8 = vpop.f32.mrf.mxu0 }
 0x999   : > { %v1362_v10 = vadd.f32 %v1356_v8, %v1146_v60 }
 0x99a   : > { %v1609_v11 = vpop.f32.mrf.mxu0 }
 0x99b   : > { %v1370_v12 = vadd.f32 %v1496_v9, %v1362_v10 }
 0x99c   : > { %v1359_v13 = vpop.f32.mrf.mxu0 }
 0x99d   : > { %v1371_v14 = vadd.f32 %v1370_v12, %v1770_v15  ;;  %v1497_v15 = vld [vmem:[%s1914_s8] ss:$0 sm:$0xff] }
 0x99e   : > { %v1610_v16 = vpop.f32.mrf.mxu0 }
 0x99f   : > { %v1374_v17 = vsel %vm389_vm1, %v1371_v14, 0.0 }
 0x9a0   : > { %1375 = vadd.xlane.f32.xlu1 %v1374_v17 }
 0xa29   : > { %v1376_v18 = vpop.xlane.xlu1 %1375 }
 0xa2a   : > { %v1378_v19 = vmul.f32 0.03125, %v1376_v18 }
 0xa2c   : > { %v1379_v21 = vsub.f32 %v1371_v14, %v1378_v19 }
 0xa2e   : > { %v1380_v23 = vmul.f32 %v1379_v21, %v1379_v21 }
 0xa30   : > { %v1381_v24 = vsel %vm389_vm1, %v1380_v23, 0.0 }
 0xa31   : > { %1382 = vadd.xlane.f32.xlu0 %v1381_v24 }
 0xaba   : > { %v1383_v25 = vpop.xlane.xlu0 %1382 }
 0xabb   : > { %v1384_v26 = vmul.f32 0.03125, %v1383_v25 }
 0xabd   : > { %v1385_v27 = vadd.f32 1e-05, %v1384_v26 }
 0xabf   : > { %1645 = vrsqrt.f32 %v1385_v27 }
 0xacc   : > { %v1646_v28 = vpop.eup %1645 }
 0xacd   : > { %v1387_v29 = vmul.f32 %v1646_v28, %v1379_v21 }
 0xacf   : > { %v1394_v31 = vmul.f32 %v1497_v15, %v1387_v29 }
 0xad1   : > { %v1401_v32 = vadd.f32 %v1498_v30, %v1394_v31 }
 0xad3   : > { %1402 = vst.msk [vmem:[%s371_s28] sm:$0xff] %vm389_vm1, %v1401_v32 }
 0xad4 PF: > { %s20_s13 = sadd.s32 1, %s1653_s13  }
 0xad5   : > { %p17_p4 = scmp.ge.s32.totalorder %s20_s13, 4  }
 0xad7   :  { %19 = sbr.rel (!%p17_p4) target bundleno = 1 (0x1), region = 93 }

// kernel: seq2seq_forward.8
= control target key start
LH: loop header
LB: loop body
LE: loop exit
PB: predicated region body
PF: predicated region fallthrough
CT: control target
= control target key end

     0   :  { %s2122_s21 = smov 0   ;;  %s2365_s0 = inlined_call_operand.vmem [shape: f32[2,16,32], index: 0, kind: input, shape index: {}, may-alias: {0,1}]   ;;  %s2366_s1 = inlined_call_operand.vmem [shape: f32[2,16,32], index: 1, kind: input, shape index: {}, may-alias: {0,1}]   ;;  %s2367_s2 = inlined_call_operand.vmem [shape: f32[32,32], index: 2, kind: input, shape index: {}]   ;;  %s2368_s3 = inlined_call_operand.vmem [shape: f32[1,32], index: 3, kind: input, shape index: {}]   ;;  %s2369_s4 = inlined_call_operand.vmem [shape: f32[32,64], index: 4, kind: input, shape index: {}]   ;;  %s2370_s5 = inlined_call_operand.vmem [shape: f32[1,64], index: 5, kind: input, shape index: {}]   ;;  %s2371_s6 = inlined_call_operand.vmem [shape: f32[32,32], index: 6, kind: input, shape index: {}]   ;;  %s2372_s7 = inlined_call_operand.vmem [shape: f32[1,32], index: 7, kind: input, shape index: {}]   ;;  %s2373_s8 = inlined_call_operand.vmem [shape: f32[1,32], index: 8, kind: input, shape index: {}]   ;;  %s2374_s9 = inlined_call_operand.vmem [shape: f32[1,32], index: 9, kind: input, shape index: {}]   ;;  %s2375_s10 = inlined_call_operand.vmem [shape: f32[2,4,16,16], index: 10, kind: input, shape index: {}]   ;;  %s2376_s11 = inlined_call_operand.vmem [shape: f32[2,16,16], index: 11, kind: input, shape index: {}]   ;;  %s2377_s12 = inlined_call_operand.vmem [shape: f32[2,16,32], index: 12, kind: output, shape index: {}]  }
   0x1 LB: > { %s1788_s22 = sadd.s32 4294967295, %s2046_s21   ;;  %p1792_p0 = scmp.ge.s32.totalorder %s2046_s21, 1  ;;  %s2046_s21 = sphi %s2122_s21, %s22_s21  }
   0x2   : > { %p392_p1 = scmp.lt.s32.totalorder %s2046_s21, 3 }
   0x4   : > { %p393_p2 = pnand %p1792_p0, %p392_p1 }
   0x5   : > { %p449_p3 = scmp.lt.s32.totalorder (!%p393_p2), %s1788_s22, 1  ;;  %s2050_s16 = smov (!%p393_p2), 120  }
   0x6   : > { %396 = sbr.rel (%p393_p2) target bundleno = 2814 (0xafe), region = 68  ;;  %s2052_s27 = smov (!%p393_p2), 88  }
   0x7   : > { %s2053_s28 = smov (!%p393_p2), 112   ;;  %s2054_s15 = smov (!%p393_p2), 80  }
   0xb   : > { %v541_v0 = vld [vmem:[%s2369_s4 + $0x10] sm:$0xff]  ;;  %v542_v1 = vld [vmem:[%s2369_s4 + $0x18] sm:$0xff]  ;;  %v2048_v3 = vmov 0.0   ;;  %v539_v6 = vld [vmem:[%s2369_s4] sm:$0xff]  ;;  %vm2049_vm0 = vmmov 0   ;;  %s2379_s22 = smov (!%p449_p3, %s1788_s22), 1 }
   0xc   : > { %v482_v2 = vld [vmem:[%s2367_s2 + $0x10] sm:$0xff]  ;;  %1899 = vmatprep.subr.bf16.mxu1 %v2048_v3  ;;  %v544_v4 = vpack.c.bf16 %v542_v1, %v541_v0  ;;  %1891 = vmatprep.subr.bf16.mxu0 %v2048_v3  ;;  %v483_v5 = vld [vmem:[%s2367_s2 + $0x18] sm:$0xff]  ;;  %v540_v7 = vld [vmem:[%s2369_s4 + $0x8] sm:$0xff]  ;;  %s2164_s23 = sshll.u32 %s2379_s22, 4  ;;  %vm493_vm1 = vcmask 261120   ;;  %vm616_vm2 = vcmask 64512  }
   0xd   : > { %v485_v8 = vpack.c.bf16 %v483_v5, %v482_v2  ;;  %1903 = vmatprep.mubr.msk.bf16.mxu1 %vm2049_vm0, %v2048_v3  ;;  %v480_v9 = vld [vmem:[%s2367_s2] sm:$0xff]  ;;  %v481_v10 = vld [vmem:[%s2367_s2 + $0x8] sm:$0xff]  ;;  %1895 = vmatprep.mubr.msk.bf16.mxu0 %vm2049_vm0, %v2048_v3  ;;  %v543_v11 = vpack.c.bf16 %v540_v7, %v539_v6  ;;  %s458_s26 = scalar_lea.vmem %s2366_s1, %s2164_s23  ;;  %s453_s29 = scalar_lea.vmem %s2365_s0, %s2164_s23  ;;  %vm710_vm3 = vcmask 130048   ;;  %vm1033_vm4 = vcmask 1043456  }
   0xe   : > { %1900 = vmatpush3.bf16.msra.mxu1 %v544_v4  ;;  %v484_v12 = vpack.c.bf16 %v481_v10, %v480_v9  ;;  %v477_v13 = vld [vmem:[%s458_s26] sm:$0xff]  ;;  %v478_v14 = vld [vmem:[%s458_s26 + $0x8] sm:$0xff]  ;;  %s468_s19 = scalar_lea.vmem %s2376_s11, %s2164_s23  ;;  %s1842_s20 = sshll.u32 %s2379_s22, 6 }
   0xf   : > { %1892 = vmatpush3.bf16.msra.mxu0 %v485_v8  ;;  %1901 = vmatprep.subr.bf16.mxu1 %v2048_v3  ;;  %v538_v15 = vpack.c.bf16 %v478_v14, %v477_v13  ;;  %v2175_v16 = vld [vmem:[%s453_s29] sm:$0xff]  ;;  %v2177_v17 = vld [vmem:[%s453_s29 + $0x8] sm:$0xff]  ;;  %s2230_s26 = scalar_lea.vmem %s2375_s10, %s1842_s20  ;;  %s2051_s22 = smov 96  }
  0x10   : > { %1893 = vmatprep.subr.bf16.mxu0 %v2048_v3  ;;  %v479_v18 = vpack.c.bf16 %v2177_v17, %v2175_v16  ;;  %v1803_v19 = vld [vmem:[%s2368_s3] ss:$0 sm:$0xff]  ;;  %v597_v37 = vld [vmem:[%s468_s19 + $0x8] sm:$0xff]  ;;  %v606_v59 = vld [vmem:[%s2230_s26 + $0x10] sm:$0xff]  ;;  %s473_s14 = scalar_lea.vmem %s2377_s12, %s2164_s23 }
  0x11   : > { %v1805_v25 = vld [vmem:[%s2370_s5] ss:$0 sm:$0xff]  ;;  %v599_v39 = vsub.f32 1.0, %v597_v37  ;;  %v605_v46 = vld [vmem:[%s2230_s26 + $0x8] sm:$0xff]  ;;  %v607_v62 = vld [vmem:[%s2230_s26 + $0x18] sm:$0xff] }
  0x12   : > { %1902 = vmatpush3.bf16.msra.mxu1 %v543_v11  ;;  %v596_v38 = vld [vmem:[%s468_s19] sm:$0xff]  ;;  %s2056_s19 = smov 72  }
  0x13   : > { %1894 = vmatpush3.bf16.msra.mxu0 %v484_v12  ;;  %v598_v40 = vsub.f32 1.0, %v596_v38  ;;  %v2232_v41 = vmul.f32 -10000.0, %v599_v39  ;;  %v604_v49 = vld [vmem:[%s2230_s26] sm:$0xff] }
  0x15   : > { %1904 = vmatmul.mubr.msk.bf16.vlgmr.msra.gmra.mxu1 %vm493_vm1, %v538_v15  ;;  %v2234_v44 = vmul.f32 -10000.0, %v598_v40 }
  0x16   : > { %1896 = vmatmul.mubr.msk.bf16.vlgmr.msra.gmra.mxu0 %vm493_vm1, %v479_v18 }
  0xd5   : > { %v589_v20 = vpop.f32.mrf.mxu1 }
  0xd6   : > { %v531_v21 = vpop.f32.mrf.mxu0  ;;  %v2198_v31 = vadd.f32 %v1805_v25, %v589_v20 }
  0xd7   : > { %v1905_v22 = vpop.f32.mrf.mxu1  ;;  %v2186_v23 = vadd.f32 %v1803_v19, %v531_v21 }
  0xd8   : > { %v1897_v24 = vpop.f32.mrf.mxu0 }
  0xd9   : > { %v592_v26 = vpop.f32.mrf.mxu1  ;;  %822 = vrot.lane.b32.xlu1 %v2186_v23, %s2050_s16  ;;  %1911 = vmatprep.mubr.msk.f32.mxu1 %vm616_vm2, %v2186_v23 }
  0xda   : > { %v2194_v27 = vadd.f32 %v1805_v25, %v592_v26  ;;  %v534_v28 = vpop.f32.mrf.mxu0 }
  0xdb   : > { %v1906_v29 = vpop.f32.mrf.mxu1  ;;  %v2196_v30 = vadd.f32 %v1803_v19, %v534_v28 }
  0xdc   : > { %828 = vrot.lane.b32.xlu0 %v2194_v27, %s2050_s16  ;;  %1907 = vmatprep.subr.msk.mxu1 %vm616_vm2, %v2194_v27  ;;  %v1898_v32 = vpop.f32.mrf.mxu0 }
  0xdd   : > { %1908 = vmatpush3.xpose.msk.msra.mxu1 %vm616_vm2, %v2194_v27  ;;  %824 = vrot.lane.b32.xlu1 %v2196_v30, %s2050_s16 }
  0xde   : > { %1909 = vmatprep.subr.msk.mxu1 %vm616_vm2, %v2198_v31 }
  0xe0   : > { %826 = vrot.lane.b32.xlu0 %v2198_v31, %s2050_s16  ;;  %s2055_s16 = smov 104  }
  0xe1   : > { %1910 = vmatpush3.xpose.msk.msra.mxu1 %vm616_vm2, %v2198_v31 }
  0xe4   : > { %1912 = vmatmul.mubr.msk.f32.vlgmr.msra.gmra.mxu1 %vm616_vm2, %v2196_v30 }
 0x14b   : > { %v823_v33 = vpop.permute.xlu1 %822 }
 0x14c   : > { %1925 = vmatprep.mubr.msk.f32.mxu0 %vm616_vm2, %v823_v33 }
 0x14e   : > { %v829_v34 = vpop.permute.xlu0 %828 }
 0x14f   : > { %1921 = vmatprep.subr.msk.mxu0 %vm616_vm2, %v829_v34  ;;  %v825_v36 = vpop.permute.xlu1 %824 }
 0x150   : > { %1922 = vmatpush3.xpose.msk.msra.mxu0 %vm616_vm2, %v829_v34 }
 0x152   : > { %v827_v35 = vpop.permute.xlu0 %826 }
 0x153   : > { %1923 = vmatprep.subr.msk.mxu0 %vm616_vm2, %v827_v35 }
 0x154   : > { %1924 = vmatpush3.xpose.msk.msra.mxu0 %vm616_vm2, %v827_v35 }
 0x155   : > { %1941 = vmatprep.subr.bf16.mxu0 %v2048_v3 }
 0x157   : > { %1926 = vmatmul.mubr.msk.f32.vlgmr.msra.gmra.mxu0 %vm616_vm2, %v825_v36 }
 0x158   : > { %1943 = vmatprep.mubr.msk.bf16.mxu0 %vm2049_vm0, %v2048_v3 }
 0x1a4   : > { %v1913_v42 = vpop.f32.mrf.mxu1 }
 0x1a5   : > { %v705_v43 = vmul.f32 0.35355338, %v1913_v42 }
 0x1a6   : > { %v695_v45 = vpop.f32.mrf.mxu1 }
 0x1a7   : > { %v707_v47 = vadd.f32 %v705_v43, %v2232_v41  ;;  %v704_v48 = vmul.f32 0.35355338, %v695_v45  ;;  %v613_v43 = vld [vmem:[%s2371_s6 + $0x8] sm:$0xff] }
 0x1a9   : > { %v706_v50 = vadd.f32 %v704_v48, %v2234_v44  ;;  %v709_v51 = vadd.f32 %v707_v47, %v605_v46  ;;  %v1029_v47 = vpack.c.bf16 %v613_v43, %v613_v43 }
 0x1ab   : > { %v714_v52 = vsel %vm710_vm3, %v709_v51, -inf  ;;  %v708_v53 = vadd.f32 %v706_v50, %v604_v49  ;;  %v1035_v50 = vsel %vm1033_vm4, %v1029_v47, 0 }
 0x1ac   : > { %715 = vmax.xlane.f32.xlu1 %v714_v52  ;;  %v612_v52 = vld [vmem:[%s2371_s6] sm:$0xff] }
 0x1ad   : > { %v711_v54 = vsel %vm710_vm3, %v708_v53, -inf }
 0x1ae   : > { %712 = vmax.xlane.f32.xlu0 %v711_v54 }
 0x1bd   : > { %735 = vrot.lane.b32.xlu1 %v2194_v27, %s2051_s22 }
 0x217   : > { %v1927_v55 = vpop.f32.mrf.mxu0 }
 0x218   : > { %v914_v56 = vmul.f32 0.35355338, %v1927_v55 }
 0x219   : > { %v904_v57 = vpop.f32.mrf.mxu0 }
 0x21a   : > { %v913_v58 = vmul.f32 0.35355338, %v904_v57  ;;  %v916_v60 = vadd.f32 %v914_v56, %v2232_v41 }
 0x21c   : > { %v915_v61 = vadd.f32 %v913_v58, %v2234_v44  ;;  %v918_v1 = vadd.f32 %v916_v60, %v607_v62 }
 0x21e   : > { %v917_v63 = vadd.f32 %v915_v61, %v606_v59  ;;  %v922_v2 = vsel %vm710_vm3, %v918_v1, -inf }
 0x220   : > { %v919_v0 = vsel %vm710_vm3, %v917_v63, -inf }
 0x221   : > { %920 = vmax.xlane.f32.xlu0 %v919_v0 }
 0x225   : > { %923 = vmax.xlane.f32.xlu0 %v922_v2 }
 0x235   : > { %v716_v4 = vpop.xlane.xlu1 %715 }
 0x236   : > { %v718_v5 = vsub.f32 %v709_v51, %v716_v4 }
 0x237   : > { %v713_v6 = vpop.xlane.xlu0 %712 }
 0x238   : > { %v721_v7 = vmul.f32 1.442695, %v718_v5  ;;  %v717_v8 = vsub.f32 %v708_v53, %v713_v6  ;;  %v821_v53 = vpack.c.bf16 %v612_v52, %v612_v52 }
 0x239   : > { %v736_v9 = vpop.permute.xlu1 %735 }
 0x23a   : > { %2004 = vpow2.f32 %v721_v7  ;;  %v719_v10 = vmul.f32 1.442695, %v717_v8  ;;  %1914 = vmatprep.subr.mxu1 %v736_v9  ;;  %v1082_v54 = vsel %vm1033_vm4, %v821_v53, 0 }
 0x23b   : > { %1915 = vmatpush3.msra.mxu1 %v736_v9  ;;  %1942 = vmatpush3.bf16.msra.mxu0 %v1082_v54 }
 0x23c   : > { %2006 = vpow2.f32 %v719_v10 }
 0x247   : > { %v2005_v11 = vpop.eup %2004 }
 0x248   : > { %v726_v12 = vsel %vm710_vm3, %v2005_v11, 0.0 }
 0x249   : > { %v2007_v13 = vpop.eup %2006  ;;  %727 = vadd.xlane.f32.xlu0 %v726_v12 }
 0x24a   : > { %v723_v14 = vsel %vm710_vm3, %v2007_v13, 0.0 }
 0x24b   : > { %724 = vadd.xlane.f32.xlu1 %v723_v14  ;;  %v609_v14 = vld [vmem:[%s2230_s26 + $0x28] sm:$0xff] }
 0x25c   : > { %943 = vrot.lane.b32.xlu1 %v2194_v27, %s2052_s27 }
 0x2aa   : > { %v921_v15 = vpop.xlane.xlu0 %920 }
 0x2ab   : > { %v925_v18 = vsub.f32 %v917_v63, %v921_v15 }
 0x2ad   : > { %v927_v19 = vmul.f32 1.442695, %v925_v18 }
 0x2ae   : > { %v924_v20 = vpop.xlane.xlu0 %923 }
 0x2af   : > { %2008 = vpow2.f32 %v927_v19  ;;  %v926_v21 = vsub.f32 %v918_v1, %v924_v20  ;;  %v608_v19 = vld [vmem:[%s2230_s26 + $0x20] sm:$0xff] }
 0x2b1   : > { %v929_v22 = vmul.f32 1.442695, %v926_v21 }
 0x2b3   : > { %2010 = vpow2.f32 %v929_v22 }
 0x2bc   : > { %v2009_v24 = vpop.eup %2008 }
 0x2bd   : > { %v931_v25 = vsel %vm710_vm3, %v2009_v24, 0.0 }
 0x2be   : > { %932 = vadd.xlane.f32.xlu1 %v931_v25 }
 0x2c0   : > { %v2011_v26 = vpop.eup %2010 }
 0x2c1   : > { %v934_v28 = vsel %vm710_vm3, %v2011_v26, 0.0 }
 0x2c2   : > { %935 = vadd.xlane.f32.xlu0 %v934_v28 }
 0x2cf   : > { %941 = vrot.lane.b32.xlu1 %v2198_v31, %s2052_s27 }
 0x2d2   : > { %v728_v34 = vpop.xlane.xlu0 %727 }
 0x2d3   : > { %1129 = vrot.lane.b32.xlu1 %v2198_v31, %s2053_s28 }
 0x2d4   : > { %v725_v29 = vpop.xlane.xlu1 %724 }
 0x2d5   : > { %2012 = vrcp.f32 %v725_v29 }
 0x2d6   : > { %2014 = vrcp.f32 %v728_v34 }
 0x2d7   : > { %1127 = vrot.lane.b32.xlu1 %v2196_v30, %s2053_s28 }
 0x2d8   : > { %733 = vrot.lane.b32.xlu0 %v2198_v31, %s2051_s22  ;;  %v944_v35 = vpop.permute.xlu1 %943 }
 0x2dc   : > { %1131 = vrot.lane.b32.xlu0 %v2194_v27, %s2053_s28 }
 0x2e0   : > { %1125 = vrot.lane.b32.xlu0 %v2186_v23, %s2053_s28 }
 0x2e2   : > { %v2013_v32 = vpop.eup %2012 }
 0x2e3   : > { %v731_v33 = vmul.f32 %v2013_v32, %v2007_v13  ;;  %v2015_v38 = vpop.eup %2014 }
 0x2e4   : > { %v732_v40 = vmul.f32 %v2015_v38, %v2005_v11 }
 0x2e5   : > { %1918 = vmatprep.mubr.msk.f32.mxu1 %vm710_vm3, %v731_v33 }
 0x347   : > { %v933_v36 = vpop.xlane.xlu1 %932 }
 0x348   : > { %2016 = vrcp.f32 %v933_v36 }
 0x34b   : > { %v936_v37 = vpop.xlane.xlu0 %935  ;;  %v942_v42 = vpop.permute.xlu1 %941 }
 0x34c   : > { %2018 = vrcp.f32 %v936_v37 }
 0x34f   : > { %v734_v39 = vpop.permute.xlu0 %733  ;;  %v1130_v62 = vpop.permute.xlu1 %1129 }
 0x350   : > { %1916 = vmatprep.subr.mxu1 %v734_v39 }
 0x351   : > { %1917 = vmatpush3.msra.mxu1 %v734_v39 }
 0x352   : > { %1919 = vmatmul.mubr.msk.f32.vlgmr.msra.gmra.mxu1 %vm710_vm3, %v732_v40  ;;  %1928 = vmatprep.subr.mxu1 %v944_v35 }
 0x353   : > { %1929 = vmatpush3.msra.mxu1 %v944_v35  ;;  %v1132_v51 = vpop.permute.xlu0 %1131  ;;  %v1128_v63 = vpop.permute.xlu1 %1127 }
 0x354   : > { %1930 = vmatprep.subr.mxu1 %v942_v42 }
 0x355   : > { %v2017_v45 = vpop.eup %2016  ;;  %1931 = vmatpush3.msra.mxu1 %v942_v42 }
 0x356   : > { %v939_v46 = vmul.f32 %v2017_v45, %v2009_v24  ;;  %1935 = vmatprep.subr.bf16.mxu1 %v2048_v3 }
 0x357   : > { %v1126_v61 = vpop.permute.xlu0 %1125 }
 0x358   : > { %1932 = vmatprep.mubr.msk.f32.mxu1 %vm710_vm3, %v939_v46 }
 0x359   : > { %v2019_v48 = vpop.eup %2018 }
 0x35a   : > { %v940_v49 = vmul.f32 %v2019_v48, %v2011_v26 }
 0x35c   : > { %1933 = vmatmul.mubr.msk.f32.vlgmr.msra.gmra.mxu1 %vm710_vm3, %v940_v49 }
 0x35d   : > { %1936 = vmatpush3.bf16.msra.mxu1 %v1035_v50  ;;  %1937 = vmatprep.mubr.msk.bf16.mxu1 %vm2049_vm0, %v2048_v3 }
 0x35e   : > { %1947 = vmatprep.subr.msk.mxu1 %vm616_vm2, %v1132_v51 }
 0x412   : > { %v1920_v55 = vpop.f32.mrf.mxu1 }
 0x414   : > { %v811_v56 = vpop.f32.mrf.mxu1 }
 0x415   : > { %v820_v57 = vpack.c.bf16 %v1920_v55, %v811_v56 }
 0x417   : > { %1944 = vmatmul.mubr.msk.bf16.vlgmr.msra.gmra.mxu0 %vm616_vm2, %v820_v57 }
 0x41c   : > { %v1934_v58 = vpop.f32.mrf.mxu1 }
 0x41e   : > { %v1019_v59 = vpop.f32.mrf.mxu1 }
 0x41f   : > { %v1028_v60 = vpack.c.bf16 %v1934_v58, %v1019_v59 }
 0x421   : > { %1938 = vmatmul.mubr.msk.bf16.vlgmr.msra.gmra.mxu1 %vm616_vm2, %v1028_v60  ;;  %v611_v60 = vld [vmem:[%s2230_s26 + $0x38] sm:$0xff] }
 0x422   : > { %1948 = vmatpush3.xpose.msk.msra.mxu1 %vm616_vm2, %v1132_v51  ;;  %1951 = vmatprep.mubr.msk.f32.mxu1 %vm616_vm2, %v1126_v61  ;;  %v614_v51 = vld [vmem:[%s2371_s6 + $0x10] sm:$0xff] }
 0x423   : > { %1949 = vmatprep.subr.msk.mxu1 %vm616_vm2, %v1130_v62  ;;  %v1332_v52 = vpack.c.bf16 %v614_v51, %v614_v51 }
 0x425   : > { %v1337_v53 = vsel %vm1033_vm4, %v1332_v52, 0 }
 0x426   : > { %1950 = vmatpush3.xpose.msk.msra.mxu1 %vm616_vm2, %v1130_v62  ;;  %v610_v62 = vld [vmem:[%s2230_s26 + $0x30] sm:$0xff] }
 0x427   : > { %1961 = vmatprep.subr.bf16.mxu1 %v2048_v3 }
 0x429   : > { %1952 = vmatmul.mubr.msk.f32.vlgmr.msra.gmra.mxu1 %vm616_vm2, %v1128_v63 }
 0x42a   : > { %1963 = vmatprep.mubr.msk.bf16.mxu1 %vm2049_vm0, %v2048_v3  ;;  %1962 = vmatpush3.bf16.msra.mxu1 %v1337_v53 }
 0x4d7   : > { %v1118_v0 = vpop.f32.mrf.mxu0 }
 0x4d9   : > { %v1945_v1 = vpop.f32.mrf.mxu0 }
 0x4db   : > { %v1121_v2 = vpop.f32.mrf.mxu0 }
 0x4dd   : > { %v1946_v4 = vpop.f32.mrf.mxu0 }
 0x4e1   : > { %v1071_v5 = vpop.f32.mrf.mxu1 }
 0x4e2   : > { %v2288_v6 = vadd.f32 %v1118_v0, %v1071_v5 }
 0x4e3   : > { %v1939_v7 = vpop.f32.mrf.mxu1 }
 0x4e5   : > { %v1074_v8 = vpop.f32.mrf.mxu1 }
 0x4e6   : > { %v2290_v9 = vadd.f32 %v1121_v2, %v1074_v8 }
 0x4e7   : > { %v1940_v10 = vpop.f32.mrf.mxu1 }
 0x4e9   : > { %v1953_v11 = vpop.f32.mrf.mxu1 }
 0x4ea   : > { %v1217_v12 = vmul.f32 0.35355338, %v1953_v11 }
 0x4eb   : > { %v1207_v13 = vpop.f32.mrf.mxu1 }
 0x4ec   : > { %v1219_v15 = vadd.f32 %v1217_v12, %v2232_v41  ;;  %v1216_v18 = vmul.f32 0.35355338, %v1207_v13 }
 0x4ee   : > { %v1218_v20 = vadd.f32 %v1216_v18, %v2234_v44  ;;  %v1221_v21 = vadd.f32 %v1219_v15, %v609_v14 }
 0x4f0   : > { %v1225_v22 = vsel %vm710_vm3, %v1221_v21, -inf  ;;  %v1220_v24 = vadd.f32 %v1218_v20, %v608_v19 }
 0x4f1   : > { %1226 = vmax.xlane.f32.xlu1 %v1225_v22 }
 0x4f2   : > { %v1222_v25 = vsel %vm710_vm3, %v1220_v24, -inf }
 0x4f3   : > { %1223 = vmax.xlane.f32.xlu0 %v1222_v25 }
 0x502   : > { %1246 = vrot.lane.b32.xlu1 %v2194_v27, %s2054_s15 }
 0x506   : > { %1388 = vrot.lane.b32.xlu1 %v2194_v27, %s2055_s16 }
 0x50a   : > { %1386 = vrot.lane.b32.xlu1 %v2198_v31, %s2055_s16 }
 0x50e   : > { %1384 = vrot.lane.b32.xlu1 %v2196_v30, %s2055_s16 }
 0x57a   : > { %v1227_v26 = vpop.xlane.xlu1 %1226 }
 0x57b   : > { %v1229_v28 = vsub.f32 %v1221_v21, %v1227_v26 }
 0x57c   : > { %v1224_v29 = vpop.xlane.xlu0 %1223 }
 0x57d   : > { %v1232_v32 = vmul.f32 1.442695, %v1229_v28  ;;  %v1228_v33 = vsub.f32 %v1220_v24, %v1224_v29 }
 0x57e   : > { %v1247_v34 = vpop.permute.xlu1 %1246 }
 0x57f   : > { %2020 = vpow2.f32 %v1232_v32  ;;  %v1230_v35 = vmul.f32 1.442695, %v1228_v33  ;;  %1954 = vmatprep.subr.mxu0 %v1247_v34 }
 0x580   : > { %1955 = vmatpush3.msra.mxu0 %v1247_v34 }
 0x581   : > { %2022 = vpow2.f32 %v1230_v35 }
 0x582   : > { %v1389_v43 = vpop.permute.xlu1 %1388 }
 0x58c   : > { %v2021_v36 = vpop.eup %2020 }
 0x58d   : > { %v1237_v37 = vsel %vm710_vm3, %v2021_v36, 0.0 }
 0x58e   : > { %v2023_v38 = vpop.eup %2022  ;;  %1238 = vadd.xlane.f32.xlu0 %v1237_v37 }
 0x58f   : > { %v1234_v39 = vsel %vm710_vm3, %v2023_v38, 0.0 }
 0x592   : > { %1235 = vadd.xlane.f32.xlu0 %v1234_v39 }
 0x5a8   : > { %1244 = vrot.lane.b32.xlu0 %v2198_v31, %s2054_s15 }
 0x5ac   : > { %1382 = vrot.lane.b32.xlu0 %v2186_v23, %s2055_s16  ;;  %v1387_v23 = vpop.permute.xlu1 %1386 }
 0x5b0   : > { %v1385_v50 = vpop.permute.xlu1 %1384 }
 0x617   : > { %v1239_v30 = vpop.xlane.xlu0 %1238 }
 0x618   : > { %2024 = vrcp.f32 %v1239_v30 }
 0x61b   : > { %v1236_v40 = vpop.xlane.xlu0 %1235 }
 0x61c   : > { %2026 = vrcp.f32 %v1236_v40 }
 0x61f   : > { %v1245_v42 = vpop.permute.xlu0 %1244 }
 0x620   : > { %1956 = vmatprep.subr.mxu0 %v1245_v42 }
 0x621   : > { %1957 = vmatpush3.msra.mxu0 %v1245_v42 }
 0x622   : > { %1967 = vmatprep.subr.msk.mxu0 %vm616_vm2, %v1389_v43 }
 0x623   : > { %v1383_v49 = vpop.permute.xlu0 %1382 }
 0x625   : > { %v2025_v45 = vpop.eup %2024 }
 0x626   : > { %v1243_v48 = vmul.f32 %v2025_v45, %v2021_v36 }
 0x629   : > { %v2027_v46 = vpop.eup %2026 }
 0x62a   : > { %v1242_v47 = vmul.f32 %v2027_v46, %v2023_v38  ;;  %v1835_v38 = vld [vmem:[%s2372_s7] ss:$0 sm:$0xff] }
 0x62c   : > { %1958 = vmatprep.mubr.msk.f32.mxu0 %vm710_vm3, %v1242_v47 }
 0x62d   : > { %1959 = vmatmul.mubr.msk.f32.vlgmr.msra.gmra.mxu0 %vm710_vm3, %v1243_v48 }
 0x62e   : > { %1968 = vmatpush3.xpose.msk.msra.mxu0 %vm616_vm2, %v1389_v43  ;;  %1971 = vmatprep.mubr.msk.f32.mxu0 %vm616_vm2, %v1383_v49 }
 0x62f   : > { %1969 = vmatprep.subr.msk.mxu0 %vm616_vm2, %v1387_v23 }
 0x632   : > { %1970 = vmatpush3.xpose.msk.msra.mxu0 %vm616_vm2, %v1387_v23 }
 0x633   : > { %1981 = vmatprep.subr.bf16.mxu0 %v2048_v3 }
 0x635   : > { %1972 = vmatmul.mubr.msk.f32.vlgmr.msra.gmra.mxu0 %vm616_vm2, %v1385_v50 }
 0x636   : > { %1983 = vmatprep.mubr.msk.bf16.mxu0 %vm2049_vm0, %v2048_v3 }
 0x6ed   : > { %v1960_v54 = vpop.f32.mrf.mxu0 }
 0x6ef   : > { %v1322_v55 = vpop.f32.mrf.mxu0 }
 0x6f0   : > { %v1331_v56 = vpack.c.bf16 %v1960_v54, %v1322_v55 }
 0x6f2   : > { %1964 = vmatmul.mubr.msk.bf16.vlgmr.msra.gmra.mxu1 %vm616_vm2, %v1331_v56 }
 0x6f5   : > { %v1973_v57 = vpop.f32.mrf.mxu0 }
 0x6f6   : > { %v1474_v58 = vmul.f32 0.35355338, %v1973_v57 }
 0x6f7   : > { %v1464_v59 = vpop.f32.mrf.mxu0 }
 0x6f8   : > { %v1476_v61 = vadd.f32 %v1474_v58, %v2232_v41  ;;  %v1473_v3 = vmul.f32 0.35355338, %v1464_v59 }
 0x6fa   : > { %v1475_v63 = vadd.f32 %v1473_v3, %v2234_v44  ;;  %v1478_v0 = vadd.f32 %v1476_v61, %v611_v60 }
 0x6fc   : > { %v1482_v1 = vsel %vm710_vm3, %v1478_v0, -inf  ;;  %v1477_v2 = vadd.f32 %v1475_v63, %v610_v62 }
 0x6fd   : > { %1483 = vmax.xlane.f32.xlu1 %v1482_v1 }
 0x6fe   : > { %v1479_v4 = vsel %vm710_vm3, %v1477_v2, -inf }
 0x6ff   : > { %1480 = vmax.xlane.f32.xlu0 %v1479_v4 }
 0x70e   : > { %1503 = vrot.lane.b32.xlu1 %v2194_v27, %s2056_s19 }
 0x786   : > { %v1484_v5 = vpop.xlane.xlu1 %1483 }
 0x787   : > { %v1486_v7 = vsub.f32 %v1478_v0, %v1484_v5  ;;  %v1836_v0 = vld [vmem:[%s2373_s8] ss:$0 sm:$0xff] }
 0x788   : > { %v1481_v8 = vpop.xlane.xlu0 %1480 }
 0x789   : > { %v1489_v10 = vmul.f32 1.442695, %v1486_v7  ;;  %v1485_v41 = vsub.f32 %v1477_v2, %v1481_v8  ;;  %v1837_v2 = vld [vmem:[%s2374_s9] ss:$0 sm:$0xff] }
 0x78a   : > { %v1504_v11 = vpop.permute.xlu1 %1503 }
 0x78b   : > { %2028 = vpow2.f32 %v1489_v10  ;;  %v1487_v12 = vmul.f32 1.442695, %v1485_v41  ;;  %1974 = vmatprep.subr.mxu1 %v1504_v11 }
 0x78c   : > { %1975 = vmatpush3.msra.mxu1 %v1504_v11 }
 0x78d   : > { %2030 = vpow2.f32 %v1487_v12 }
 0x798   : > { %v2029_v44 = vpop.eup %2028 }
 0x799   : > { %v1494_v13 = vsel %vm710_vm3, %v2029_v44, 0.0 }
 0x79a   : > { %v2031_v14 = vpop.eup %2030  ;;  %1495 = vadd.xlane.f32.xlu0 %v1494_v13 }
 0x79b   : > { %v1491_v15 = vsel %vm710_vm3, %v2031_v14, 0.0 }
 0x79e   : > { %1492 = vadd.xlane.f32.xlu0 %v1491_v15 }
 0x7b2   : > { %v1373_v27 = vpop.f32.mrf.mxu1 }
 0x7b3   : > { %v1380_v18 = vadd.f32 %v1373_v27, %v2288_v6 }
 0x7b4   : > { %1501 = vrot.lane.b32.xlu0 %v2198_v31, %s2056_s19  ;;  %v1965_v19 = vpop.f32.mrf.mxu1  ;;  %v615_v31 = vld [vmem:[%s2371_s6 + $0x18] sm:$0xff] }
 0x7b5   : > { %v1589_v6 = vpack.c.bf16 %v615_v31, %v615_v31 }
 0x7b6   : > { %v1376_v20 = vpop.f32.mrf.mxu1 }
 0x7b7   : > { %v1381_v21 = vadd.f32 %v1376_v20, %v2290_v9  ;;  %v1594_v9 = vsel %vm1033_vm4, %v1589_v6, 0 }
 0x7b8   : > { %v1966_v22 = vpop.f32.mrf.mxu1  ;;  %1982 = vmatpush3.bf16.msra.mxu0 %v1594_v9 }
 0x823   : > { %v1496_v24 = vpop.xlane.xlu0 %1495 }
 0x824   : > { %2032 = vrcp.f32 %v1496_v24 }
 0x827   : > { %v1493_v25 = vpop.xlane.xlu0 %1492 }
 0x828   : > { %2034 = vrcp.f32 %v1493_v25 }
 0x82b   : > { %v1502_v26 = vpop.permute.xlu0 %1501 }
 0x82c   : > { %1976 = vmatprep.subr.mxu1 %v1502_v26 }
 0x82d   : > { %1977 = vmatpush3.msra.mxu1 %v1502_v26 }
 0x831   : > { %v2033_v28 = vpop.eup %2032 }
 0x832   : > { %v1500_v33 = vmul.f32 %v2033_v28, %v2029_v44 }
 0x835   : > { %v2035_v29 = vpop.eup %2034 }
 0x836   : > { %v1499_v32 = vmul.f32 %v2035_v29, %v2031_v14 }
 0x838   : > { %1978 = vmatprep.mubr.msk.f32.mxu1 %vm710_vm3, %v1499_v32 }
 0x839   : > { %1979 = vmatmul.mubr.msk.f32.vlgmr.msra.gmra.mxu1 %vm710_vm3, %v1500_v33 }
 0x8f9   : > { %v1980_v34 = vpop.f32.mrf.mxu1 }
 0x8fb   : > { %v1579_v35 = vpop.f32.mrf.mxu1 }
 0x8fc   : > { %v1588_v36 = vpack.c.bf16 %v1980_v34, %v1579_v35 }
 0x8fe   : > { %1984 = vmatmul.mubr.msk.bf16.vlgmr.msra.gmra.mxu0 %vm616_vm2, %v1588_v36 }
 0x9be   : > { %v1630_v37 = vpop.f32.mrf.mxu0 }
 0x9bf   : > { %v1637_v39 = vadd.f32 %v1630_v37, %v1380_v18 }
 0x9c0   : > { %v1985_v30 = vpop.f32.mrf.mxu0 }
 0x9c1   : > { %v1646_v40 = vadd.f32 %v1835_v38, %v1637_v39 }
 0x9c2   : > { %v1633_v42 = vpop.f32.mrf.mxu0 }
 0x9c3   : > { %v1638_v43 = vadd.f32 %v1633_v42, %v1381_v21  ;;  %v1648_v45 = vadd.f32 %v1646_v40, %v2175_v16 }
 0x9c4   : > { %v1986_v46 = vpop.f32.mrf.mxu0 }
 0x9c5   : > { %v1647_v47 = vadd.f32 %v1835_v38, %v1638_v43  ;;  %v1652_v48 = vsel %vm493_vm1, %v1648_v45, 0.0 }
 0x9c6   : > { %1653 = vadd.xlane.f32.xlu1 %v1652_v48 }
 0x9c7   : > { %v1649_v49 = vadd.f32 %v1647_v47, %v2177_v17 }
 0x9c9   : > { %v1655_v23 = vsel %vm493_vm1, %v1649_v49, 0.0 }
 0x9ca   : > { %1656 = vadd.xlane.f32.xlu0 %v1655_v23 }
 0xa4f   : > { %v1654_v50 = vpop.xlane.xlu1 %1653 }
 0xa50   : > { %v1659_v51 = vmul.f32 0.03125, %v1654_v50 }
 0xa52   : > { %v1661_v52 = vsub.f32 %v1648_v45, %v1659_v51 }
 0xa53   : > { %v1657_v53 = vpop.xlane.xlu0 %1656 }
 0xa54   : > { %v1660_v54 = vmul.f32 0.03125, %v1657_v53  ;;  %v1663_v55 = vmul.f32 %v1661_v52, %v1661_v52 }
 0xa56   : > { %v1662_v56 = vsub.f32 %v1649_v49, %v1660_v54  ;;  %v1665_v57 = vsel %vm493_vm1, %v1663_v55, 0.0 }
 0xa57   : > { %1666 = vadd.xlane.f32.xlu1 %v1665_v57 }
 0xa58   : > { %v1664_v16 = vmul.f32 %v1662_v56, %v1662_v56 }
 0xa5a   : > { %v1668_v58 = vsel %vm493_vm1, %v1664_v16, 0.0 }
 0xa5b   : > { %1669 = vadd.xlane.f32.xlu0 %v1668_v58 }
 0xae0   : > { %v1667_v59 = vpop.xlane.xlu1 %1666 }
 0xae1   : > { %v1671_v17 = vmul.f32 0.03125, %v1667_v59 }
 0xae3   : > { %v1673_v60 = vadd.f32 1e-05, %v1671_v17 }
 0xae4   : > { %v1670_v61 = vpop.xlane.xlu0 %1669 }
 0xae5   : > { %2036 = vrsqrt.f32 %v1673_v60  ;;  %v1672_v3 = vmul.f32 0.03125, %v1670_v61 }
 0xae7   : > { %v1674_v62 = vadd.f32 1e-05, %v1672_v3 }
 0xae9   : > { %2038 = vrsqrt.f32 %v1674_v62 }
 0xaf2   : > { %v2037_v63 = vpop.eup %2036 }
 0xaf3   : > { %v1677_v1 = vmul.f32 %v2037_v63, %v1661_v52 }
 0xaf5   : > { %v1685_v4 = vmul.f32 %v1836_v0, %v1677_v1 }
 0xaf6   : > { %v2039_v5 = vpop.eup %2038 }
 0xaf7   : > { %v1693_v7 = vadd.f32 %v1837_v2, %v1685_v4  ;;  %v1678_v8 = vmul.f32 %v2039_v5, %v1662_v56 }
 0xaf9   : > { %1695 = vst.msk [vmem:[%s473_s14] sm:$0xff] %vm493_vm1, %v1693_v7  ;;  %v1686_v10 = vmul.f32 %v1836_v0, %v1678_v8 }
 0xafb   : > { %v1694_v41 = vadd.f32 %v1837_v2, %v1686_v10 }
 0xafd   : > { %1696 = vst.msk [vmem:[%s473_s14 + $0x8] sm:$0xff] %vm493_vm1, %v1694_v41 }
 0xafe PF: > { %s22_s21 = sadd.s32 1, %s2046_s21  }
 0xaff   : > { %p19_p4 = scmp.ge.s32.totalorder %s22_s21, 4  }
 0xb01   :  { %21 = sbr.rel (!%p19_p4) target bundleno = 1 (0x1), region = 107 }

// kernel: seq2seq_forward.12
= control target key start
LH: loop header
LB: loop body
LE: loop exit
PB: predicated region body
PF: predicated region fallthrough
CT: control target
= control target key end

     0   :  { %s589_s24 = smov 0   ;;  %s665_s0 = inlined_call_operand.vmem [shape: f32[2,8,32], index: 0, kind: input, shape index: {}]   ;;  %s666_s1 = inlined_call_operand.vmem [shape: f32[32,64], index: 1, kind: input, shape index: {}]   ;;  %s667_s2 = inlined_call_operand.vmem [shape: f32[1,64], index: 2, kind: input, shape index: {}]   ;;  %s668_s3 = inlined_call_operand.vmem [shape: f32[64,32], index: 3, kind: input, shape index: {}]   ;;  %s669_s4 = inlined_call_operand.vmem [shape: f32[1,32], index: 4, kind: input, shape index: {}]   ;;  %s670_s5 = inlined_call_operand.vmem [shape: f32[1,32], index: 5, kind: input, shape index: {}]   ;;  %s671_s6 = inlined_call_operand.vmem [shape: f32[1,32], index: 6, kind: input, shape index: {}]   ;;  %s672_s7 = inlined_call_operand.vmem [shape: f32[2,8,32], index: 7, kind: output, shape index: {}]  }
   0x1 LB: > { %s484_s25 = sadd.s32 4294967295, %s545_s24   ;;  %p488_p0 = scmp.ge.s32.totalorder %s545_s24, 1  ;;  %s545_s24 = sphi %s589_s24, %s17_s24  }
   0x2   : > { %p236_p1 = scmp.lt.s32.totalorder %s545_s24, 3 }
   0x4   : > { %p237_p2 = pnand %p488_p0, %p236_p1 }
   0x5   : > { %p266_p3 = scmp.lt.s32.totalorder (!%p237_p2), %s484_s25, 1 }
   0x6   : > { %240 = sbr.rel (%p237_p2) target bundleno = 726 (0x2d6), region = 48 }
   0xb   : > { %v279_v0 = vld [vmem:[%s666_s1 + $0x10] sm:$0xff]  ;;  %v280_v1 = vld [vmem:[%s666_s1 + $0x18] sm:$0xff]  ;;  %v277_v2 = vld [vmem:[%s666_s1] sm:$0xff]  ;;  %v547_v3 = vmov 0.0   ;;  %vm548_vm0 = vmmov 0   ;;  %s674_s25 = smov (!%p266_p3, %s484_s25), 1 }
   0xc   : > { %507 = vmatprep.subr.bf16.mxu0 %v547_v3  ;;  %v282_v4 = vpack.c.bf16 %v280_v1, %v279_v0  ;;  %v278_v5 = vld [vmem:[%s666_s1 + $0x8] sm:$0xff]  ;;  %511 = vmatprep.mubr.msk.bf16.mxu0 %vm548_vm0, %v547_v3  ;;  %v342_v6 = vld [vmem:[%s668_s3 + $0x30] sm:$0xff]  ;;  %v343_v7 = vld [vmem:[%s668_s3 + $0x38] sm:$0xff]  ;;  %s489_s19 = sshll.u32 %s674_s25, 3  ;;  %vm290_vm1 = vcmask 261120   ;;  %vm355_vm2 = vcmask 523264  }
   0xd   : > { %515 = vmatprep.subr.bf16.mxu1 %v547_v3  ;;  %v347_v8 = vpack.c.bf16 %v343_v7, %v342_v6  ;;  %v340_v9 = vld [vmem:[%s668_s3 + $0x20] sm:$0xff]  ;;  %v341_v10 = vld [vmem:[%s668_s3 + $0x28] sm:$0xff]  ;;  %523 = vmatprep.mubr.msk.bf16.mxu1 %vm548_vm0, %v547_v3  ;;  %v281_v11 = vpack.c.bf16 %v278_v5, %v277_v2  ;;  %s269_s22 = scalar_lea.vmem %s665_s0, %s489_s19  ;;  %v338_v15 = vld [vmem:[%s668_s3 + $0x10] sm:$0xff]  ;;  %s273_s21 = scalar_lea.vmem %s672_s7, %s489_s19 }
   0xe   : > { %508 = vmatpush3.bf16.msra.mxu0 %v282_v4  ;;  %v346_v12 = vpack.c.bf16 %v341_v10, %v340_v9  ;;  %v275_v13 = vld [vmem:[%s269_s22] sm:$0xff]  ;;  %v339_v16 = vld [vmem:[%s668_s3 + $0x18] sm:$0xff]  ;;  %v337_v19 = vld [vmem:[%s668_s3 + $0x8] sm:$0xff] }
   0xf   : > { %509 = vmatprep.subr.bf16.mxu0 %v547_v3  ;;  %516 = vmatpush3.bf16.msra.mxu1 %v347_v8  ;;  %v276_v14 = vpack.c.bf16 %v275_v13, %v275_v13  ;;  %v345_v17 = vpack.c.bf16 %v339_v16, %v338_v15  ;;  %v336_v18 = vld [vmem:[%s668_s3] sm:$0xff] }
  0x10   : > { %517 = vmatprep.subr.bf16.mxu1 %v547_v3  ;;  %v344_v20 = vpack.c.bf16 %v337_v19, %v336_v18  ;;  %v491_v21 = vld [vmem:[%s667_s2] ss:$0 sm:$0xff] }
  0x11   : > { %v493_v29 = vld [vmem:[%s669_s4] ss:$0 sm:$0xff] }
  0x12   : > { %510 = vmatpush3.bf16.msra.mxu0 %v281_v11  ;;  %v495_v46 = vld [vmem:[%s670_s5] ss:$0 sm:$0xff] }
  0x13   : > { %518 = vmatpush3.bf16.msra.mxu1 %v346_v12  ;;  %v496_v48 = vld [vmem:[%s671_s6] ss:$0 sm:$0xff] }
  0x14   : > { %519 = vmatprep.subr.bf16.mxu1 %v547_v3 }
  0x15   : > { %512 = vmatmul.mubr.msk.bf16.vlgmr.msra.gmra.mxu0 %vm290_vm1, %v276_v14 }
  0x17   : > { %520 = vmatpush3.bf16.msra.mxu1 %v345_v17 }
  0x18   : > { %521 = vmatprep.subr.bf16.mxu1 %v547_v3 }
  0x1b   : > { %522 = vmatpush3.bf16.msra.mxu1 %v344_v20 }
  0xd5   : > { %v328_v22 = vpop.f32.mrf.mxu0 }
  0xd6   : > { %v329_v23 = vadd.f32 %v491_v21, %v328_v22 }
  0xd7   : > { %v513_v24 = vpop.f32.mrf.mxu0 }
  0xd8   : > { %v334_v25 = vmax.f32 %v329_v23, 0.0 }
  0xd9   : > { %v331_v26 = vpop.f32.mrf.mxu0 }
  0xda   : > { %v335_v27 = vpack.c.bf16 %v334_v25, %v334_v25 }
  0xdb   : > { %v514_v28 = vpop.f32.mrf.mxu0 }
  0xdc   : > { %524 = vmatmul.mubr.msk.bf16.vlgmr.msra.gmra.mxu1 %vm355_vm2, %v335_v27 }
 0x19c   : > { %v393_v30 = vpop.f32.mrf.mxu1 }
 0x19d   : > { %v394_v31 = vadd.f32 %v493_v29, %v393_v30 }
 0x19e   : > { %v525_v32 = vpop.f32.mrf.mxu1 }
 0x19f   : > { %v399_v33 = vadd.f32 %v394_v31, %v275_v13 }
 0x1a0   : > { %v396_v34 = vpop.f32.mrf.mxu1 }
 0x1a1   : > { %v402_v35 = vsel %vm290_vm1, %v399_v33, 0.0 }
 0x1a2   : > { %403 = vadd.xlane.f32.xlu0 %v402_v35  ;;  %v526_v36 = vpop.f32.mrf.mxu1 }
 0x22b   : > { %v404_v37 = vpop.xlane.xlu0 %403 }
 0x22c   : > { %v406_v38 = vmul.f32 0.03125, %v404_v37 }
 0x22e   : > { %v407_v39 = vsub.f32 %v399_v33, %v406_v38 }
 0x230   : > { %v408_v40 = vmul.f32 %v407_v39, %v407_v39 }
 0x232   : > { %v409_v41 = vsel %vm290_vm1, %v408_v40, 0.0 }
 0x233   : > { %410 = vadd.xlane.f32.xlu0 %v409_v41 }
 0x2bc   : > { %v411_v42 = vpop.xlane.xlu0 %410 }
 0x2bd   : > { %v412_v43 = vmul.f32 0.03125, %v411_v42 }
 0x2bf   : > { %v413_v44 = vadd.f32 1e-05, %v412_v43 }
 0x2c1   : > { %537 = vrsqrt.f32 %v413_v44 }
 0x2ce   : > { %v538_v45 = vpop.eup %537 }
 0x2cf   : > { %v415_v47 = vmul.f32 %v538_v45, %v407_v39 }
 0x2d1   : > { %v422_v49 = vmul.f32 %v495_v46, %v415_v47 }
 0x2d3   : > { %v429_v50 = vadd.f32 %v496_v48, %v422_v49 }
 0x2d5   : > { %430 = vst.msk [vmem:[%s273_s21] sm:$0xff] %vm290_vm1, %v429_v50 }
 0x2d6 PF: > { %s17_s24 = sadd.s32 1, %s545_s24  }
 0x2d7   : > { %p14_p4 = scmp.ge.s32.totalorder %s17_s24, 4  }
 0x2d9   :  { %16 = sbr.rel (!%p14_p4) target bundleno = 1 (0x1), region = 78 }

// kernel: seq2seq_forward.13
= control target key start
LH: loop header
LB: loop body
LE: loop exit
PB: predicated region body
PF: predicated region fallthrough
CT: control target
= control target key end

     0   :  { %12 = vsyncpa [#allocation3], 0  ;;  %s814_s0 = inlined_call_operand.vmem [shape: f32[2,7,32], index: 0, kind: input, shape index: {}]   ;;  %s815_s1 = inlined_call_operand.vmem [shape: f32[32,32], index: 1, kind: input, shape index: {}]   ;;  %s816_s2 = inlined_call_operand.vmem [shape: f32[1,32], index: 2, kind: input, shape index: {}]   ;;  %s817_s3 = inlined_call_operand.vmem [shape: f32[64,32], index: 3, kind: input, shape index: {}]   ;;  %s818_s4 = inlined_call_operand.vmem [shape: s32[2,7,1], index: 4, kind: input, shape index: {}]   ;;  %s819_s5 = inlined_call_operand.hbm [shape: f32[1,1], index: 5, kind: output, shape index: {0}]   ;;  %s820_s6 = inlined_call_operand.hbm [shape: f32[1,1], index: 6, kind: output, shape index: {1}]  }
   0x1   :  { %13 = vsyncpa [#allocation5], 0  ;;  %s704_s21 = smov 0  }
   0x2 LB: > { %s710_s22 = sadd.s32 4294967295, %s661_s21   ;;  %p523_p0 = scmp.ge.s32.totalorder %s661_s21, 1  ;;  %s661_s21 = sphi %s704_s21, %s19_s21  }
   0x3   : > { %p215_p1 = scmp.lt.s32.totalorder %s661_s21, 3 }
   0x5   : > { %p216_p2 = pnand %p523_p0, %p215_p1 }
   0x6   : > { %p243_p3 = scmp.lt.s32.totalorder (!%p216_p2), %s710_s22, 1  ;;  %p526_p4 = scmp.ne.s32.totalorder (!%p216_p2), %s710_s22, 0 }
   0x7   : > { %219 = sbr.rel (%p216_p2) target bundleno = 774 (0x306), region = 40 }
   0xc   : > { %s244_s23 = scalar_select %p243_p3, %s710_s22, 1 }
   0xd   : > { %255 = sbr.rel (%p526_p4) target bundleno = 20 (0x14), region = 44 }
   0xe   : > { %s524_s24 = sshll.u32 %s244_s23, 3 }
   0xf   : > { %s246_s27 = scalar_lea.vmem %s814_s0, %s524_s24  ;;  %s722_s30 = scalar_lea.vmem %s818_s4, %s524_s24 }
  0x12   : > { %vm256_vm0 = vcmask 0   ;;  %v663_v0 = vmov 0.0  }
  0x13   : > { %257 = vst.msk [vmem:[#allocation2] sm:$0x1] %vm256_vm0, %v663_v0  ;;  %258 = vst.msk [vmem:[#allocation4] sm:$0x1] %vm256_vm0, %v663_v0 }
  0x14 PF: > { %v263_v1 = vld [vmem:[%s815_s1 + $0x10] sm:$0xff]  ;;  %v264_v2 = vld [vmem:[%s815_s1 + $0x18] sm:$0xff]  ;;  %v261_v3 = vld [vmem:[%s815_s1] sm:$0xff]  ;;  %v664_v4 = vmov 0.0   ;;  %vm665_vm1 = vmmov 0   ;;  %vm274_vm2 = vcmask 261120   ;;  %v401_v44 = vlaneseq }
  0x15   : > { %546 = vmatprep.subr.bf16.mxu0 %v664_v4  ;;  %v266_v5 = vpack.c.bf16 %v264_v2, %v263_v1  ;;  %v262_v6 = vld [vmem:[%s815_s1 + $0x8] sm:$0xff]  ;;  %550 = vmatprep.mubr.msk.bf16.mxu0 %vm665_vm1, %v664_v4  ;;  %v326_v7 = vld [vmem:[%s817_s3 + $0x30] sm:$0xff]  ;;  %v327_v8 = vld [vmem:[%s817_s3 + $0x38] sm:$0xff]  ;;  %v666_v34 = vmov 0   ;;  %vm388_vm3 = vcmask 522240   ;;  %vm419_vm6 = vcmask 6144  }
  0x16   : > { %554 = vmatprep.subr.bf16.mxu1 %v664_v4  ;;  %562 = vmatprep.mubr.msk.bf16.mxu1 %vm665_vm1, %v664_v4  ;;  %v265_v9 = vpack.c.bf16 %v262_v6, %v261_v3  ;;  %v259_v10 = vld [vmem:[%s246_s27] sm:$0x7f]  ;;  %v331_v11 = vpack.c.bf16 %v327_v8, %v326_v7  ;;  %v325_v13 = vld [vmem:[%s817_s3 + $0x28] sm:$0xff]  ;;  %v322_v18 = vld [vmem:[%s817_s3 + $0x10] sm:$0xff]  ;;  %v402_v45 = vand.u32 127, %v401_v44  ;;  %vm428_vm7 = vcmask 0  }
  0x17   : > { %547 = vmatpush3.bf16.msra.mxu0 %v266_v5  ;;  %v324_v12 = vld [vmem:[%s817_s3 + $0x20] sm:$0xff]  ;;  %v260_v15 = vpack.c.bf16 %v259_v10, %v259_v10  ;;  %v323_v19 = vld [vmem:[%s817_s3 + $0x18] sm:$0xff]  ;;  %v321_v23 = vld [vmem:[%s817_s3 + $0x8] sm:$0xff]  ;;  %592 = vset.pattern.permute.xlu0 %v666_v34  ;;  %p574_p5 = scmp.eq.s32.totalorder %s710_s22, 1 }
  0x18   : > { %548 = vmatprep.subr.bf16.mxu0 %v664_v4  ;;  %v345_v14 = vsel %vm274_vm2, %v331_v11, 0  ;;  %v330_v16 = vpack.c.bf16 %v325_v13, %v324_v12  ;;  %v329_v20 = vpack.c.bf16 %v323_v19, %v322_v18  ;;  %v320_v22 = vld [vmem:[%s817_s3] sm:$0xff] }
  0x19   : > { %555 = vmatpush3.bf16.xpose.msra.mxu1 %v345_v14  ;;  %v328_v24 = vpack.c.bf16 %v321_v23, %v320_v22  ;;  %v527_v26 = vld [vmem:[%s816_s2] ss:$0 sm:$0xff] }
  0x1a   : > { %556 = vmatprep.subr.bf16.mxu1 %v664_v4  ;;  %v342_v17 = vsel %vm274_vm2, %v330_v16, 0  ;;  %v339_v21 = vsel %vm274_vm2, %v329_v20, 0  ;;  %v387_v40 = vld [vmem:[%s722_s30] sm:$0x7f]  ;;  %s667_s30 = smov [#allocation4]  }
  0x1b   : > { %549 = vmatpush3.bf16.msra.mxu0 %v265_v9  ;;  %v336_v25 = vsel %vm274_vm2, %v328_v24, 0  ;;  %vm413_vm5 = vcmp.ne.s32.totalorder %v387_v40, 4294967295  ;;  %v430_v60 = vld [vmem:[#allocation4] sm:$0x1]  ;;  %s458_s12 = sshll.u32 %s667_s30, 4  ;;  %s459_s12 = int_to_ptr.vmem [resolvable:$true] %s458_s12 }
  0x1c   : > { %v531_v52 = vsel %vm413_vm5, 1.0, %v664_v4  ;;  %s599_s13 = scalar_lea.vmem %s459_s12, 16  ;;  %s605_s14 = scalar_lea.vmem %s459_s12, 32 }
  0x1d   : > { %v431_v53 = vsel %vm419_vm6, %v531_v52, 0.0  ;;  %p600_p6 = scmp.ne.s32.totalorder %s459_s12, %s599_s13  ;;  %p606_p9 = scmp.lt.s32.totalorder %s459_s12, %s459_s12 }
  0x1e   : > { %551 = vmatmul.mubr.msk.bf16.vlgmr.msra.gmra.mxu0 %vm274_vm2, %v260_v15  ;;  %v432_v54 = vrot.slane %v431_v53, 4  ;;  %p607_p10 = scmp.lt.s32.totalorder %s605_s14, %s599_s13 }
  0x1f   : > { %p601_p7 = pnand %p600_p6, %p574_p5 }
  0x20   : > { %v433_v55 = vadd.f32 %v432_v54, %v431_v53  ;;  %p608_p11 = por %p607_p10, %p606_p9 }
  0x21   : > { %557 = vmatpush3.bf16.xpose.msra.mxu1 %v342_v17  ;;  %p602_p8 = pneg %p601_p7 }
  0x22   : > { %558 = vmatprep.subr.bf16.mxu1 %v664_v4  ;;  %v434_v56 = vrot.slane %v433_v55, 2 }
  0x23   : > { %p609_p12 = pnand %p608_p11, %p602_p8 }
  0x24   : > { %v435_v57 = vadd.f32 %v434_v56, %v433_v55 }
  0x26   : > { %v436_v58 = vrot.slane %v435_v57, 1 }
  0x28   : > { %v437_v59 = vadd.f32 %v436_v58, %v435_v57 }
  0x29   : > { %559 = vmatpush3.bf16.xpose.msra.mxu1 %v339_v21 }
  0x2a   : > { %560 = vmatprep.subr.bf16.mxu1 %v664_v4  ;;  %v438_v61 = vadd.f32 %v437_v59, %v430_v60 }
  0x2c   : > { %439 = vst.msk [vmem:[#allocation4] sm:$0x1] %vm428_vm7, %v438_v61 }
  0x31   : > { %561 = vmatpush3.bf16.xpose.msra.mxu1 %v336_v25 }
  0xde   : > { %v312_v27 = vpop.f32.mrf.mxu0 }
  0xdf   : > { %v313_v28 = vadd.f32 %v527_v26, %v312_v27 }
  0xe0   : > { %v552_v29 = vpop.f32.mrf.mxu0 }
  0xe1   : > { %593 = vtanh.f32 %v313_v28 }
  0xe2   : > { %v315_v30 = vpop.f32.mrf.mxu0 }
  0xe4   : > { %v553_v31 = vpop.f32.mrf.mxu0 }
  0xee   : > { %v594_v32 = vpop.eup %593 }
  0xef   : > { %v319_v33 = vpack.c.bf16 %v594_v32, %v594_v32 }
  0xf1   : > { %563 = vmatmul.mubr.msk.bf16.vlgmr.msra.gmra.mxu1 %vm274_vm2, %v319_v33 }
 0x1b1   : > { %v381_v35 = vpop.f32.mrf.mxu1 }
 0x1b2   : > { %v389_v36 = vsel %vm388_vm3, %v381_v35, -inf }
 0x1b3   : > { %390 = vmax.xlane.f32.xlu0 %v389_v36  ;;  %v564_v37 = vpop.f32.mrf.mxu1 }
 0x1b5   : > { %v384_v38 = vpop.f32.mrf.mxu1 }
 0x1b7   : > { %v565_v39 = vpop.f32.mrf.mxu1 }
 0x1c9   : > { %404 = vperm.xlu0 %592, %v387_v40  }
 0x23c   : > { %v391_v41 = vpop.xlane.xlu0 %390 }
 0x23d   : > { %v392_v42 = vsub.f32 %v381_v35, %v391_v41 }
 0x23f   : > { %v393_v43 = vmul.f32 1.442695, %v392_v42 }
 0x241   : > { %595 = vpow2.f32 %v393_v43 }
 0x244   : > { %v405_v46 = vpop.permute.xlu0 %404 }
 0x245   : > { %vm406_vm4 = vcmp.eq.s32.totalorder %v402_v45, %v405_v46 }
 0x246   : > { %v530_v47 = vsel %vm406_vm4, 1.0, %v664_v4 }
 0x247   : > { %v409_v50 = vmul.f32 %v530_v47, %v381_v35 }
 0x249   : > { %v410_v51 = vsel %vm388_vm3, %v409_v50, 0.0 }
 0x24e   : > { %v596_v48 = vpop.eup %595 }
 0x24f   : > { %v395_v49 = vsel %vm388_vm3, %v596_v48, 0.0 }
 0x250   : > { %396 = vadd.xlane.f32.xlu1 %v395_v49 }
 0x254   : > { %411 = vadd.xlane.f32.xlu1 %v410_v51 }
 0x255   : > { %612 = shalt.err (!%p609_p12)
}
 0x256   : > { %569 = dma.vmem_to_hbm [thread:$0]  (%p574_p5), %s459_s12, 16, %s820_s6, [#allocation5]   ;;  %v418_v11 = vld [vmem:[#allocation2] sm:$0x1] }
 0x257   : > { %s668_s17 = smov [#allocation2]  }
 0x258   : > { %s447_s18 = sshll.u32 %s668_s17, 4  ;;  %s448_s18 = int_to_ptr.vmem [resolvable:$true] %s447_s18 }
 0x259   : > { %s623_s19 = scalar_lea.vmem %s448_s18, 16  ;;  %s629_s20 = scalar_lea.vmem %s448_s18, 32 }
 0x25a   : > { %p624_p13 = scmp.ne.s32.totalorder %s448_s18, %s623_s19  ;;  %p630_p2 = scmp.lt.s32.totalorder %s448_s18, %s448_s18 }
 0x25b   : > { %p631_p3 = scmp.lt.s32.totalorder %s629_s20, %s623_s19 }
 0x25c   : > { %p625_p0 = pnand %p624_p13, %p574_p5 }
 0x25d   : > { %p632_p4 = por %p631_p3, %p630_p2 }
 0x25e   : > { %p626_p1 = pneg %p625_p0 }
 0x260   : > { %p633_p6 = pnand %p632_p4, %p626_p1 }
 0x2d9   : > { %v397_v62 = vpop.xlane.xlu1 %396 }
 0x2da   : > { %597 = vlog2.f32 %v397_v62 }
 0x2dd   : > { %v412_v2 = vpop.xlane.xlu1 %411 }
 0x2e7   : > { %v598_v63 = vpop.eup %597 }
 0x2e8   : > { %v399_v0 = vmul.f32 0.6931472, %v598_v63 }
 0x2ea   : > { %v400_v1 = vadd.f32 %v399_v0, %v391_v41 }
 0x2ec   : > { %v416_v3 = vsub.f32 %v400_v1, %v412_v2 }
 0x2ee   : > { %v417_v4 = vmul.f32 %v531_v52, %v416_v3 }
 0x2f0   : > { %v420_v5 = vsel %vm419_vm6, %v417_v4, 0.0 }
 0x2f1   : > { %v421_v6 = vrot.slane %v420_v5, 4 }
 0x2f3   : > { %v422_v7 = vadd.f32 %v421_v6, %v420_v5 }
 0x2f5   : > { %v423_v8 = vrot.slane %v422_v7, 2 }
 0x2f7   : > { %v424_v9 = vadd.f32 %v423_v8, %v422_v7 }
 0x2f9   : > { %v425_v10 = vrot.slane %v424_v9, 1 }
 0x2fb   : > { %v426_v12 = vadd.f32 %v425_v10, %v424_v9 }
 0x2fd   : > { %v427_v13 = vadd.f32 %v426_v12, %v418_v11 }
 0x2ff   : > { %429 = vst.msk [vmem:[#allocation2] sm:$0x1] %vm428_vm7, %v427_v13 }
 0x300   : > { %636 = shalt.err (!%p633_p6)
}
 0x301   : > { %567 = dma.vmem_to_hbm [thread:$0]  (%p574_p5), %s448_s18, 16, %s819_s5, [#allocation3]  }
 0x302   : > { %652 = dma.done.wait (%p574_p5), [#allocation3], 16  }
 0x303   : > { %654 = vsyncadd (%p574_p5), [#allocation3], 4294967280 }
 0x304   : > { %656 = dma.done.wait (%p574_p5), [#allocation5], 16  }
 0x305   : > { %658 = vsyncadd (%p574_p5), [#allocation5], 4294967280 }
 0x306 PF: > { %s19_s21 = sadd.s32 1, %s661_s21  }
 0x307   : > { %p16_p7 = scmp.ge.s32.totalorder %s19_s21, 4  }
 0x309   :  { %18 = sbr.rel (!%p16_p7) target bundleno = 2 (0x2), region = 82 }
 0x30e   :  { %475 = vsyncpa [#allocation3], 1 }
 0x30f   :  { %477 = vsyncpa [#allocation3 + $0x1], 1 }
 0x310   :  { %478 = vsyncpa [#allocation5], 1 }

// kernel: seq2seq_forward.11
= control target key start
LH: loop header
LB: loop body
LE: loop exit
PB: predicated region body
PF: predicated region fallthrough
CT: control target
= control target key end

     0   :  { %s1839_s17 = smov 0   ;;  %s2056_s0 = inlined_call_operand.vmem [shape: f32[2,8,32], index: 0, kind: input, shape index: {}]   ;;  %s2057_s1 = inlined_call_operand.vmem [shape: f32[2,16,32], index: 1, kind: input, shape index: {}]   ;;  %s2058_s2 = inlined_call_operand.vmem [shape: f32[32,32], index: 2, kind: input, shape index: {}]   ;;  %s2059_s3 = inlined_call_operand.vmem [shape: f32[1,32], index: 3, kind: input, shape index: {}]   ;;  %s2060_s4 = inlined_call_operand.vmem [shape: f32[32,64], index: 4, kind: input, shape index: {}]   ;;  %s2061_s5 = inlined_call_operand.vmem [shape: f32[1,64], index: 5, kind: input, shape index: {}]   ;;  %s2062_s6 = inlined_call_operand.vmem [shape: f32[32,32], index: 6, kind: input, shape index: {}]   ;;  %s2063_s7 = inlined_call_operand.vmem [shape: f32[1,32], index: 7, kind: input, shape index: {}]   ;;  %s2064_s8 = inlined_call_operand.vmem [shape: f32[1,32], index: 8, kind: input, shape index: {}]   ;;  %s2065_s9 = inlined_call_operand.vmem [shape: f32[1,32], index: 9, kind: input, shape index: {}]   ;;  %s2066_s10 = inlined_call_operand.vmem [shape: f32[2,1,16], index: 10, kind: input, shape index: {}]   ;;  %s2067_s11 = inlined_call_operand.vmem [shape: f32[2,8,32], index: 11, kind: output, shape index: {}]  }
   0x1 LB: > { %s1554_s18 = sadd.s32 4294967295, %s1768_s17   ;;  %p1558_p0 = scmp.ge.s32.totalorder %s1768_s17, 1  ;;  %s1768_s17 = sphi %s1839_s17, %s21_s17  }
   0x2   : > { %p354_p1 = scmp.lt.s32.totalorder %s1768_s17, 3 }
   0x4   : > { %p355_p2 = pnand %p1558_p0, %p354_p1 }
   0x5   : > { %p400_p3 = scmp.lt.s32.totalorder (!%p355_p2), %s1554_s18, 1  ;;  %s1772_s30 = smov (!%p355_p2), 120  }
   0x6   : > { %358 = sbr.rel (%p355_p2) target bundleno = 2783 (0xadf), region = 64  ;;  %s1773_s15 = smov (!%p355_p2), 96  }
   0x7   : > { %s1775_s20 = smov (!%p355_p2), 112   ;;  %s1776_s21 = smov (!%p355_p2), 80  }
   0x8   : > { %s1777_s26 = smov (!%p355_p2), 104   ;;  %s1778_s29 = smov (!%p355_p2), 72  }
   0xb   : > { %v481_v0 = vld [vmem:[%s2060_s4 + $0x10] sm:$0xff]  ;;  %v482_v1 = vld [vmem:[%s2060_s4 + $0x18] sm:$0xff]  ;;  %v479_v2 = vld [vmem:[%s2060_s4] sm:$0xff]  ;;  %v1770_v3 = vmov 0.0   ;;  %vm1771_vm0 = vmmov 0   ;;  %s2069_s18 = smov (!%p400_p3, %s1554_s18), 1  ;;  %v540_v34 = vlaneseq }
   0xc   : > { %1639 = vmatprep.subr.bf16.mxu1 %v1770_v3  ;;  %v484_v4 = vpack.c.bf16 %v482_v1, %v481_v0  ;;  %v480_v5 = vld [vmem:[%s2060_s4 + $0x8] sm:$0xff]  ;;  %1631 = vmatprep.subr.bf16.mxu0 %v1770_v3  ;;  %v423_v6 = vld [vmem:[%s2058_s2 + $0x10] sm:$0xff]  ;;  %v424_v7 = vld [vmem:[%s2058_s2 + $0x18] sm:$0xff]  ;;  %s1592_s16 = sshll.u32 %s2069_s18, 4  ;;  %s1559_s19 = sshll.u32 %s2069_s18, 3  ;;  %vm434_vm1 = vcmask 261120  }
   0xd   : > { %v426_v8 = vpack.c.bf16 %v424_v7, %v423_v6  ;;  %1643 = vmatprep.mubr.msk.bf16.mxu1 %vm1771_vm0, %v1770_v3  ;;  %v421_v9 = vld [vmem:[%s2058_s2] sm:$0xff]  ;;  %v422_v10 = vld [vmem:[%s2058_s2 + $0x8] sm:$0xff]  ;;  %1635 = vmatprep.mubr.msk.bf16.mxu0 %vm1771_vm0, %v1770_v3  ;;  %v483_v11 = vpack.c.bf16 %v480_v5, %v479_v2  ;;  %s408_s22 = scalar_lea.vmem %s2057_s1, %s1592_s16  ;;  %s403_s25 = scalar_lea.vmem %s2056_s0, %s1559_s19  ;;  %vm550_vm2 = vcmask 64512   ;;  %v541_v37 = vshrl.u32 %v540_v34, 7 }
   0xe   : > { %1640 = vmatpush3.bf16.msra.mxu1 %v484_v4  ;;  %v425_v12 = vpack.c.bf16 %v422_v10, %v421_v9  ;;  %v418_v13 = vld [vmem:[%s408_s22] sm:$0xff]  ;;  %v419_v14 = vld [vmem:[%s408_s22 + $0x8] sm:$0xff]  ;;  %s411_s14 = scalar_lea.vmem %s2066_s10, %s2069_s18  ;;  %vm632_vm3 = vcmask 130048   ;;  %s1774_s16 = smov 88   ;;  %vm904_vm4 = vcmask 1043456  }
   0xf   : > { %1641 = vmatprep.subr.bf16.mxu1 %v1770_v3  ;;  %1632 = vmatpush3.bf16.msra.mxu0 %v426_v8  ;;  %v1891_v15 = vld [vmem:[%s403_s25] sm:$0xff]  ;;  %v478_v16 = vpack.c.bf16 %v419_v14, %v418_v13  ;;  %v542_v39 = vsub.s32 0, %v541_v37  ;;  %v547_v9 = vld [vmem:[%s2062_s6 + $0x8] sm:$0xff]  ;;  %s415_s24 = scalar_lea.vmem %s2067_s11, %s1559_s19 }
  0x10   : > { %1633 = vmatprep.subr.bf16.mxu0 %v1770_v3  ;;  %v420_v17 = vpack.c.bf16 %v1891_v15, %v1891_v15  ;;  %v1563_v18 = vld [vmem:[%s2059_s3] ss:$0 sm:$0xff]  ;;  %v900_v10 = vpack.c.bf16 %v547_v9, %v547_v9 }
  0x11   : > { %v1565_v24 = vld [vmem:[%s2061_s5] ss:$0 sm:$0xff] }
  0x12   : > { %1642 = vmatpush3.bf16.msra.mxu1 %v483_v11  ;;  %v536_v35 = vld [vmem:[%s411_s14] sm:$0x1]  ;;  %v906_v13 = vsel %vm904_vm4, %v900_v10, 0 }
  0x13   : > { %1634 = vmatpush3.bf16.msra.mxu0 %v425_v12  ;;  %1647 = vmatprep.subr.mxu1 %v1770_v3  ;;  %v537_v36 = vsub.f32 1.0, %v536_v35  ;;  %v546_v2 = vld [vmem:[%s2062_s6] sm:$0xff] }
  0x14   : > { %1661 = vmatprep.subr.mxu0 %v1770_v3  ;;  %v724_v4 = vpack.c.bf16 %v546_v2, %v546_v2 }
  0x15   : > { %1644 = vmatmul.mubr.msk.bf16.vlgmr.msra.gmra.mxu1 %vm434_vm1, %v478_v16  ;;  %v538_v38 = vmul.f32 -10000.0, %v537_v36 }
  0x16   : > { %1636 = vmatmul.mubr.msk.bf16.vlgmr.msra.gmra.mxu0 %vm434_vm1, %v420_v17  ;;  %1651 = vmatprep.mubr.msk.f32.mxu1 %vm1771_vm0, %v1770_v3  ;;  %v952_v5 = vsel %vm904_vm4, %v724_v4, 0 }
  0x17   : > { %1665 = vmatprep.mubr.msk.f32.mxu0 %vm1771_vm0, %v1770_v3  ;;  %v1939_v40 = vrot.slane %v538_v38, %v542_v39 }
  0xd5   : > { %v529_v19 = vpop.f32.mrf.mxu1 }
  0xd6   : > { %v472_v20 = vpop.f32.mrf.mxu0  ;;  %v1918_v30 = vadd.f32 %v1565_v24, %v529_v19 }
  0xd7   : > { %v1645_v21 = vpop.f32.mrf.mxu1  ;;  %v1906_v22 = vadd.f32 %v1563_v18, %v472_v20 }
  0xd8   : > { %v1637_v23 = vpop.f32.mrf.mxu0 }
  0xd9   : > { %v532_v25 = vpop.f32.mrf.mxu1  ;;  %725 = vrot.lane.b32.xlu1 %v1906_v22, %s1772_s30 }
  0xda   : > { %v1912_v26 = vadd.f32 %v1565_v24, %v532_v25  ;;  %v475_v27 = vpop.f32.mrf.mxu0 }
  0xdb   : > { %v1646_v28 = vpop.f32.mrf.mxu1 }
  0xdc   : > { %729 = vrot.lane.b32.xlu0 %v1912_v26, %s1772_s30  ;;  %1648 = vmatpush3.xpose.msk.msra.mxu1 %vm550_vm2, %v1912_v26  ;;  %v1638_v29 = vpop.f32.mrf.mxu0 }
  0xdd   : > { %1649 = vmatprep.subr.mxu1 %v1770_v3 }
  0xe0   : > { %727 = vrot.lane.b32.xlu0 %v1918_v30, %s1772_s30  ;;  %1650 = vmatpush3.xpose.msk.msra.mxu1 %vm550_vm2, %v1918_v30 }
  0xe1   : > { %1654 = vmatprep.subr.mxu1 %v1770_v3 }
  0xe3   : > { %1652 = vmatmul.mubr.msk.f32.vlgmr.msra.gmra.mxu1 %vm550_vm2, %v1906_v22 }
  0xe4   : > { %1658 = vmatprep.mubr.msk.f32.mxu1 %vm1771_vm0, %v1770_v3 }
 0x14b   : > { %v726_v33 = vpop.permute.xlu1 %725 }
 0x14e   : > { %v730_v31 = vpop.permute.xlu0 %729 }
 0x14f   : > { %1662 = vmatpush3.xpose.msk.msra.mxu0 %vm550_vm2, %v730_v31 }
 0x150   : > { %1663 = vmatprep.subr.mxu0 %v1770_v3 }
 0x152   : > { %v728_v32 = vpop.permute.xlu0 %727 }
 0x153   : > { %1664 = vmatpush3.xpose.msk.msra.mxu0 %vm550_vm2, %v728_v32 }
 0x154   : > { %1681 = vmatprep.subr.bf16.mxu0 %v1770_v3 }
 0x156   : > { %1666 = vmatmul.mubr.msk.f32.vlgmr.msra.gmra.mxu0 %vm550_vm2, %v726_v33 }
 0x157   : > { %1683 = vmatprep.mubr.msk.bf16.mxu0 %vm1771_vm0, %v1770_v3  ;;  %1682 = vmatpush3.bf16.msra.mxu0 %v952_v5 }
 0x158   : > { %1694 = vmatprep.subr.mxu0 %v1770_v3 }
 0x1a3   : > { %v626_v41 = vpop.f32.mrf.mxu1 }
 0x1a4   : > { %v630_v42 = vmul.f32 0.35355338, %v626_v41 }
 0x1a5   : > { %v1653_v43 = vpop.f32.mrf.mxu1 }
 0x1a6   : > { %v631_v44 = vadd.f32 %v630_v42, %v1939_v40 }
 0x1a8   : > { %v633_v45 = vsel %vm632_vm3, %v631_v44, -inf }
 0x1a9   : > { %634 = vmax.xlane.f32.xlu1 %v633_v45 }
 0x1ba   : > { %644 = vrot.lane.b32.xlu1 %v1918_v30, %s1773_s15 }
 0x216   : > { %v803_v46 = vpop.f32.mrf.mxu0 }
 0x217   : > { %v807_v47 = vmul.f32 0.35355338, %v803_v46 }
 0x218   : > { %v1667_v48 = vpop.f32.mrf.mxu0 }
 0x219   : > { %v808_v49 = vadd.f32 %v807_v47, %v1939_v40 }
 0x21b   : > { %v809_v50 = vsel %vm632_vm3, %v808_v49, -inf }
 0x21c   : > { %810 = vmax.xlane.f32.xlu0 %v809_v50 }
 0x232   : > { %646 = vrot.lane.b32.xlu0 %v1912_v26, %s1773_s15  ;;  %v635_v51 = vpop.xlane.xlu1 %634 }
 0x233   : > { %v636_v52 = vsub.f32 %v631_v44, %v635_v51 }
 0x235   : > { %v637_v53 = vmul.f32 1.442695, %v636_v52 }
 0x236   : > { %v645_v60 = vpop.permute.xlu1 %644 }
 0x237   : > { %1744 = vpow2.f32 %v637_v53  ;;  %v548_v53 = vld [vmem:[%s2062_s6 + $0x10] sm:$0xff] }
 0x244   : > { %v1745_v54 = vpop.eup %1744 }
 0x245   : > { %v639_v55 = vsel %vm632_vm3, %v1745_v54, 0.0 }
 0x251   : > { %640 = vadd.xlane.f32.xlu0 %v639_v55 }
 0x267   : > { %820 = vrot.lane.b32.xlu0 %v1918_v30, %s1774_s16 }
 0x26b   : > { %996 = vrot.lane.b32.xlu0 %v1918_v30, %s1775_s20 }
 0x2a5   : > { %v811_v56 = vpop.xlane.xlu0 %810 }
 0x2a6   : > { %v812_v57 = vsub.f32 %v808_v49, %v811_v56 }
 0x2a8   : > { %v813_v58 = vmul.f32 1.442695, %v812_v57 }
 0x2a9   : > { %v647_v59 = vpop.permute.xlu0 %646 }
 0x2aa   : > { %1746 = vpow2.f32 %v813_v58  ;;  %1655 = vmatpush3.msra.mxu1 %v647_v59 }
 0x2ab   : > { %1656 = vmatprep.subr.mxu1 %v1770_v3 }
 0x2ac   : > { %1657 = vmatpush3.msra.mxu1 %v645_v60 }
 0x2ad   : > { %1668 = vmatprep.subr.mxu1 %v1770_v3 }
 0x2b7   : > { %v1747_v61 = vpop.eup %1746 }
 0x2b8   : > { %v815_v62 = vsel %vm632_vm3, %v1747_v61, 0.0 }
 0x2b9   : > { %816 = vadd.xlane.f32.xlu1 %v815_v62 }
 0x2ca   : > { %822 = vrot.lane.b32.xlu1 %v1912_v26, %s1774_s16 }
 0x2ce   : > { %998 = vrot.lane.b32.xlu1 %v1912_v26, %s1775_s20 }
 0x2d2   : > { %994 = vrot.lane.b32.xlu1 %v1906_v22, %s1775_s20 }
 0x2d6   : > { %1089 = vrot.lane.b32.xlu1 %v1918_v30, %s1776_s21 }
 0x2da   : > { %v641_v63 = vpop.xlane.xlu0 %640 }
 0x2db   : > { %1748 = vrcp.f32 %v641_v63 }
 0x2de   : > { %v821_v8 = vpop.permute.xlu0 %820 }
 0x2e2   : > { %v997_v23 = vpop.permute.xlu0 %996 }
 0x2e8   : > { %v1749_v0 = vpop.eup %1748 }
 0x2e9   : > { %v643_v1 = vmul.f32 %v1749_v0, %v1745_v54  ;;  %v1169_v54 = vpack.c.bf16 %v548_v53, %v548_v53 }
 0x2eb   : > { %1659 = vmatmul.mubr.msk.f32.vlgmr.msra.gmra.mxu1 %vm632_vm3, %v643_v1  ;;  %v1174_v55 = vsel %vm904_vm4, %v1169_v54, 0 }
 0x2ec   : > { %1672 = vmatprep.mubr.msk.f32.mxu1 %vm1771_vm0, %v1770_v3 }
 0x342   : > { %v817_v6 = vpop.xlane.xlu1 %816 }
 0x343   : > { %1750 = vrcp.f32 %v817_v6 }
 0x346   : > { %v823_v7 = vpop.permute.xlu1 %822 }
 0x347   : > { %1669 = vmatpush3.msra.mxu1 %v823_v7 }
 0x348   : > { %1670 = vmatprep.subr.mxu1 %v1770_v3 }
 0x349   : > { %1671 = vmatpush3.msra.mxu1 %v821_v8 }
 0x34a   : > { %1675 = vmatprep.subr.bf16.mxu1 %v1770_v3  ;;  %v999_v21 = vpop.permute.xlu1 %998 }
 0x34e   : > { %v995_v24 = vpop.permute.xlu1 %994 }
 0x350   : > { %v1751_v11 = vpop.eup %1750 }
 0x351   : > { %v819_v12 = vmul.f32 %v1751_v11, %v1747_v61 }
 0x352   : > { %v1090_v45 = vpop.permute.xlu1 %1089 }
 0x353   : > { %1673 = vmatmul.mubr.msk.f32.vlgmr.msra.gmra.mxu1 %vm632_vm3, %v819_v12 }
 0x354   : > { %1676 = vmatpush3.bf16.msra.mxu1 %v906_v13  ;;  %1677 = vmatprep.mubr.msk.bf16.mxu1 %vm1771_vm0, %v1770_v3 }
 0x355   : > { %1687 = vmatprep.subr.mxu1 %v1770_v3 }
 0x3ab   : > { %v719_v14 = vpop.f32.mrf.mxu1 }
 0x3ac   : > { %v723_v16 = vpack.c.bf16 %v719_v14, %v719_v14 }
 0x3ad   : > { %v1660_v17 = vpop.f32.mrf.mxu1 }
 0x3ae   : > { %1684 = vmatmul.mubr.msk.bf16.vlgmr.msra.gmra.mxu0 %vm550_vm2, %v723_v16 }
 0x3af   : > { %1698 = vmatprep.mubr.msk.f32.mxu0 %vm1771_vm0, %v1770_v3 }
 0x413   : > { %v895_v18 = vpop.f32.mrf.mxu1 }
 0x414   : > { %v899_v19 = vpack.c.bf16 %v895_v18, %v895_v18 }
 0x415   : > { %v1674_v20 = vpop.f32.mrf.mxu1 }
 0x416   : > { %1678 = vmatmul.mubr.msk.bf16.vlgmr.msra.gmra.mxu1 %vm550_vm2, %v899_v19 }
 0x417   : > { %1688 = vmatpush3.xpose.msk.msra.mxu1 %vm550_vm2, %v999_v21  ;;  %1691 = vmatprep.mubr.msk.f32.mxu1 %vm1771_vm0, %v1770_v3 }
 0x418   : > { %1689 = vmatprep.subr.mxu1 %v1770_v3 }
 0x41b   : > { %1690 = vmatpush3.xpose.msk.msra.mxu1 %vm550_vm2, %v997_v23 }
 0x41c   : > { %1701 = vmatprep.subr.bf16.mxu1 %v1770_v3 }
 0x41e   : > { %1692 = vmatmul.mubr.msk.f32.vlgmr.msra.gmra.mxu1 %vm550_vm2, %v995_v24 }
 0x41f   : > { %1703 = vmatprep.mubr.msk.bf16.mxu1 %vm1771_vm0, %v1770_v3  ;;  %1702 = vmatpush3.bf16.msra.mxu1 %v1174_v55 }
 0x420   : > { %1714 = vmatprep.subr.mxu1 %v1770_v3 }
 0x46e   : > { %v1989_v25 = vpop.f32.mrf.mxu0 }
 0x470   : > { %v1685_v27 = vpop.f32.mrf.mxu0 }
 0x472   : > { %v991_v28 = vpop.f32.mrf.mxu0 }
 0x474   : > { %v1686_v29 = vpop.f32.mrf.mxu0 }
 0x4d6   : > { %v1991_v31 = vpop.f32.mrf.mxu1 }
 0x4d7   : > { %v989_v6 = vadd.f32 %v1989_v25, %v1991_v31 }
 0x4d8   : > { %v1679_v32 = vpop.f32.mrf.mxu1 }
 0x4da   : > { %v945_v33 = vpop.f32.mrf.mxu1 }
 0x4dc   : > { %v1680_v34 = vpop.f32.mrf.mxu1 }
 0x4de   : > { %v1072_v35 = vpop.f32.mrf.mxu1 }
 0x4df   : > { %v1076_v36 = vmul.f32 0.35355338, %v1072_v35 }
 0x4e0   : > { %v1693_v37 = vpop.f32.mrf.mxu1 }
 0x4e1   : > { %v1077_v38 = vadd.f32 %v1076_v36, %v1939_v40 }
 0x4e3   : > { %v1078_v39 = vsel %vm632_vm3, %v1077_v38, -inf }
 0x4e4   : > { %1079 = vmax.xlane.f32.xlu0 %v1078_v39 }
 0x4fa   : > { %1091 = vrot.lane.b32.xlu0 %v1912_v26, %s1776_s21 }
 0x4fe   : > { %1221 = vrot.lane.b32.xlu0 %v1912_v26, %s1777_s26 }
 0x502   : > { %1217 = vrot.lane.b32.xlu0 %v1906_v22, %s1777_s26 }
 0x56d   : > { %v1080_v41 = vpop.xlane.xlu0 %1079 }
 0x56e   : > { %v1081_v42 = vsub.f32 %v1077_v38, %v1080_v41 }
 0x570   : > { %v1082_v43 = vmul.f32 1.442695, %v1081_v42 }
 0x571   : > { %v1092_v44 = vpop.permute.xlu0 %1091 }
 0x572   : > { %1752 = vpow2.f32 %v1082_v43  ;;  %1695 = vmatpush3.msra.mxu0 %v1092_v44  ;;  %v1589_v43 = vld [vmem:[%s2065_s9] ss:$0 sm:$0xff] }
 0x573   : > { %1696 = vmatprep.subr.mxu0 %v1770_v3 }
 0x574   : > { %1697 = vmatpush3.msra.mxu0 %v1090_v45 }
 0x575   : > { %1707 = vmatprep.subr.mxu0 %v1770_v3  ;;  %v1222_v50 = vpop.permute.xlu0 %1221 }
 0x579   : > { %v1218_v52 = vpop.permute.xlu0 %1217 }
 0x57f   : > { %v1753_v46 = vpop.eup %1752 }
 0x580   : > { %v1084_v47 = vsel %vm632_vm3, %v1753_v46, 0.0 }
 0x581   : > { %1085 = vadd.xlane.f32.xlu1 %v1084_v47 }
 0x592   : > { %1219 = vrot.lane.b32.xlu1 %v1918_v30, %s1777_s26 }
 0x60a   : > { %v1086_v48 = vpop.xlane.xlu1 %1085 }
 0x60b   : > { %1754 = vrcp.f32 %v1086_v48 }
 0x60e   : > { %v1220_v51 = vpop.permute.xlu1 %1219 }
 0x618   : > { %v1755_v22 = vpop.eup %1754 }
 0x619   : > { %v1088_v49 = vmul.f32 %v1755_v22, %v1753_v46 }
 0x61b   : > { %1699 = vmatmul.mubr.msk.f32.vlgmr.msra.gmra.mxu0 %vm632_vm3, %v1088_v49 }
 0x61c   : > { %1708 = vmatpush3.xpose.msk.msra.mxu0 %vm550_vm2, %v1222_v50  ;;  %1711 = vmatprep.mubr.msk.f32.mxu0 %vm1771_vm0, %v1770_v3 }
 0x61d   : > { %1709 = vmatprep.subr.mxu0 %v1770_v3 }
 0x620   : > { %1710 = vmatpush3.xpose.msk.msra.mxu0 %vm550_vm2, %v1220_v51 }
 0x621   : > { %1721 = vmatprep.subr.bf16.mxu0 %v1770_v3 }
 0x623   : > { %1712 = vmatmul.mubr.msk.f32.vlgmr.msra.gmra.mxu0 %vm550_vm2, %v1218_v52 }
 0x624   : > { %1723 = vmatprep.mubr.msk.bf16.mxu0 %vm1771_vm0, %v1770_v3 }
 0x6db   : > { %v1164_v56 = vpop.f32.mrf.mxu0 }
 0x6dc   : > { %v1168_v57 = vpack.c.bf16 %v1164_v56, %v1164_v56 }
 0x6dd   : > { %v1700_v58 = vpop.f32.mrf.mxu0 }
 0x6de   : > { %1704 = vmatmul.mubr.msk.bf16.vlgmr.msra.gmra.mxu1 %vm550_vm2, %v1168_v57 }
 0x6df   : > { %1718 = vmatprep.mubr.msk.f32.mxu1 %vm1771_vm0, %v1770_v3 }
 0x6e3   : > { %v1295_v59 = vpop.f32.mrf.mxu0 }
 0x6e4   : > { %v1299_v60 = vmul.f32 0.35355338, %v1295_v59 }
 0x6e5   : > { %v1713_v61 = vpop.f32.mrf.mxu0 }
 0x6e6   : > { %v1300_v62 = vadd.f32 %v1299_v60, %v1939_v40 }
 0x6e8   : > { %v1301_v63 = vsel %vm632_vm3, %v1300_v62, -inf }
 0x6e9   : > { %1302 = vmax.xlane.f32.xlu1 %v1301_v63 }
 0x6fa   : > { %1312 = vrot.lane.b32.xlu1 %v1918_v30, %s1778_s29 }
 0x772   : > { %v1303_v0 = vpop.xlane.xlu1 %1302 }
 0x773   : > { %v1304_v1 = vsub.f32 %v1300_v62, %v1303_v0 }
 0x775   : > { %v1305_v2 = vmul.f32 1.442695, %v1304_v1 }
 0x776   : > { %v1313_v12 = vpop.permute.xlu1 %1312 }
 0x777   : > { %1756 = vpow2.f32 %v1305_v2 }
 0x784   : > { %v1757_v4 = vpop.eup %1756 }
 0x785   : > { %v1307_v5 = vsel %vm632_vm3, %v1757_v4, 0.0 }
 0x786   : > { %1308 = vadd.xlane.f32.xlu0 %v1307_v5 }
 0x79c   : > { %1314 = vrot.lane.b32.xlu0 %v1912_v26, %s1778_s29  ;;  %v549_v26 = vld [vmem:[%s2062_s6 + $0x18] sm:$0xff] }
 0x79d   : > { %v1392_v16 = vpack.c.bf16 %v549_v26, %v549_v26 }
 0x79e   : > { %v1210_v40 = vpop.f32.mrf.mxu1 }
 0x79f   : > { %v1216_v7 = vadd.f32 %v1210_v40, %v989_v6  ;;  %v1397_v17 = vsel %vm904_vm4, %v1392_v16, 0 }
 0x7a0   : > { %v1705_v8 = vpop.f32.mrf.mxu1  ;;  %1722 = vmatpush3.bf16.msra.mxu0 %v1397_v17 }
 0x7a2   : > { %v1213_v9 = vpop.f32.mrf.mxu1 }
 0x7a4   : > { %v1706_v10 = vpop.f32.mrf.mxu1 }
 0x80f   : > { %v1309_v11 = vpop.xlane.xlu0 %1308 }
 0x810   : > { %1758 = vrcp.f32 %v1309_v11 }
 0x813   : > { %v1315_v30 = vpop.permute.xlu0 %1314 }
 0x814   : > { %1715 = vmatpush3.msra.mxu1 %v1315_v30 }
 0x815   : > { %1716 = vmatprep.subr.mxu1 %v1770_v3  ;;  %v1587_v3 = vld [vmem:[%s2063_s7] ss:$0 sm:$0xff] }
 0x816   : > { %1717 = vmatpush3.msra.mxu1 %v1313_v12 }
 0x81d   : > { %v1759_v13 = vpop.eup %1758 }
 0x81e   : > { %v1311_v14 = vmul.f32 %v1759_v13, %v1757_v4 }
 0x820   : > { %1719 = vmatmul.mubr.msk.f32.vlgmr.msra.gmra.mxu1 %vm632_vm3, %v1311_v14 }
 0x8e0   : > { %v1387_v18 = vpop.f32.mrf.mxu1 }
 0x8e1   : > { %v1391_v19 = vpack.c.bf16 %v1387_v18, %v1387_v18 }
 0x8e2   : > { %v1720_v20 = vpop.f32.mrf.mxu1 }
 0x8e3   : > { %1724 = vmatmul.mubr.msk.bf16.vlgmr.msra.gmra.mxu0 %vm550_vm2, %v1391_v19 }
 0x9a3   : > { %v1433_v21 = vpop.f32.mrf.mxu0 }
 0x9a4   : > { %v1439_v23 = vadd.f32 %v1433_v21, %v1216_v7 }
 0x9a5   : > { %v1725_v24 = vpop.f32.mrf.mxu0 }
 0x9a6   : > { %v1447_v25 = vadd.f32 %v1587_v3, %v1439_v23 }
 0x9a7   : > { %v1436_v27 = vpop.f32.mrf.mxu0 }
 0x9a8   : > { %v1448_v28 = vadd.f32 %v1447_v25, %v1891_v15  ;;  %v1588_v15 = vld [vmem:[%s2064_s8] ss:$0 sm:$0xff] }
 0x9a9   : > { %v1726_v29 = vpop.f32.mrf.mxu0 }
 0x9aa   : > { %v1451_v31 = vsel %vm434_vm1, %v1448_v28, 0.0 }
 0x9ab   : > { %1452 = vadd.xlane.f32.xlu1 %v1451_v31 }
 0xa34   : > { %v1453_v32 = vpop.xlane.xlu1 %1452 }
 0xa35   : > { %v1455_v33 = vmul.f32 0.03125, %v1453_v32 }
 0xa37   : > { %v1456_v34 = vsub.f32 %v1448_v28, %v1455_v33 }
 0xa39   : > { %v1457_v35 = vmul.f32 %v1456_v34, %v1456_v34 }
 0xa3b   : > { %v1458_v36 = vsel %vm434_vm1, %v1457_v35, 0.0 }
 0xa3c   : > { %1459 = vadd.xlane.f32.xlu0 %v1458_v36 }
 0xac5   : > { %v1460_v37 = vpop.xlane.xlu0 %1459 }
 0xac6   : > { %v1461_v38 = vmul.f32 0.03125, %v1460_v37 }
 0xac8   : > { %v1462_v39 = vadd.f32 1e-05, %v1461_v38 }
 0xaca   : > { %1760 = vrsqrt.f32 %v1462_v39 }
 0xad7   : > { %v1761_v41 = vpop.eup %1760 }
 0xad8   : > { %v1464_v42 = vmul.f32 %v1761_v41, %v1456_v34 }
 0xada   : > { %v1471_v44 = vmul.f32 %v1588_v15, %v1464_v42 }
 0xadc   : > { %v1478_v45 = vadd.f32 %v1589_v43, %v1471_v44 }
 0xade   : > { %1479 = vst.msk [vmem:[%s415_s24] sm:$0xff] %vm434_vm1, %v1478_v45 }
 0xadf PF: > { %s21_s17 = sadd.s32 1, %s1768_s17  }
 0xae0   : > { %p18_p4 = scmp.ge.s32.totalorder %s21_s17, 4  }
 0xae2   :  { %20 = sbr.rel (!%p18_p4) target bundleno = 1 (0x1), region = 100 }

</bundles_post_ra>
